<compile_context>
chip_gen: v6e
topology: v6e:2x2x1
jax: 0.10.0
libtpu: 0.0.40
codegen_flags: <defaults>
</compile_context>

<pallas_src>
import functools
import math

import jax
import jax.numpy as jnp
from jax import lax
from jax.experimental import pallas as pl
from jax.experimental.pallas import tpu as pltpu


_VMEM = pl.BlockSpec(memory_space=pltpu.MemorySpace.VMEM)


# ----------------------------------------------------------------------------
# Fused kernel: BiLSTM layer 0 -> BiLSTM layer 1 -> Linear/ReLU/Linear/ReLU
# ----------------------------------------------------------------------------
def _double_lstm_kernel(x_ref,
                        wih0_ref, whh0_ref, b0_ref, h00_ref, c00_ref,
                        wih1_ref, whh1_ref, b1_ref, h01_ref, c01_ref,
                        wd1_ref, bd1_ref, wd2_ref, bd2_ref,
                        out_ref,
                        gin_ref, act_ref,
                        *, seq_len, batch, hidden):
    """x_ref: (T*Bp, E) time-major bf16 slab. out_ref: (T*Bp, OCp) f32."""
    T, Bp, H = seq_len, batch, hidden
    H2, H8 = 2 * H, 8 * H

    # Gate column layout (width H each): [i_f,i_b, f_f,f_b, g_f,g_b, o_f,o_b]
    lane = lax.broadcasted_iota(jnp.int32, (Bp, H8), 1)
    fwd_mask = (lane % H2) < H        # first H of every 2H block = forward dir

    def run_layer(x2d, wih, b, whh, h0, c0):
        # (1) Hoisted input projection for ALL timesteps, both directions,
        #     bias folded in. One wide bf16 MXU matmul, f32 accumulation,
        #     stored as a bf16 slab.
        gin_ref[...] = (jnp.dot(x2d, wih, preferred_element_type=jnp.float32)
                        + b).astype(jnp.bfloat16)

        # (2) Hoisted fwd/bwd blend (OFF the serial path): after this pass,
        #     row t holds fwd gates from time t and bwd gates from time T-1-t,
        #     so each recurrent step does ONE contiguous load, no select.
        #     Pairs (t, T-1-t) are swapped in place, so no extra scratch.
        half = (T + 1) // 2

        def blend(t, _):
            rf = pl.multiple_of(t * Bp, 8)
            rb = pl.multiple_of((T - 1 - t) * Bp, 8)
            a = gin_ref[pl.ds(rf, Bp), :]
            bk = gin_ref[pl.ds(rb, Bp), :]
            gin_ref[pl.ds(rf, Bp), :] = jnp.where(fwd_mask, a, bk)
            gin_ref[pl.ds(rb, Bp), :] = jnp.where(fwd_mask, bk, a)
            return 0

        lax.fori_loop(0, half, blend, 0, unroll=True if half <= 16 else 8)

        # (3) Serial recurrence: a single fused bf16 (Bp,2H) x (2H,8H)
        #     block-diagonal matmul per step covers both directions.
        def step(s, carry):
            h_cat, c_cat = carry                       # (Bp, 2H) f32 each
            row_f = pl.multiple_of(s * Bp, 8)
            row_b = pl.multiple_of((T - 1 - s) * Bp, 8)
            gin = gin_ref[pl.ds(row_f, Bp), :].astype(jnp.float32)   # (Bp, 8H)
            gates = gin + jnp.dot(h_cat.astype(jnp.bfloat16), whh,
                                  preferred_element_type=jnp.float32)
            # Narrow transcendentals: sigmoid on [i|f] (4H) and o (2H),
            # tanh only on g (2H).
            if_act = jax.nn.sigmoid(gates[:, 0:2 * H2])
            g_act = jnp.tanh(gates[:, 2 * H2:3 * H2])
            o_act = jax.nn.sigmoid(gates[:, 3 * H2:4 * H2])
            i_g = if_act[:, 0:H2]
            f_g = if_act[:, H2:2 * H2]
            c_new = f_g * c_cat + i_g * g_act
            h_new = o_act * jnp.tanh(c_new)
            # single fused output slab: [:, :H] = fwd@s, [:, H:] = bwd@(T-1-s)
            act_ref[pl.ds(row_f, Bp), 0:H] = h_new[:, 0:H].astype(jnp.bfloat16)
            act_ref[pl.ds(row_b, Bp), H:H2] = h_new[:, H:H2].astype(jnp.bfloat16)
            return h_new, c_new

        lax.fori_loop(0, T, step, (h0, c0),
                      unroll=True if T <= 16 else 8)

    # Layer 0 (input = embeddings), Layer 1 (input = layer-0 output).
    # NOTE: layer 1's input projection reads the FULL act slab before the
    # layer-1 step loop overwrites it -- keep the gin matmul un-chunked (or
    # switch to ping-pong act scratch if it is ever chunked).
    run_layer(x_ref[...], wih0_ref[...], b0_ref[...], whh0_ref[...],
              h00_ref[...], c00_ref[...])
    run_layer(act_ref[...], wih1_ref[...], b1_ref[...], whh1_ref[...],
              h01_ref[...], c01_ref[...])

    # Dense head: Linear -> ReLU -> Linear -> ReLU, tiled over row chunks.
    wd1 = wd1_ref[...]
    wd2 = wd2_ref[...]
    bd1 = bd1_ref[...]
    bd2 = bd2_ref[...]
    t_chunk = max(1, min(T, 512 // Bp))
    for t0 in range(0, T, t_chunk):
        nt = min(t_chunk, T - t0)
        r0, nr = t0 * Bp, nt * Bp
        a = act_ref[pl.ds(r0, nr), :]
        h1 = jnp.maximum(
            jnp.dot(a, wd1, preferred_element_type=jnp.float32) + bd1, 0.0)
        out_ref[pl.ds(r0, nr), :] = jnp.maximum(
            jnp.dot(h1.astype(jnp.bfloat16), wd2,
                    preferred_element_type=jnp.float32) + bd2, 0.0)


# ----------------------------------------------------------------------------
# Wrapper
# ----------------------------------------------------------------------------
def double_lstm_forward(params, x):
    """x: (B, T, E) batch-first (like PyTorch). Returns (B, T, out_class)."""
    B, T, E = x.shape
    H = params["l0"]["whh"].shape[0] // 2          # static (from array shape)
    OC = params["dense"]["w2"].shape[1]

    Bp = max(8, ((B + 7) // 8) * 8)                # sublane-dense batch
    OCp = max(128, ((OC + 127) // 128) * 128)      # lane-dense kernel output

    # Time-major, batch-padded, flattened to a 2D bf16 slab.
    x_tm = jnp.transpose(x, (1, 0, 2))                         # (T, B, E)
    x_tm = jnp.pad(x_tm, ((0, 0), (0, Bp - B), (0, 0)))
    x2d = x_tm.reshape(T * Bp, E).astype(jnp.bfloat16)

    # Initial states: (4, batch_max, H) -> per-layer concatenated (Bp, 2H) f32.
    h0 = jnp.pad(params["fst_h"][:, :B, :], ((0, 0), (0, Bp - B), (0, 0)))
    c0 = jnp.pad(params["fst_c"][:, :B, :], ((0, 0), (0, Bp - B), (0, 0)))
    h00 = jnp.concatenate([h0[0], h0[1]], axis=-1)
    c00 = jnp.concatenate([c0[0], c0[1]], axis=-1)
    h01 = jnp.concatenate([h0[2], h0[3]], axis=-1)
    c01 = jnp.concatenate([c0[2], c0[3]], axis=-1)

    # Pad the final linear to a lane-dense output width.
    wd2 = jnp.pad(params["dense"]["w2"], ((0, 0), (0, OCp - OC)))
    bd2 = jnp.pad(params["dense"]["b2"], ((0, 0), (0, OCp - OC)))

    # --- VMEM sizing & cost estimate (all Python ints; shapes are static) ---
    rows = T * Bp
    bytes_bf16 = 2
    vmem_needed = (
        rows * E * bytes_bf16                    # x slab
        + rows * 8 * H * bytes_bf16              # gin scratch
        + rows * 2 * H * bytes_bf16              # act scratch
        + rows * OCp * 4                         # f32 output
        + (E * 8 * H + 2 * (2 * H * 8 * H)       # wih0, whh0, whh1
           + 2 * H * 8 * H                       # wih1
           + 2 * H * 6 * H + 6 * H * OCp) * bytes_bf16   # dense weights
        + (2 * 8 * H + 4 * Bp * 2 * H + 6 * H + OCp) * 4  # biases + states
    )
    vmem_limit = int(min(max(2 * vmem_needed + (4 << 20), 16 << 20), 128 << 20))

    flops = 2 * rows * (E * 8 * H          # layer-0 input projection
                        + 2 * H * 8 * H    # layer-0 recurrence
                        + 2 * H * 8 * H    # layer-1 input projection
                        + 2 * H * 8 * H    # layer-1 recurrence
                        + 2 * H * 6 * H    # dense 1
                        + 6 * H * OCp)     # dense 2
    transcendentals = 2 * rows * 10 * H
    bytes_accessed = (rows * E * bytes_bf16 + rows * OCp * 4
                      + (E + 6 * H) * 8 * H * bytes_bf16
                      + (2 * H * 6 * H + 6 * H * OCp) * bytes_bf16
                      + 4 * Bp * 2 * H * 4)

    kernel = functools.partial(_double_lstm_kernel,
                               seq_len=T, batch=Bp, hidden=H)
    out2d = pl.pallas_call(
        kernel,
        out_shape=jax.ShapeDtypeStruct((T * Bp, OCp), jnp.float32),
        in_specs=[_VMEM] * 15,
        out_specs=_VMEM,
        scratch_shapes=[pltpu.VMEM((T * Bp, 8 * H), jnp.bfloat16),   # gate slab
                        pltpu.VMEM((T * Bp, 2 * H), jnp.bfloat16)],  # activations
        compiler_params=pltpu.CompilerParams(vmem_limit_bytes=vmem_limit),
        cost_estimate=pl.CostEstimate(flops=int(flops),
                                      transcendentals=int(transcendentals),
                                      bytes_accessed=int(bytes_accessed)),
    )(x2d,
      params["l0"]["wih"], params["l0"]["whh"], params["l0"]["b"], h00, c00,
      params["l1"]["wih"], params["l1"]["whh"], params["l1"]["b"], h01, c01,
      params["dense"]["w1"], params["dense"]["b1"], wd2, bd2)

    y = out2d.reshape(T, Bp, OCp)
    return jnp.transpose(y, (1, 0, 2))[:B, :, :OC]


# ----------------------------------------------------------------------------
# Parameters: raw (PyTorch layout, for the pure-JAX reference) + packed (kernel)
# ----------------------------------------------------------------------------
def _uniform(key, shape, bound):
    return jax.random.uniform(key, shape, jnp.float32, -bound, bound)


def make_raw_params(key, batch_size, out_class, emb_size, hidden_size):
    H = hidden_size
    bound = 1.0 / math.sqrt(H)
    keys = list(jax.random.split(key, 24))
    it = iter(keys)

    def lstm_dir(input_size):
        return {"wih": _uniform(next(it), (4 * H, input_size), bound),
                "whh": _uniform(next(it), (4 * H, H), bound),
                "bih": _uniform(next(it), (4 * H,), bound),
                "bhh": _uniform(next(it), (4 * H,), bound)}

    raw = {
        "fst_h": jax.random.normal(next(it), (4, batch_size, H), jnp.float32),
        "fst_c": jax.random.normal(next(it), (4, batch_size, H), jnp.float32),
        "l0": {"f": lstm_dir(emb_size), "b": lstm_dir(emb_size)},
        "l1": {"f": lstm_dir(2 * H), "b": lstm_dir(2 * H)},
    }
    b1_bound = 1.0 / math.sqrt(2 * H)
    b2_bound = 1.0 / math.sqrt(6 * H)
    raw["dense"] = {
        "w1": _uniform(next(it), (6 * H, 2 * H), b1_bound),
        "b1": _uniform(next(it), (6 * H,), b1_bound),
        "w2": _uniform(next(it), (out_class, 6 * H), b2_bound),
        "b2": _uniform(next(it), (out_class,), b2_bound),
    }
    return raw


def _interleave_gate_cols(a, b, H):
    """a,b: (D, 4H) with gate blocks [i|f|g|o] -> (D, 8H) [i_f,i_b,f_f,f_b,...]."""
    D = a.shape[0]
    return jnp.stack([a.reshape(D, 4, H), b.reshape(D, 4, H)],
                     axis=2).reshape(D, 8 * H)


def _pack_bilstm_layer(dir_f, dir_b, H):
    wih_f, wih_b = dir_f["wih"].T, dir_b["wih"].T            # (D_in, 4H)
    whh_f, whh_b = dir_f["whh"].T, dir_b["whh"].T            # (H, 4H)
    b_f = (dir_f["bih"] + dir_f["bhh"])[None, :]             # (1, 4H)
    b_b = (dir_b["bih"] + dir_b["bhh"])[None, :]
    wih = _interleave_gate_cols(wih_f, wih_b, H)             # (D_in, 8H)
    b = _interleave_gate_cols(b_f, b_b, H)                   # (1, 8H)
    whh = jnp.concatenate(                                   # block-diag (2H, 8H)
        [_interleave_gate_cols(whh_f, jnp.zeros_like(whh_f), H),
         _interleave_gate_cols(jnp.zeros_like(whh_b), whh_b, H)], axis=0)
    # bf16 weights (MXU-native), f32 bias (added to f32 accumulation).
    return {"wih": wih.astype(jnp.bfloat16),
            "whh": whh.astype(jnp.bfloat16),
            "b": b.astype(jnp.float32)}


def pack_params(raw, hidden_size):
    H = hidden_size
    return {
        "fst_h": raw["fst_h"],
        "fst_c": raw["fst_c"],
        "l0": _pack_bilstm_layer(raw["l0"]["f"], raw["l0"]["b"], H),
        "l1": _pack_bilstm_layer(raw["l1"]["f"], raw["l1"]["b"], H),
        "dense": {"w1": raw["dense"]["w1"].T.astype(jnp.bfloat16),
                  "b1": raw["dense"]["b1"][None, :].astype(jnp.float32),
                  "w2": raw["dense"]["w2"].T.astype(jnp.bfloat16),
                  "b2": raw["dense"]["b2"][None, :].astype(jnp.float32)},
    }


# ----------------------------------------------------------------------------
# Pure-JAX reference (PyTorch eval-mode semantics) for correctness checking
# ----------------------------------------------------------------------------
def reference_forward(raw, x):
    B, T, E = x.shape
    h0 = raw["fst_h"][:, :B, :]
    c0 = raw["fst_c"][:, :B, :]

    def run_dir(x_seq, p, h, c, reverse):
        def step(carry, x_t):
            h, c = carry
            gates = x_t @ p["wih"].T + h @ p["whh"].T + p["bih"] + p["bhh"]
            i, f, g, o = jnp.split(gates, 4, axis=-1)
            c = jax.nn.sigmoid(f) * c + jax.nn.sigmoid(i) * jnp.tanh(g)
            h = jax.nn.sigmoid(o) * jnp.tanh(c)
            return (h, c), h
        _, ys = lax.scan(step, (h, c), x_seq, reverse=reverse)
        return ys

    x_tm = jnp.transpose(x, (1, 0, 2))
    o1 = jnp.concatenate(
        [run_dir(x_tm, raw["l0"]["f"], h0[0], c0[0], False),
         run_dir(x_tm, raw["l0"]["b"], h0[1], c0[1], True)], axis=-1)
    o2 = jnp.concatenate(
        [run_dir(o1, raw["l1"]["f"], h0[2], c0[2], False),
         run_dir(o1, raw["l1"]["b"], h0[3], c0[3], True)], axis=-1)
    d = raw["dense"]
    h1 = jnp.maximum(o2 @ d["w1"].T + d["b1"], 0.0)
    y = jnp.maximum(h1 @ d["w2"].T + d["b2"], 0.0)
    return jnp.transpose(y, (1, 0, 2))


# ----------------------------------------------------------------------------
if __name__ == "__main__":
    SEQ, BATCH, EMB, HIDDEN, OUT_CLASS = 8, 2, 32, 32, 8

    key = jax.random.PRNGKey(0)
    k_params, k_x = jax.random.split(key)
    raw = make_raw_params(k_params, BATCH, OUT_CLASS, EMB, HIDDEN)
    params = pack_params(raw, HIDDEN)
    x = jax.random.normal(k_x, (BATCH, SEQ, EMB), jnp.float32)

    fwd = jax.jit(double_lstm_forward)
    out = fwd(params, x)
    jax.block_until_ready(out)

    assert out.shape == (BATCH, SEQ, OUT_CLASS), out.shape
    assert out.dtype == jnp.float32
    assert bool(jnp.all(jnp.isfinite(out)))
    assert bool(jnp.all(out >= 0.0))  # final ReLU

    ref = reference_forward(raw, x)
    err = float(jnp.max(jnp.abs(out - ref)))
    # bf16 matmul operands with f32 accumulation; f32 state math keeps the
    # error comfortably inside this tolerance at these shapes.
    assert err < 5e-2, f"max abs error vs reference: {err}"
    print("KERNEL_OK")
</pallas_src>

<mosaic_0001>
module attributes {stable_mosaic.version = 11 : i64} {
  func.func @_double_lstm_kernel(%arg0: memref<64x32xbf16, #tpu.memory_space<vmem>>, %arg1: memref<32x256xbf16, #tpu.memory_space<vmem>>, %arg2: memref<64x256xbf16, #tpu.memory_space<vmem>>, %arg3: memref<1x256xf32, #tpu.memory_space<vmem>>, %arg4: memref<8x64xf32, #tpu.memory_space<vmem>>, %arg5: memref<8x64xf32, #tpu.memory_space<vmem>>, %arg6: memref<64x256xbf16, #tpu.memory_space<vmem>>, %arg7: memref<64x256xbf16, #tpu.memory_space<vmem>>, %arg8: memref<1x256xf32, #tpu.memory_space<vmem>>, %arg9: memref<8x64xf32, #tpu.memory_space<vmem>>, %arg10: memref<8x64xf32, #tpu.memory_space<vmem>>, %arg11: memref<64x192xbf16, #tpu.memory_space<vmem>>, %arg12: memref<1x192xf32, #tpu.memory_space<vmem>>, %arg13: memref<192x128xbf16, #tpu.memory_space<vmem>>, %arg14: memref<1x128xf32, #tpu.memory_space<vmem>>, %arg15: memref<64x128xf32, #tpu.memory_space<vmem>>, %arg16: memref<64x256xbf16, #tpu.memory_space<vmem>>, %arg17: memref<64x64xbf16, #tpu.memory_space<vmem>>) attributes {dimension_semantics = [], scalar_prefetch = 0 : i64, scratch_operands = 2 : i64, tpu.core_type = #tpu.core_type<tc>} {
    %0 = tpu.iota {dimensions = array<i32: 1>} : vector<8x256xi32>
    %c64_i32 = arith.constant 64 : i32
    %c0_i32 = arith.constant 0 : i32
    %1 = arith.cmpi eq, %c64_i32, %c0_i32 : i32
    %c1_i32 = arith.constant 1 : i32
    %2 = arith.select %1, %c1_i32, %c64_i32 : i32
    %3 = vector.broadcast %2 : i32 to vector<8x256xi32>
    %4 = arith.remsi %0, %3 : vector<8x256xi32>
    %c0_i32_0 = arith.constant 0 : i32
    %5 = vector.broadcast %c0_i32_0 : i32 to vector<8x256xi32>
    %6 = arith.cmpi ne, %4, %5 : vector<8x256xi32>
    %c0_i32_1 = arith.constant 0 : i32
    %7 = vector.broadcast %c0_i32_1 : i32 to vector<8x256xi32>
    %8 = arith.cmpi slt, %4, %7 : vector<8x256xi32>
    %c0_i32_2 = arith.constant 0 : i32
    %9 = arith.cmpi slt, %2, %c0_i32_2 : i32
    %10 = vector.broadcast %9 : i1 to vector<8x256xi1>
    %11 = vector.broadcast %10 : vector<8x256xi1> to vector<8x256xi1>
    %12 = arith.xori %8, %11 : vector<8x256xi1>
    %13 = arith.andi %12, %6 : vector<8x256xi1>
    %14 = vector.broadcast %2 : i32 to vector<8x256xi32>
    %15 = arith.addi %4, %14 : vector<8x256xi32>
    %16 = arith.select %13, %15, %4 : vector<8x256xi1>, vector<8x256xi32>
    %c32_i32 = arith.constant 32 : i32
    %17 = vector.broadcast %c32_i32 : i32 to vector<8x256xi32>
    %18 = arith.cmpi slt, %16, %17 : vector<8x256xi32>
    %c0 = arith.constant 0 : index
    %c0_3 = arith.constant 0 : index
    %19 = vector.load %arg0[%c0, %c0_3] : memref<64x32xbf16, #tpu.memory_space<vmem>>, vector<64x32xbf16>
    %c0_4 = arith.constant 0 : index
    %c0_5 = arith.constant 0 : index
    %20 = vector.load %arg1[%c0_4, %c0_5] : memref<32x256xbf16, #tpu.memory_space<vmem>>, vector<32x256xbf16>
    %c0_6 = arith.constant 0 : index
    %c0_7 = arith.constant 0 : index
    %21 = vector.load %arg3[%c0_6, %c0_7] : memref<1x256xf32, #tpu.memory_space<vmem>>, vector<1x256xf32>
    %c0_8 = arith.constant 0 : index
    %c0_9 = arith.constant 0 : index
    %22 = vector.load %arg2[%c0_8, %c0_9] : memref<64x256xbf16, #tpu.memory_space<vmem>>, vector<64x256xbf16>
    %c0_10 = arith.constant 0 : index
    %c0_11 = arith.constant 0 : index
    %23 = vector.load %arg4[%c0_10, %c0_11] : memref<8x64xf32, #tpu.memory_space<vmem>>, vector<8x64xf32>
    %c0_12 = arith.constant 0 : index
    %c0_13 = arith.constant 0 : index
    %24 = vector.load %arg5[%c0_12, %c0_13] : memref<8x64xf32, #tpu.memory_space<vmem>>, vector<8x64xf32>
    %cst = arith.constant dense<0.000000e+00> : vector<64x256xf32>
    %25 = tpu.matmul %19, %20, %cst {dimension_numbers = #tpu.dot_dimension_numbers<[1], [0], [0], [1], [0, 0, 1, 1], [], []>} : vector<64x32xbf16>, vector<32x256xbf16>, vector<64x256xf32> -> vector<64x256xf32>
    %26 = vector.broadcast %21 : vector<1x256xf32> to vector<64x256xf32>
    %27 = arith.addf %25, %26 : vector<64x256xf32>
    %28 = arith.truncf %27 : vector<64x256xf32> to vector<64x256xbf16>
    %c0_14 = arith.constant 0 : index
    %c0_15 = arith.constant 0 : index
    %29 = vector.load %arg16[%c0_14, %c0_15] : memref<64x256xbf16, #tpu.memory_space<vmem>>, vector<64x256xbf16>
    tpu.vector_store %arg16[%c0_14, %c0_15], %28 {strides = array<i32>} : memref<64x256xbf16, #tpu.memory_space<vmem>>, vector<64x256xbf16>,
    %c0_i32_16 = arith.constant 0 : i32
    %c8_i32 = arith.constant 8 : i32
    %30 = arith.muli %c0_i32_16, %c8_i32 : i32
    %31 = tpu.assume_multiple %30, 8 : i32
    %c7_i32 = arith.constant 7 : i32
    %32 = arith.subi %c7_i32, %c0_i32_16 : i32
    %c8_i32_17 = arith.constant 8 : i32
    %33 = arith.muli %32, %c8_i32_17 : i32
    %34 = tpu.assume_multiple %33, 8 : i32
    %35 = arith.index_cast %31 : i32 to index
    %c0_18 = arith.constant 0 : index
    %36 = vector.load %arg16[%35, %c0_18] : memref<64x256xbf16, #tpu.memory_space<vmem>>, vector<8x256xbf16>
    %37 = arith.index_cast %34 : i32 to index
    %c0_19 = arith.constant 0 : index
    %38 = vector.load %arg16[%37, %c0_19] : memref<64x256xbf16, #tpu.memory_space<vmem>>, vector<8x256xbf16>
    %39 = arith.select %18, %36, %38 : vector<8x256xi1>, vector<8x256xbf16>
    %40 = arith.index_cast %31 : i32 to index
    %c0_20 = arith.constant 0 : index
    %41 = vector.load %arg16[%40, %c0_20] : memref<64x256xbf16, #tpu.memory_space<vmem>>, vector<8x256xbf16>
    tpu.vector_store %arg16[%40, %c0_20], %39 {strides = array<i32>} : memref<64x256xbf16, #tpu.memory_space<vmem>>, vector<8x256xbf16>,
    %42 = arith.select %18, %38, %36 : vector<8x256xi1>, vector<8x256xbf16>
    %43 = arith.index_cast %34 : i32 to index
    %c0_21 = arith.constant 0 : index
    %44 = vector.load %arg16[%43, %c0_21] : memref<64x256xbf16, #tpu.memory_space<vmem>>, vector<8x256xbf16>
    tpu.vector_store %arg16[%43, %c0_21], %42 {strides = array<i32>} : memref<64x256xbf16, #tpu.memory_space<vmem>>, vector<8x256xbf16>,
    %c1_i32_22 = arith.constant 1 : i32
    %c8_i32_23 = arith.constant 8 : i32
    %45 = arith.muli %c1_i32_22, %c8_i32_23 : i32
    %46 = tpu.assume_multiple %45, 8 : i32
    %c7_i32_24 = arith.constant 7 : i32
    %47 = arith.subi %c7_i32_24, %c1_i32_22 : i32
    %c8_i32_25 = arith.constant 8 : i32
    %48 = arith.muli %47, %c8_i32_25 : i32
    %49 = tpu.assume_multiple %48, 8 : i32
    %50 = arith.index_cast %46 : i32 to index
    %c0_26 = arith.constant 0 : index
    %51 = vector.load %arg16[%50, %c0_26] : memref<64x256xbf16, #tpu.memory_space<vmem>>, vector<8x256xbf16>
    %52 = arith.index_cast %49 : i32 to index
    %c0_27 = arith.constant 0 : index
    %53 = vector.load %arg16[%52, %c0_27] : memref<64x256xbf16, #tpu.memory_space<vmem>>, vector<8x256xbf16>
    %54 = arith.select %18, %51, %53 : vector<8x256xi1>, vector<8x256xbf16>
    %55 = arith.index_cast %46 : i32 to index
    %c0_28 = arith.constant 0 : index
    %56 = vector.load %arg16[%55, %c0_28] : memref<64x256xbf16, #tpu.memory_space<vmem>>, vector<8x256xbf16>
    tpu.vector_store %arg16[%55, %c0_28], %54 {strides = array<i32>} : memref<64x256xbf16, #tpu.memory_space<vmem>>, vector<8x256xbf16>,
    %57 = arith.select %18, %53, %51 : vector<8x256xi1>, vector<8x256xbf16>
    %58 = arith.index_cast %49 : i32 to index
    %c0_29 = arith.constant 0 : index
    %59 = vector.load %arg16[%58, %c0_29] : memref<64x256xbf16, #tpu.memory_space<vmem>>, vector<8x256xbf16>
    tpu.vector_store %arg16[%58, %c0_29], %57 {strides = array<i32>} : memref<64x256xbf16, #tpu.memory_space<vmem>>, vector<8x256xbf16>,
    %c2_i32 = arith.constant 2 : i32
    %c8_i32_30 = arith.constant 8 : i32
    %60 = arith.muli %c2_i32, %c8_i32_30 : i32
    %61 = tpu.assume_multiple %60, 8 : i32
    %c7_i32_31 = arith.constant 7 : i32
    %62 = arith.subi %c7_i32_31, %c2_i32 : i32
    %c8_i32_32 = arith.constant 8 : i32
    %63 = arith.muli %62, %c8_i32_32 : i32
    %64 = tpu.assume_multiple %63, 8 : i32
    %65 = arith.index_cast %61 : i32 to index
    %c0_33 = arith.constant 0 : index
    %66 = vector.load %arg16[%65, %c0_33] : memref<64x256xbf16, #tpu.memory_space<vmem>>, vector<8x256xbf16>
    %67 = arith.index_cast %64 : i32 to index
    %c0_34 = arith.constant 0 : index
    %68 = vector.load %arg16[%67, %c0_34] : memref<64x256xbf16, #tpu.memory_space<vmem>>, vector<8x256xbf16>
    %69 = arith.select %18, %66, %68 : vector<8x256xi1>, vector<8x256xbf16>
    %70 = arith.index_cast %61 : i32 to index
    %c0_35 = arith.constant 0 : index
    %71 = vector.load %arg16[%70, %c0_35] : memref<64x256xbf16, #tpu.memory_space<vmem>>, vector<8x256xbf16>
    tpu.vector_store %arg16[%70, %c0_35], %69 {strides = array<i32>} : memref<64x256xbf16, #tpu.memory_space<vmem>>, vector<8x256xbf16>,
    %72 = arith.select %18, %68, %66 : vector<8x256xi1>, vector<8x256xbf16>
    %73 = arith.index_cast %64 : i32 to index
    %c0_36 = arith.constant 0 : index
    %74 = vector.load %arg16[%73, %c0_36] : memref<64x256xbf16, #tpu.memory_space<vmem>>, vector<8x256xbf16>
    tpu.vector_store %arg16[%73, %c0_36], %72 {strides = array<i32>} : memref<64x256xbf16, #tpu.memory_space<vmem>>, vector<8x256xbf16>,
    %c3_i32 = arith.constant 3 : i32
    %c8_i32_37 = arith.constant 8 : i32
    %75 = arith.muli %c3_i32, %c8_i32_37 : i32
    %76 = tpu.assume_multiple %75, 8 : i32
    %c7_i32_38 = arith.constant 7 : i32
    %77 = arith.subi %c7_i32_38, %c3_i32 : i32
    %c8_i32_39 = arith.constant 8 : i32
    %78 = arith.muli %77, %c8_i32_39 : i32
    %79 = tpu.assume_multiple %78, 8 : i32
    %80 = arith.index_cast %76 : i32 to index
    %c0_40 = arith.constant 0 : index
    %81 = vector.load %arg16[%80, %c0_40] : memref<64x256xbf16, #tpu.memory_space<vmem>>, vector<8x256xbf16>
    %82 = arith.index_cast %79 : i32 to index
    %c0_41 = arith.constant 0 : index
    %83 = vector.load %arg16[%82, %c0_41] : memref<64x256xbf16, #tpu.memory_space<vmem>>, vector<8x256xbf16>
    %84 = arith.select %18, %81, %83 : vector<8x256xi1>, vector<8x256xbf16>
    %85 = arith.index_cast %76 : i32 to index
    %c0_42 = arith.constant 0 : index
    %86 = vector.load %arg16[%85, %c0_42] : memref<64x256xbf16, #tpu.memory_space<vmem>>, vector<8x256xbf16>
    tpu.vector_store %arg16[%85, %c0_42], %84 {strides = array<i32>} : memref<64x256xbf16, #tpu.memory_space<vmem>>, vector<8x256xbf16>,
    %87 = arith.select %18, %83, %81 : vector<8x256xi1>, vector<8x256xbf16>
    %88 = arith.index_cast %79 : i32 to index
    %c0_43 = arith.constant 0 : index
    %89 = vector.load %arg16[%88, %c0_43] : memref<64x256xbf16, #tpu.memory_space<vmem>>, vector<8x256xbf16>
    tpu.vector_store %arg16[%88, %c0_43], %87 {strides = array<i32>} : memref<64x256xbf16, #tpu.memory_space<vmem>>, vector<8x256xbf16>,
    %c4_i32 = arith.constant 4 : i32
    %c0_i32_44 = arith.constant 0 : i32
    %c8_i32_45 = arith.constant 8 : i32
    %90 = arith.muli %c0_i32_44, %c8_i32_45 : i32
    %91 = tpu.assume_multiple %90, 8 : i32
    %c7_i32_46 = arith.constant 7 : i32
    %92 = arith.subi %c7_i32_46, %c0_i32_44 : i32
    %c8_i32_47 = arith.constant 8 : i32
    %93 = arith.muli %92, %c8_i32_47 : i32
    %94 = tpu.assume_multiple %93, 8 : i32
    %95 = arith.index_cast %91 : i32 to index
    %c0_48 = arith.constant 0 : index
    %96 = vector.load %arg16[%95, %c0_48] : memref<64x256xbf16, #tpu.memory_space<vmem>>, vector<8x256xbf16>
    %97 = arith.extf %96 : vector<8x256xbf16> to vector<8x256xf32>
    %98 = arith.truncf %23 : vector<8x64xf32> to vector<8x64xbf16>
    %cst_49 = arith.constant dense<0.000000e+00> : vector<8x256xf32>
    %99 = tpu.matmul %98, %22, %cst_49 {dimension_numbers = #tpu.dot_dimension_numbers<[1], [0], [0], [1], [0, 0, 1, 1], [], []>} : vector<8x64xbf16>, vector<64x256xbf16>, vector<8x256xf32> -> vector<8x256xf32>
    %100 = arith.addf %97, %99 : vector<8x256xf32>
    %101 = vector.extract_strided_slice %100 {offsets = [0, 0], sizes = [8, 128], strides = [1, 1]} : vector<8x256xf32> to vector<8x128xf32>
    %102 = arith.negf %101 : vector<8x128xf32>
    %103 = math.exp %102 : vector<8x128xf32>
    %cst_50 = arith.constant 1.000000e+00 : f32
    %104 = vector.broadcast %cst_50 : f32 to vector<8x128xf32>
    %105 = arith.addf %104, %103 : vector<8x128xf32>
    %106 = arith.divf %104, %105 : vector<8x128xf32>
    %107 = vector.extract_strided_slice %100 {offsets = [0, 128], sizes = [8, 64], strides = [1, 1]} : vector<8x256xf32> to vector<8x64xf32>
    %108 = math.tanh %107 : vector<8x64xf32>
    %109 = vector.extract_strided_slice %100 {offsets = [0, 192], sizes = [8, 64], strides = [1, 1]} : vector<8x256xf32> to vector<8x64xf32>
    %110 = arith.negf %109 : vector<8x64xf32>
    %111 = math.exp %110 : vector<8x64xf32>
    %cst_51 = arith.constant 1.000000e+00 : f32
    %112 = vector.broadcast %cst_51 : f32 to vector<8x64xf32>
    %113 = arith.addf %112, %111 : vector<8x64xf32>
    %114 = arith.divf %112, %113 : vector<8x64xf32>
    %115 = vector.extract_strided_slice %106 {offsets = [0, 0], sizes = [8, 64], strides = [1, 1]} : vector<8x128xf32> to vector<8x64xf32>
    %116 = vector.extract_strided_slice %106 {offsets = [0, 64], sizes = [8, 64], strides = [1, 1]} : vector<8x128xf32> to vector<8x64xf32>
    %117 = arith.mulf %116, %24 : vector<8x64xf32>
    %118 = arith.mulf %115, %108 : vector<8x64xf32>
    %119 = arith.addf %117, %118 : vector<8x64xf32>
    %120 = math.tanh %119 : vector<8x64xf32>
    %121 = arith.mulf %114, %120 : vector<8x64xf32>
    %122 = vector.extract_strided_slice %121 {offsets = [0, 0], sizes = [8, 32], strides = [1, 1]} : vector<8x64xf32> to vector<8x32xf32>
    %123 = arith.truncf %122 : vector<8x32xf32> to vector<8x32xbf16>
    %124 = arith.index_cast %91 : i32 to index
    %c0_52 = arith.constant 0 : index
    %125 = vector.load %arg17[%124, %c0_52] : memref<64x64xbf16, #tpu.memory_space<vmem>>, vector<8x32xbf16>
    tpu.vector_store %arg17[%124, %c0_52], %123 {strides = array<i32>} : memref<64x64xbf16, #tpu.memory_space<vmem>>, vector<8x32xbf16>,
    %126 = vector.extract_strided_slice %121 {offsets = [0, 32], sizes = [8, 32], strides = [1, 1]} : vector<8x64xf32> to vector<8x32xf32>
    %127 = arith.truncf %126 : vector<8x32xf32> to vector<8x32xbf16>
    %128 = arith.index_cast %94 : i32 to index
    %c32 = arith.constant 32 : index
    %129 = vector.load %arg17[%128, %c32] : memref<64x64xbf16, #tpu.memory_space<vmem>>, vector<8x32xbf16>
    tpu.vector_store %arg17[%128, %c32], %127 {strides = array<i32>} : memref<64x64xbf16, #tpu.memory_space<vmem>>, vector<8x32xbf16>,
    %c1_i32_53 = arith.constant 1 : i32
    %c8_i32_54 = arith.constant 8 : i32
    %130 = arith.muli %c1_i32_53, %c8_i32_54 : i32
    %131 = tpu.assume_multiple %130, 8 : i32
    %c7_i32_55 = arith.constant 7 : i32
    %132 = arith.subi %c7_i32_55, %c1_i32_53 : i32
    %c8_i32_56 = arith.constant 8 : i32
    %133 = arith.muli %132, %c8_i32_56 : i32
    %134 = tpu.assume_multiple %133, 8 : i32
    %135 = arith.index_cast %131 : i32 to index
    %c0_57 = arith.constant 0 : index
    %136 = vector.load %arg16[%135, %c0_57] : memref<64x256xbf16, #tpu.memory_space<vmem>>, vector<8x256xbf16>
    %137 = arith.extf %136 : vector<8x256xbf16> to vector<8x256xf32>
    %138 = arith.truncf %121 : vector<8x64xf32> to vector<8x64xbf16>
    %cst_58 = arith.constant dense<0.000000e+00> : vector<8x256xf32>
    %139 = tpu.matmul %138, %22, %cst_58 {dimension_numbers = #tpu.dot_dimension_numbers<[1], [0], [0], [1], [0, 0, 1, 1], [], []>} : vector<8x64xbf16>, vector<64x256xbf16>, vector<8x256xf32> -> vector<8x256xf32>
    %140 = arith.addf %137, %139 : vector<8x256xf32>
    %141 = vector.extract_strided_slice %140 {offsets = [0, 0], sizes = [8, 128], strides = [1, 1]} : vector<8x256xf32> to vector<8x128xf32>
    %142 = arith.negf %141 : vector<8x128xf32>
    %143 = math.exp %142 : vector<8x128xf32>
    %cst_59 = arith.constant 1.000000e+00 : f32
    %144 = vector.broadcast %cst_59 : f32 to vector<8x128xf32>
    %145 = arith.addf %144, %143 : vector<8x128xf32>
    %146 = arith.divf %144, %145 : vector<8x128xf32>
    %147 = vector.extract_strided_slice %140 {offsets = [0, 128], sizes = [8, 64], strides = [1, 1]} : vector<8x256xf32> to vector<8x64xf32>
    %148 = math.tanh %147 : vector<8x64xf32>
    %149 = vector.extract_strided_slice %140 {offsets = [0, 192], sizes = [8, 64], strides = [1, 1]} : vector<8x256xf32> to vector<8x64xf32>
    %150 = arith.negf %149 : vector<8x64xf32>
    %151 = math.exp %150 : vector<8x64xf32>
    %cst_60 = arith.constant 1.000000e+00 : f32
    %152 = vector.broadcast %cst_60 : f32 to vector<8x64xf32>
    %153 = arith.addf %152, %151 : vector<8x64xf32>
    %154 = arith.divf %152, %153 : vector<8x64xf32>
    %155 = vector.extract_strided_slice %146 {offsets = [0, 0], sizes = [8, 64], strides = [1, 1]} : vector<8x128xf32> to vector<8x64xf32>
    %156 = vector.extract_strided_slice %146 {offsets = [0, 64], sizes = [8, 64], strides = [1, 1]} : vector<8x128xf32> to vector<8x64xf32>
    %157 = arith.mulf %156, %119 : vector<8x64xf32>
    %158 = arith.mulf %155, %148 : vector<8x64xf32>
    %159 = arith.addf %157, %158 : vector<8x64xf32>
    %160 = math.tanh %159 : vector<8x64xf32>
    %161 = arith.mulf %154, %160 : vector<8x64xf32>
    %162 = vector.extract_strided_slice %161 {offsets = [0, 0], sizes = [8, 32], strides = [1, 1]} : vector<8x64xf32> to vector<8x32xf32>
    %163 = arith.truncf %162 : vector<8x32xf32> to vector<8x32xbf16>
    %164 = arith.index_cast %131 : i32 to index
    %c0_61 = arith.constant 0 : index
    %165 = vector.load %arg17[%164, %c0_61] : memref<64x64xbf16, #tpu.memory_space<vmem>>, vector<8x32xbf16>
    tpu.vector_store %arg17[%164, %c0_61], %163 {strides = array<i32>} : memref<64x64xbf16, #tpu.memory_space<vmem>>, vector<8x32xbf16>,
    %166 = vector.extract_strided_slice %161 {offsets = [0, 32], sizes = [8, 32], strides = [1, 1]} : vector<8x64xf32> to vector<8x32xf32>
    %167 = arith.truncf %166 : vector<8x32xf32> to vector<8x32xbf16>
    %168 = arith.index_cast %134 : i32 to index
    %c32_62 = arith.constant 32 : index
    %169 = vector.load %arg17[%168, %c32_62] : memref<64x64xbf16, #tpu.memory_space<vmem>>, vector<8x32xbf16>
    tpu.vector_store %arg17[%168, %c32_62], %167 {strides = array<i32>} : memref<64x64xbf16, #tpu.memory_space<vmem>>, vector<8x32xbf16>,
    %c2_i32_63 = arith.constant 2 : i32
    %c8_i32_64 = arith.constant 8 : i32
    %170 = arith.muli %c2_i32_63, %c8_i32_64 : i32
    %171 = tpu.assume_multiple %170, 8 : i32
    %c7_i32_65 = arith.constant 7 : i32
    %172 = arith.subi %c7_i32_65, %c2_i32_63 : i32
    %c8_i32_66 = arith.constant 8 : i32
    %173 = arith.muli %172, %c8_i32_66 : i32
    %174 = tpu.assume_multiple %173, 8 : i32
    %175 = arith.index_cast %171 : i32 to index
    %c0_67 = arith.constant 0 : index
    %176 = vector.load %arg16[%175, %c0_67] : memref<64x256xbf16, #tpu.memory_space<vmem>>, vector<8x256xbf16>
    %177 = arith.extf %176 : vector<8x256xbf16> to vector<8x256xf32>
    %178 = arith.truncf %161 : vector<8x64xf32> to vector<8x64xbf16>
    %cst_68 = arith.constant dense<0.000000e+00> : vector<8x256xf32>
    %179 = tpu.matmul %178, %22, %cst_68 {dimension_numbers = #tpu.dot_dimension_numbers<[1], [0], [0], [1], [0, 0, 1, 1], [], []>} : vector<8x64xbf16>, vector<64x256xbf16>, vector<8x256xf32> -> vector<8x256xf32>
    %180 = arith.addf %177, %179 : vector<8x256xf32>
    %181 = vector.extract_strided_slice %180 {offsets = [0, 0], sizes = [8, 128], strides = [1, 1]} : vector<8x256xf32> to vector<8x128xf32>
    %182 = arith.negf %181 : vector<8x128xf32>
    %183 = math.exp %182 : vector<8x128xf32>
    %cst_69 = arith.constant 1.000000e+00 : f32
    %184 = vector.broadcast %cst_69 : f32 to vector<8x128xf32>
    %185 = arith.addf %184, %183 : vector<8x128xf32>
    %186 = arith.divf %184, %185 : vector<8x128xf32>
    %187 = vector.extract_strided_slice %180 {offsets = [0, 128], sizes = [8, 64], strides = [1, 1]} : vector<8x256xf32> to vector<8x64xf32>
    %188 = math.tanh %187 : vector<8x64xf32>
    %189 = vector.extract_strided_slice %180 {offsets = [0, 192], sizes = [8, 64], strides = [1, 1]} : vector<8x256xf32> to vector<8x64xf32>
    %190 = arith.negf %189 : vector<8x64xf32>
    %191 = math.exp %190 : vector<8x64xf32>
    %cst_70 = arith.constant 1.000000e+00 : f32
    %192 = vector.broadcast %cst_70 : f32 to vector<8x64xf32>
    %193 = arith.addf %192, %191 : vector<8x64xf32>
    %194 = arith.divf %192, %193 : vector<8x64xf32>
    %195 = vector.extract_strided_slice %186 {offsets = [0, 0], sizes = [8, 64], strides = [1, 1]} : vector<8x128xf32> to vector<8x64xf32>
    %196 = vector.extract_strided_slice %186 {offsets = [0, 64], sizes = [8, 64], strides = [1, 1]} : vector<8x128xf32> to vector<8x64xf32>
    %197 = arith.mulf %196, %159 : vector<8x64xf32>
    %198 = arith.mulf %195, %188 : vector<8x64xf32>
    %199 = arith.addf %197, %198 : vector<8x64xf32>
    %200 = math.tanh %199 : vector<8x64xf32>
    %201 = arith.mulf %194, %200 : vector<8x64xf32>
    %202 = vector.extract_strided_slice %201 {offsets = [0, 0], sizes = [8, 32], strides = [1, 1]} : vector<8x64xf32> to vector<8x32xf32>
    %203 = arith.truncf %202 : vector<8x32xf32> to vector<8x32xbf16>
    %204 = arith.index_cast %171 : i32 to index
    %c0_71 = arith.constant 0 : index
    %205 = vector.load %arg17[%204, %c0_71] : memref<64x64xbf16, #tpu.memory_space<vmem>>, vector<8x32xbf16>
    tpu.vector_store %arg17[%204, %c0_71], %203 {strides = array<i32>} : memref<64x64xbf16, #tpu.memory_space<vmem>>, vector<8x32xbf16>,
    %206 = vector.extract_strided_slice %201 {offsets = [0, 32], sizes = [8, 32], strides = [1, 1]} : vector<8x64xf32> to vector<8x32xf32>
    %207 = arith.truncf %206 : vector<8x32xf32> to vector<8x32xbf16>
    %208 = arith.index_cast %174 : i32 to index
    %c32_72 = arith.constant 32 : index
    %209 = vector.load %arg17[%208, %c32_72] : memref<64x64xbf16, #tpu.memory_space<vmem>>, vector<8x32xbf16>
    tpu.vector_store %arg17[%208, %c32_72], %207 {strides = array<i32>} : memref<64x64xbf16, #tpu.memory_space<vmem>>, vector<8x32xbf16>,
    %c3_i32_73 = arith.constant 3 : i32
    %c8_i32_74 = arith.constant 8 : i32
    %210 = arith.muli %c3_i32_73, %c8_i32_74 : i32
    %211 = tpu.assume_multiple %210, 8 : i32
    %c7_i32_75 = arith.constant 7 : i32
    %212 = arith.subi %c7_i32_75, %c3_i32_73 : i32
    %c8_i32_76 = arith.constant 8 : i32
    %213 = arith.muli %212, %c8_i32_76 : i32
    %214 = tpu.assume_multiple %213, 8 : i32
    %215 = arith.index_cast %211 : i32 to index
    %c0_77 = arith.constant 0 : index
    %216 = vector.load %arg16[%215, %c0_77] : memref<64x256xbf16, #tpu.memory_space<vmem>>, vector<8x256xbf16>
    %217 = arith.extf %216 : vector<8x256xbf16> to vector<8x256xf32>
    %218 = arith.truncf %201 : vector<8x64xf32> to vector<8x64xbf16>
    %cst_78 = arith.constant dense<0.000000e+00> : vector<8x256xf32>
    %219 = tpu.matmul %218, %22, %cst_78 {dimension_numbers = #tpu.dot_dimension_numbers<[1], [0], [0], [1], [0, 0, 1, 1], [], []>} : vector<8x64xbf16>, vector<64x256xbf16>, vector<8x256xf32> -> vector<8x256xf32>
    %220 = arith.addf %217, %219 : vector<8x256xf32>
    %221 = vector.extract_strided_slice %220 {offsets = [0, 0], sizes = [8, 128], strides = [1, 1]} : vector<8x256xf32> to vector<8x128xf32>
    %222 = arith.negf %221 : vector<8x128xf32>
    %223 = math.exp %222 : vector<8x128xf32>
    %cst_79 = arith.constant 1.000000e+00 : f32
    %224 = vector.broadcast %cst_79 : f32 to vector<8x128xf32>
    %225 = arith.addf %224, %223 : vector<8x128xf32>
    %226 = arith.divf %224, %225 : vector<8x128xf32>
    %227 = vector.extract_strided_slice %220 {offsets = [0, 128], sizes = [8, 64], strides = [1, 1]} : vector<8x256xf32> to vector<8x64xf32>
    %228 = math.tanh %227 : vector<8x64xf32>
    %229 = vector.extract_strided_slice %220 {offsets = [0, 192], sizes = [8, 64], strides = [1, 1]} : vector<8x256xf32> to vector<8x64xf32>
    %230 = arith.negf %229 : vector<8x64xf32>
    %231 = math.exp %230 : vector<8x64xf32>
    %cst_80 = arith.constant 1.000000e+00 : f32
    %232 = vector.broadcast %cst_80 : f32 to vector<8x64xf32>
    %233 = arith.addf %232, %231 : vector<8x64xf32>
    %234 = arith.divf %232, %233 : vector<8x64xf32>
    %235 = vector.extract_strided_slice %226 {offsets = [0, 0], sizes = [8, 64], strides = [1, 1]} : vector<8x128xf32> to vector<8x64xf32>
    %236 = vector.extract_strided_slice %226 {offsets = [0, 64], sizes = [8, 64], strides = [1, 1]} : vector<8x128xf32> to vector<8x64xf32>
    %237 = arith.mulf %236, %199 : vector<8x64xf32>
    %238 = arith.mulf %235, %228 : vector<8x64xf32>
    %239 = arith.addf %237, %238 : vector<8x64xf32>
    %240 = math.tanh %239 : vector<8x64xf32>
    %241 = arith.mulf %234, %240 : vector<8x64xf32>
    %242 = vector.extract_strided_slice %241 {offsets = [0, 0], sizes = [8, 32], strides = [1, 1]} : vector<8x64xf32> to vector<8x32xf32>
    %243 = arith.truncf %242 : vector<8x32xf32> to vector<8x32xbf16>
    %244 = arith.index_cast %211 : i32 to index
    %c0_81 = arith.constant 0 : index
    %245 = vector.load %arg17[%244, %c0_81] : memref<64x64xbf16, #tpu.memory_space<vmem>>, vector<8x32xbf16>
    tpu.vector_store %arg17[%244, %c0_81], %243 {strides = array<i32>} : memref<64x64xbf16, #tpu.memory_space<vmem>>, vector<8x32xbf16>,
    %246 = vector.extract_strided_slice %241 {offsets = [0, 32], sizes = [8, 32], strides = [1, 1]} : vector<8x64xf32> to vector<8x32xf32>
    %247 = arith.truncf %246 : vector<8x32xf32> to vector<8x32xbf16>
    %248 = arith.index_cast %214 : i32 to index
    %c32_82 = arith.constant 32 : index
    %249 = vector.load %arg17[%248, %c32_82] : memref<64x64xbf16, #tpu.memory_space<vmem>>, vector<8x32xbf16>
    tpu.vector_store %arg17[%248, %c32_82], %247 {strides = array<i32>} : memref<64x64xbf16, #tpu.memory_space<vmem>>, vector<8x32xbf16>,
    %c4_i32_83 = arith.constant 4 : i32
    %c8_i32_84 = arith.constant 8 : i32
    %250 = arith.muli %c4_i32_83, %c8_i32_84 : i32
    %251 = tpu.assume_multiple %250, 8 : i32
    %c7_i32_85 = arith.constant 7 : i32
    %252 = arith.subi %c7_i32_85, %c4_i32_83 : i32
    %c8_i32_86 = arith.constant 8 : i32
    %253 = arith.muli %252, %c8_i32_86 : i32
    %254 = tpu.assume_multiple %253, 8 : i32
    %255 = arith.index_cast %251 : i32 to index
    %c0_87 = arith.constant 0 : index
    %256 = vector.load %arg16[%255, %c0_87] : memref<64x256xbf16, #tpu.memory_space<vmem>>, vector<8x256xbf16>
    %257 = arith.extf %256 : vector<8x256xbf16> to vector<8x256xf32>
    %258 = arith.truncf %241 : vector<8x64xf32> to vector<8x64xbf16>
    %cst_88 = arith.constant dense<0.000000e+00> : vector<8x256xf32>
    %259 = tpu.matmul %258, %22, %cst_88 {dimension_numbers = #tpu.dot_dimension_numbers<[1], [0], [0], [1], [0, 0, 1, 1], [], []>} : vector<8x64xbf16>, vector<64x256xbf16>, vector<8x256xf32> -> vector<8x256xf32>
    %260 = arith.addf %257, %259 : vector<8x256xf32>
    %261 = vector.extract_strided_slice %260 {offsets = [0, 0], sizes = [8, 128], strides = [1, 1]} : vector<8x256xf32> to vector<8x128xf32>
    %262 = arith.negf %261 : vector<8x128xf32>
    %263 = math.exp %262 : vector<8x128xf32>
    %cst_89 = arith.constant 1.000000e+00 : f32
    %264 = vector.broadcast %cst_89 : f32 to vector<8x128xf32>
    %265 = arith.addf %264, %263 : vector<8x128xf32>
    %266 = arith.divf %264, %265 : vector<8x128xf32>
    %267 = vector.extract_strided_slice %260 {offsets = [0, 128], sizes = [8, 64], strides = [1, 1]} : vector<8x256xf32> to vector<8x64xf32>
    %268 = math.tanh %267 : vector<8x64xf32>
    %269 = vector.extract_strided_slice %260 {offsets = [0, 192], sizes = [8, 64], strides = [1, 1]} : vector<8x256xf32> to vector<8x64xf32>
    %270 = arith.negf %269 : vector<8x64xf32>
    %271 = math.exp %270 : vector<8x64xf32>
    %cst_90 = arith.constant 1.000000e+00 : f32
    %272 = vector.broadcast %cst_90 : f32 to vector<8x64xf32>
    %273 = arith.addf %272, %271 : vector<8x64xf32>
    %274 = arith.divf %272, %273 : vector<8x64xf32>
    %275 = vector.extract_strided_slice %266 {offsets = [0, 0], sizes = [8, 64], strides = [1, 1]} : vector<8x128xf32> to vector<8x64xf32>
    %276 = vector.extract_strided_slice %266 {offsets = [0, 64], sizes = [8, 64], strides = [1, 1]} : vector<8x128xf32> to vector<8x64xf32>
    %277 = arith.mulf %276, %239 : vector<8x64xf32>
    %278 = arith.mulf %275, %268 : vector<8x64xf32>
    %279 = arith.addf %277, %278 : vector<8x64xf32>
    %280 = math.tanh %279 : vector<8x64xf32>
    %281 = arith.mulf %274, %280 : vector<8x64xf32>
    %282 = vector.extract_strided_slice %281 {offsets = [0, 0], sizes = [8, 32], strides = [1, 1]} : vector<8x64xf32> to vector<8x32xf32>
    %283 = arith.truncf %282 : vector<8x32xf32> to vector<8x32xbf16>
    %284 = arith.index_cast %251 : i32 to index
    %c0_91 = arith.constant 0 : index
    %285 = vector.load %arg17[%284, %c0_91] : memref<64x64xbf16, #tpu.memory_space<vmem>>, vector<8x32xbf16>
    tpu.vector_store %arg17[%284, %c0_91], %283 {strides = array<i32>} : memref<64x64xbf16, #tpu.memory_space<vmem>>, vector<8x32xbf16>,
    %286 = vector.extract_strided_slice %281 {offsets = [0, 32], sizes = [8, 32], strides = [1, 1]} : vector<8x64xf32> to vector<8x32xf32>
    %287 = arith.truncf %286 : vector<8x32xf32> to vector<8x32xbf16>
    %288 = arith.index_cast %254 : i32 to index
    %c32_92 = arith.constant 32 : index
    %289 = vector.load %arg17[%288, %c32_92] : memref<64x64xbf16, #tpu.memory_space<vmem>>, vector<8x32xbf16>
    tpu.vector_store %arg17[%288, %c32_92], %287 {strides = array<i32>} : memref<64x64xbf16, #tpu.memory_space<vmem>>, vector<8x32xbf16>,
    %c5_i32 = arith.constant 5 : i32
    %c8_i32_93 = arith.constant 8 : i32
    %290 = arith.muli %c5_i32, %c8_i32_93 : i32
    %291 = tpu.assume_multiple %290, 8 : i32
    %c7_i32_94 = arith.constant 7 : i32
    %292 = arith.subi %c7_i32_94, %c5_i32 : i32
    %c8_i32_95 = arith.constant 8 : i32
    %293 = arith.muli %292, %c8_i32_95 : i32
    %294 = tpu.assume_multiple %293, 8 : i32
    %295 = arith.index_cast %291 : i32 to index
    %c0_96 = arith.constant 0 : index
    %296 = vector.load %arg16[%295, %c0_96] : memref<64x256xbf16, #tpu.memory_space<vmem>>, vector<8x256xbf16>
    %297 = arith.extf %296 : vector<8x256xbf16> to vector<8x256xf32>
    %298 = arith.truncf %281 : vector<8x64xf32> to vector<8x64xbf16>
    %cst_97 = arith.constant dense<0.000000e+00> : vector<8x256xf32>
    %299 = tpu.matmul %298, %22, %cst_97 {dimension_numbers = #tpu.dot_dimension_numbers<[1], [0], [0], [1], [0, 0, 1, 1], [], []>} : vector<8x64xbf16>, vector<64x256xbf16>, vector<8x256xf32> -> vector<8x256xf32>
    %300 = arith.addf %297, %299 : vector<8x256xf32>
    %301 = vector.extract_strided_slice %300 {offsets = [0, 0], sizes = [8, 128], strides = [1, 1]} : vector<8x256xf32> to vector<8x128xf32>
    %302 = arith.negf %301 : vector<8x128xf32>
    %303 = math.exp %302 : vector<8x128xf32>
    %cst_98 = arith.constant 1.000000e+00 : f32
    %304 = vector.broadcast %cst_98 : f32 to vector<8x128xf32>
    %305 = arith.addf %304, %303 : vector<8x128xf32>
    %306 = arith.divf %304, %305 : vector<8x128xf32>
    %307 = vector.extract_strided_slice %300 {offsets = [0, 128], sizes = [8, 64], strides = [1, 1]} : vector<8x256xf32> to vector<8x64xf32>
    %308 = math.tanh %307 : vector<8x64xf32>
    %309 = vector.extract_strided_slice %300 {offsets = [0, 192], sizes = [8, 64], strides = [1, 1]} : vector<8x256xf32> to vector<8x64xf32>
    %310 = arith.negf %309 : vector<8x64xf32>
    %311 = math.exp %310 : vector<8x64xf32>
    %cst_99 = arith.constant 1.000000e+00 : f32
    %312 = vector.broadcast %cst_99 : f32 to vector<8x64xf32>
    %313 = arith.addf %312, %311 : vector<8x64xf32>
    %314 = arith.divf %312, %313 : vector<8x64xf32>
    %315 = vector.extract_strided_slice %306 {offsets = [0, 0], sizes = [8, 64], strides = [1, 1]} : vector<8x128xf32> to vector<8x64xf32>
    %316 = vector.extract_strided_slice %306 {offsets = [0, 64], sizes = [8, 64], strides = [1, 1]} : vector<8x128xf32> to vector<8x64xf32>
    %317 = arith.mulf %316, %279 : vector<8x64xf32>
    %318 = arith.mulf %315, %308 : vector<8x64xf32>
    %319 = arith.addf %317, %318 : vector<8x64xf32>
    %320 = math.tanh %319 : vector<8x64xf32>
    %321 = arith.mulf %314, %320 : vector<8x64xf32>
    %322 = vector.extract_strided_slice %321 {offsets = [0, 0], sizes = [8, 32], strides = [1, 1]} : vector<8x64xf32> to vector<8x32xf32>
    %323 = arith.truncf %322 : vector<8x32xf32> to vector<8x32xbf16>
    %324 = arith.index_cast %291 : i32 to index
    %c0_100 = arith.constant 0 : index
    %325 = vector.load %arg17[%324, %c0_100] : memref<64x64xbf16, #tpu.memory_space<vmem>>, vector<8x32xbf16>
    tpu.vector_store %arg17[%324, %c0_100], %323 {strides = array<i32>} : memref<64x64xbf16, #tpu.memory_space<vmem>>, vector<8x32xbf16>,
    %326 = vector.extract_strided_slice %321 {offsets = [0, 32], sizes = [8, 32], strides = [1, 1]} : vector<8x64xf32> to vector<8x32xf32>
    %327 = arith.truncf %326 : vector<8x32xf32> to vector<8x32xbf16>
    %328 = arith.index_cast %294 : i32 to index
    %c32_101 = arith.constant 32 : index
    %329 = vector.load %arg17[%328, %c32_101] : memref<64x64xbf16, #tpu.memory_space<vmem>>, vector<8x32xbf16>
    tpu.vector_store %arg17[%328, %c32_101], %327 {strides = array<i32>} : memref<64x64xbf16, #tpu.memory_space<vmem>>, vector<8x32xbf16>,
    %c6_i32 = arith.constant 6 : i32
    %c8_i32_102 = arith.constant 8 : i32
    %330 = arith.muli %c6_i32, %c8_i32_102 : i32
    %331 = tpu.assume_multiple %330, 8 : i32
    %c7_i32_103 = arith.constant 7 : i32
    %332 = arith.subi %c7_i32_103, %c6_i32 : i32
    %c8_i32_104 = arith.constant 8 : i32
    %333 = arith.muli %332, %c8_i32_104 : i32
    %334 = tpu.assume_multiple %333, 8 : i32
    %335 = arith.index_cast %331 : i32 to index
    %c0_105 = arith.constant 0 : index
    %336 = vector.load %arg16[%335, %c0_105] : memref<64x256xbf16, #tpu.memory_space<vmem>>, vector<8x256xbf16>
    %337 = arith.extf %336 : vector<8x256xbf16> to vector<8x256xf32>
    %338 = arith.truncf %321 : vector<8x64xf32> to vector<8x64xbf16>
    %cst_106 = arith.constant dense<0.000000e+00> : vector<8x256xf32>
    %339 = tpu.matmul %338, %22, %cst_106 {dimension_numbers = #tpu.dot_dimension_numbers<[1], [0], [0], [1], [0, 0, 1, 1], [], []>} : vector<8x64xbf16>, vector<64x256xbf16>, vector<8x256xf32> -> vector<8x256xf32>
    %340 = arith.addf %337, %339 : vector<8x256xf32>
    %341 = vector.extract_strided_slice %340 {offsets = [0, 0], sizes = [8, 128], strides = [1, 1]} : vector<8x256xf32> to vector<8x128xf32>
    %342 = arith.negf %341 : vector<8x128xf32>
    %343 = math.exp %342 : vector<8x128xf32>
    %cst_107 = arith.constant 1.000000e+00 : f32
    %344 = vector.broadcast %cst_107 : f32 to vector<8x128xf32>
    %345 = arith.addf %344, %343 : vector<8x128xf32>
    %346 = arith.divf %344, %345 : vector<8x128xf32>
    %347 = vector.extract_strided_slice %340 {offsets = [0, 128], sizes = [8, 64], strides = [1, 1]} : vector<8x256xf32> to vector<8x64xf32>
    %348 = math.tanh %347 : vector<8x64xf32>
    %349 = vector.extract_strided_slice %340 {offsets = [0, 192], sizes = [8, 64], strides = [1, 1]} : vector<8x256xf32> to vector<8x64xf32>
    %350 = arith.negf %349 : vector<8x64xf32>
    %351 = math.exp %350 : vector<8x64xf32>
    %cst_108 = arith.constant 1.000000e+00 : f32
    %352 = vector.broadcast %cst_108 : f32 to vector<8x64xf32>
    %353 = arith.addf %352, %351 : vector<8x64xf32>
    %354 = arith.divf %352, %353 : vector<8x64xf32>
    %355 = vector.extract_strided_slice %346 {offsets = [0, 0], sizes = [8, 64], strides = [1, 1]} : vector<8x128xf32> to vector<8x64xf32>
    %356 = vector.extract_strided_slice %346 {offsets = [0, 64], sizes = [8, 64], strides = [1, 1]} : vector<8x128xf32> to vector<8x64xf32>
    %357 = arith.mulf %356, %319 : vector<8x64xf32>
    %358 = arith.mulf %355, %348 : vector<8x64xf32>
    %359 = arith.addf %357, %358 : vector<8x64xf32>
    %360 = math.tanh %359 : vector<8x64xf32>
    %361 = arith.mulf %354, %360 : vector<8x64xf32>
    %362 = vector.extract_strided_slice %361 {offsets = [0, 0], sizes = [8, 32], strides = [1, 1]} : vector<8x64xf32> to vector<8x32xf32>
    %363 = arith.truncf %362 : vector<8x32xf32> to vector<8x32xbf16>
    %364 = arith.index_cast %331 : i32 to index
    %c0_109 = arith.constant 0 : index
    %365 = vector.load %arg17[%364, %c0_109] : memref<64x64xbf16, #tpu.memory_space<vmem>>, vector<8x32xbf16>
    tpu.vector_store %arg17[%364, %c0_109], %363 {strides = array<i32>} : memref<64x64xbf16, #tpu.memory_space<vmem>>, vector<8x32xbf16>,
    %366 = vector.extract_strided_slice %361 {offsets = [0, 32], sizes = [8, 32], strides = [1, 1]} : vector<8x64xf32> to vector<8x32xf32>
    %367 = arith.truncf %366 : vector<8x32xf32> to vector<8x32xbf16>
    %368 = arith.index_cast %334 : i32 to index
    %c32_110 = arith.constant 32 : index
    %369 = vector.load %arg17[%368, %c32_110] : memref<64x64xbf16, #tpu.memory_space<vmem>>, vector<8x32xbf16>
    tpu.vector_store %arg17[%368, %c32_110], %367 {strides = array<i32>} : memref<64x64xbf16, #tpu.memory_space<vmem>>, vector<8x32xbf16>,
    %c7_i32_111 = arith.constant 7 : i32
    %c8_i32_112 = arith.constant 8 : i32
    %370 = arith.muli %c7_i32_111, %c8_i32_112 : i32
    %371 = tpu.assume_multiple %370, 8 : i32
    %c7_i32_113 = arith.constant 7 : i32
    %372 = arith.subi %c7_i32_113, %c7_i32_111 : i32
    %c8_i32_114 = arith.constant 8 : i32
    %373 = arith.muli %372, %c8_i32_114 : i32
    %374 = tpu.assume_multiple %373, 8 : i32
    %375 = arith.index_cast %371 : i32 to index
    %c0_115 = arith.constant 0 : index
    %376 = vector.load %arg16[%375, %c0_115] : memref<64x256xbf16, #tpu.memory_space<vmem>>, vector<8x256xbf16>
    %377 = arith.extf %376 : vector<8x256xbf16> to vector<8x256xf32>
    %378 = arith.truncf %361 : vector<8x64xf32> to vector<8x64xbf16>
    %cst_116 = arith.constant dense<0.000000e+00> : vector<8x256xf32>
    %379 = tpu.matmul %378, %22, %cst_116 {dimension_numbers = #tpu.dot_dimension_numbers<[1], [0], [0], [1], [0, 0, 1, 1], [], []>} : vector<8x64xbf16>, vector<64x256xbf16>, vector<8x256xf32> -> vector<8x256xf32>
    %380 = arith.addf %377, %379 : vector<8x256xf32>
    %381 = vector.extract_strided_slice %380 {offsets = [0, 0], sizes = [8, 128], strides = [1, 1]} : vector<8x256xf32> to vector<8x128xf32>
    %382 = arith.negf %381 : vector<8x128xf32>
    %383 = math.exp %382 : vector<8x128xf32>
    %cst_117 = arith.constant 1.000000e+00 : f32
    %384 = vector.broadcast %cst_117 : f32 to vector<8x128xf32>
    %385 = arith.addf %384, %383 : vector<8x128xf32>
    %386 = arith.divf %384, %385 : vector<8x128xf32>
    %387 = vector.extract_strided_slice %380 {offsets = [0, 128], sizes = [8, 64], strides = [1, 1]} : vector<8x256xf32> to vector<8x64xf32>
    %388 = math.tanh %387 : vector<8x64xf32>
    %389 = vector.extract_strided_slice %380 {offsets = [0, 192], sizes = [8, 64], strides = [1, 1]} : vector<8x256xf32> to vector<8x64xf32>
    %390 = arith.negf %389 : vector<8x64xf32>
    %391 = math.exp %390 : vector<8x64xf32>
    %cst_118 = arith.constant 1.000000e+00 : f32
    %392 = vector.broadcast %cst_118 : f32 to vector<8x64xf32>
    %393 = arith.addf %392, %391 : vector<8x64xf32>
    %394 = arith.divf %392, %393 : vector<8x64xf32>
    %395 = vector.extract_strided_slice %386 {offsets = [0, 0], sizes = [8, 64], strides = [1, 1]} : vector<8x128xf32> to vector<8x64xf32>
    %396 = vector.extract_strided_slice %386 {offsets = [0, 64], sizes = [8, 64], strides = [1, 1]} : vector<8x128xf32> to vector<8x64xf32>
    %397 = arith.mulf %396, %359 : vector<8x64xf32>
    %398 = arith.mulf %395, %388 : vector<8x64xf32>
    %399 = arith.addf %397, %398 : vector<8x64xf32>
    %400 = math.tanh %399 : vector<8x64xf32>
    %401 = arith.mulf %394, %400 : vector<8x64xf32>
    %402 = vector.extract_strided_slice %401 {offsets = [0, 0], sizes = [8, 32], strides = [1, 1]} : vector<8x64xf32> to vector<8x32xf32>
    %403 = arith.truncf %402 : vector<8x32xf32> to vector<8x32xbf16>
    %404 = arith.index_cast %371 : i32 to index
    %c0_119 = arith.constant 0 : index
    %405 = vector.load %arg17[%404, %c0_119] : memref<64x64xbf16, #tpu.memory_space<vmem>>, vector<8x32xbf16>
    tpu.vector_store %arg17[%404, %c0_119], %403 {strides = array<i32>} : memref<64x64xbf16, #tpu.memory_space<vmem>>, vector<8x32xbf16>,
    %406 = vector.extract_strided_slice %401 {offsets = [0, 32], sizes = [8, 32], strides = [1, 1]} : vector<8x64xf32> to vector<8x32xf32>
    %407 = arith.truncf %406 : vector<8x32xf32> to vector<8x32xbf16>
    %408 = arith.index_cast %374 : i32 to index
    %c32_120 = arith.constant 32 : index
    %409 = vector.load %arg17[%408, %c32_120] : memref<64x64xbf16, #tpu.memory_space<vmem>>, vector<8x32xbf16>
    tpu.vector_store %arg17[%408, %c32_120], %407 {strides = array<i32>} : memref<64x64xbf16, #tpu.memory_space<vmem>>, vector<8x32xbf16>,
    %c8_i32_121 = arith.constant 8 : i32
    %c0_122 = arith.constant 0 : index
    %c0_123 = arith.constant 0 : index
    %410 = vector.load %arg17[%c0_122, %c0_123] : memref<64x64xbf16, #tpu.memory_space<vmem>>, vector<64x64xbf16>
    %c0_124 = arith.constant 0 : index
    %c0_125 = arith.constant 0 : index
    %411 = vector.load %arg6[%c0_124, %c0_125] : memref<64x256xbf16, #tpu.memory_space<vmem>>, vector<64x256xbf16>
    %c0_126 = arith.constant 0 : index
    %c0_127 = arith.constant 0 : index
    %412 = vector.load %arg8[%c0_126, %c0_127] : memref<1x256xf32, #tpu.memory_space<vmem>>, vector<1x256xf32>
    %c0_128 = arith.constant 0 : index
    %c0_129 = arith.constant 0 : index
    %413 = vector.load %arg7[%c0_128, %c0_129] : memref<64x256xbf16, #tpu.memory_space<vmem>>, vector<64x256xbf16>
    %c0_130 = arith.constant 0 : index
    %c0_131 = arith.constant 0 : index
    %414 = vector.load %arg9[%c0_130, %c0_131] : memref<8x64xf32, #tpu.memory_space<vmem>>, vector<8x64xf32>
    %c0_132 = arith.constant 0 : index
    %c0_133 = arith.constant 0 : index
    %415 = vector.load %arg10[%c0_132, %c0_133] : memref<8x64xf32, #tpu.memory_space<vmem>>, vector<8x64xf32>
    %cst_134 = arith.constant dense<0.000000e+00> : vector<64x256xf32>
    %416 = tpu.matmul %410, %411, %cst_134 {dimension_numbers = #tpu.dot_dimension_numbers<[1], [0], [0], [1], [0, 0, 1, 1], [], []>} : vector<64x64xbf16>, vector<64x256xbf16>, vector<64x256xf32> -> vector<64x256xf32>
    %417 = vector.broadcast %412 : vector<1x256xf32> to vector<64x256xf32>
    %418 = arith.addf %416, %417 : vector<64x256xf32>
    %419 = arith.truncf %418 : vector<64x256xf32> to vector<64x256xbf16>
    %c0_135 = arith.constant 0 : index
    %c0_136 = arith.constant 0 : index
    %420 = vector.load %arg16[%c0_135, %c0_136] : memref<64x256xbf16, #tpu.memory_space<vmem>>, vector<64x256xbf16>
    tpu.vector_store %arg16[%c0_135, %c0_136], %419 {strides = array<i32>} : memref<64x256xbf16, #tpu.memory_space<vmem>>, vector<64x256xbf16>,
    %c0_i32_137 = arith.constant 0 : i32
    %c8_i32_138 = arith.constant 8 : i32
    %421 = arith.muli %c0_i32_137, %c8_i32_138 : i32
    %422 = tpu.assume_multiple %421, 8 : i32
    %c7_i32_139 = arith.constant 7 : i32
    %423 = arith.subi %c7_i32_139, %c0_i32_137 : i32
    %c8_i32_140 = arith.constant 8 : i32
    %424 = arith.muli %423, %c8_i32_140 : i32
    %425 = tpu.assume_multiple %424, 8 : i32
    %426 = arith.index_cast %422 : i32 to index
    %c0_141 = arith.constant 0 : index
    %427 = vector.load %arg16[%426, %c0_141] : memref<64x256xbf16, #tpu.memory_space<vmem>>, vector<8x256xbf16>
    %428 = arith.index_cast %425 : i32 to index
    %c0_142 = arith.constant 0 : index
    %429 = vector.load %arg16[%428, %c0_142] : memref<64x256xbf16, #tpu.memory_space<vmem>>, vector<8x256xbf16>
    %430 = arith.select %18, %427, %429 : vector<8x256xi1>, vector<8x256xbf16>
    %431 = arith.index_cast %422 : i32 to index
    %c0_143 = arith.constant 0 : index
    %432 = vector.load %arg16[%431, %c0_143] : memref<64x256xbf16, #tpu.memory_space<vmem>>, vector<8x256xbf16>
    tpu.vector_store %arg16[%431, %c0_143], %430 {strides = array<i32>} : memref<64x256xbf16, #tpu.memory_space<vmem>>, vector<8x256xbf16>,
    %433 = arith.select %18, %429, %427 : vector<8x256xi1>, vector<8x256xbf16>
    %434 = arith.index_cast %425 : i32 to index
    %c0_144 = arith.constant 0 : index
    %435 = vector.load %arg16[%434, %c0_144] : memref<64x256xbf16, #tpu.memory_space<vmem>>, vector<8x256xbf16>
    tpu.vector_store %arg16[%434, %c0_144], %433 {strides = array<i32>} : memref<64x256xbf16, #tpu.memory_space<vmem>>, vector<8x256xbf16>,
    %c1_i32_145 = arith.constant 1 : i32
    %c8_i32_146 = arith.constant 8 : i32
    %436 = arith.muli %c1_i32_145, %c8_i32_146 : i32
    %437 = tpu.assume_multiple %436, 8 : i32
    %c7_i32_147 = arith.constant 7 : i32
    %438 = arith.subi %c7_i32_147, %c1_i32_145 : i32
    %c8_i32_148 = arith.constant 8 : i32
    %439 = arith.muli %438, %c8_i32_148 : i32
    %440 = tpu.assume_multiple %439, 8 : i32
    %441 = arith.index_cast %437 : i32 to index
    %c0_149 = arith.constant 0 : index
    %442 = vector.load %arg16[%441, %c0_149] : memref<64x256xbf16, #tpu.memory_space<vmem>>, vector<8x256xbf16>
    %443 = arith.index_cast %440 : i32 to index
    %c0_150 = arith.constant 0 : index
    %444 = vector.load %arg16[%443, %c0_150] : memref<64x256xbf16, #tpu.memory_space<vmem>>, vector<8x256xbf16>
    %445 = arith.select %18, %442, %444 : vector<8x256xi1>, vector<8x256xbf16>
    %446 = arith.index_cast %437 : i32 to index
    %c0_151 = arith.constant 0 : index
    %447 = vector.load %arg16[%446, %c0_151] : memref<64x256xbf16, #tpu.memory_space<vmem>>, vector<8x256xbf16>
    tpu.vector_store %arg16[%446, %c0_151], %445 {strides = array<i32>} : memref<64x256xbf16, #tpu.memory_space<vmem>>, vector<8x256xbf16>,
    %448 = arith.select %18, %444, %442 : vector<8x256xi1>, vector<8x256xbf16>
    %449 = arith.index_cast %440 : i32 to index
    %c0_152 = arith.constant 0 : index
    %450 = vector.load %arg16[%449, %c0_152] : memref<64x256xbf16, #tpu.memory_space<vmem>>, vector<8x256xbf16>
    tpu.vector_store %arg16[%449, %c0_152], %448 {strides = array<i32>} : memref<64x256xbf16, #tpu.memory_space<vmem>>, vector<8x256xbf16>,
    %c2_i32_153 = arith.constant 2 : i32
    %c8_i32_154 = arith.constant 8 : i32
    %451 = arith.muli %c2_i32_153, %c8_i32_154 : i32
    %452 = tpu.assume_multiple %451, 8 : i32
    %c7_i32_155 = arith.constant 7 : i32
    %453 = arith.subi %c7_i32_155, %c2_i32_153 : i32
    %c8_i32_156 = arith.constant 8 : i32
    %454 = arith.muli %453, %c8_i32_156 : i32
    %455 = tpu.assume_multiple %454, 8 : i32
    %456 = arith.index_cast %452 : i32 to index
    %c0_157 = arith.constant 0 : index
    %457 = vector.load %arg16[%456, %c0_157] : memref<64x256xbf16, #tpu.memory_space<vmem>>, vector<8x256xbf16>
    %458 = arith.index_cast %455 : i32 to index
    %c0_158 = arith.constant 0 : index
    %459 = vector.load %arg16[%458, %c0_158] : memref<64x256xbf16, #tpu.memory_space<vmem>>, vector<8x256xbf16>
    %460 = arith.select %18, %457, %459 : vector<8x256xi1>, vector<8x256xbf16>
    %461 = arith.index_cast %452 : i32 to index
    %c0_159 = arith.constant 0 : index
    %462 = vector.load %arg16[%461, %c0_159] : memref<64x256xbf16, #tpu.memory_space<vmem>>, vector<8x256xbf16>
    tpu.vector_store %arg16[%461, %c0_159], %460 {strides = array<i32>} : memref<64x256xbf16, #tpu.memory_space<vmem>>, vector<8x256xbf16>,
    %463 = arith.select %18, %459, %457 : vector<8x256xi1>, vector<8x256xbf16>
    %464 = arith.index_cast %455 : i32 to index
    %c0_160 = arith.constant 0 : index
    %465 = vector.load %arg16[%464, %c0_160] : memref<64x256xbf16, #tpu.memory_space<vmem>>, vector<8x256xbf16>
    tpu.vector_store %arg16[%464, %c0_160], %463 {strides = array<i32>} : memref<64x256xbf16, #tpu.memory_space<vmem>>, vector<8x256xbf16>,
    %c3_i32_161 = arith.constant 3 : i32
    %c8_i32_162 = arith.constant 8 : i32
    %466 = arith.muli %c3_i32_161, %c8_i32_162 : i32
    %467 = tpu.assume_multiple %466, 8 : i32
    %c7_i32_163 = arith.constant 7 : i32
    %468 = arith.subi %c7_i32_163, %c3_i32_161 : i32
    %c8_i32_164 = arith.constant 8 : i32
    %469 = arith.muli %468, %c8_i32_164 : i32
    %470 = tpu.assume_multiple %469, 8 : i32
    %471 = arith.index_cast %467 : i32 to index
    %c0_165 = arith.constant 0 : index
    %472 = vector.load %arg16[%471, %c0_165] : memref<64x256xbf16, #tpu.memory_space<vmem>>, vector<8x256xbf16>
    %473 = arith.index_cast %470 : i32 to index
    %c0_166 = arith.constant 0 : index
    %474 = vector.load %arg16[%473, %c0_166] : memref<64x256xbf16, #tpu.memory_space<vmem>>, vector<8x256xbf16>
    %475 = arith.select %18, %472, %474 : vector<8x256xi1>, vector<8x256xbf16>
    %476 = arith.index_cast %467 : i32 to index
    %c0_167 = arith.constant 0 : index
    %477 = vector.load %arg16[%476, %c0_167] : memref<64x256xbf16, #tpu.memory_space<vmem>>, vector<8x256xbf16>
    tpu.vector_store %arg16[%476, %c0_167], %475 {strides = array<i32>} : memref<64x256xbf16, #tpu.memory_space<vmem>>, vector<8x256xbf16>,
    %478 = arith.select %18, %474, %472 : vector<8x256xi1>, vector<8x256xbf16>
    %479 = arith.index_cast %470 : i32 to index
    %c0_168 = arith.constant 0 : index
    %480 = vector.load %arg16[%479, %c0_168] : memref<64x256xbf16, #tpu.memory_space<vmem>>, vector<8x256xbf16>
    tpu.vector_store %arg16[%479, %c0_168], %478 {strides = array<i32>} : memref<64x256xbf16, #tpu.memory_space<vmem>>, vector<8x256xbf16>,
    %c4_i32_169 = arith.constant 4 : i32
    %c0_i32_170 = arith.constant 0 : i32
    %c8_i32_171 = arith.constant 8 : i32
    %481 = arith.muli %c0_i32_170, %c8_i32_171 : i32
    %482 = tpu.assume_multiple %481, 8 : i32
    %c7_i32_172 = arith.constant 7 : i32
    %483 = arith.subi %c7_i32_172, %c0_i32_170 : i32
    %c8_i32_173 = arith.constant 8 : i32
    %484 = arith.muli %483, %c8_i32_173 : i32
    %485 = tpu.assume_multiple %484, 8 : i32
    %486 = arith.index_cast %482 : i32 to index
    %c0_174 = arith.constant 0 : index
    %487 = vector.load %arg16[%486, %c0_174] : memref<64x256xbf16, #tpu.memory_space<vmem>>, vector<8x256xbf16>
    %488 = arith.extf %487 : vector<8x256xbf16> to vector<8x256xf32>
    %489 = arith.truncf %414 : vector<8x64xf32> to vector<8x64xbf16>
    %cst_175 = arith.constant dense<0.000000e+00> : vector<8x256xf32>
    %490 = tpu.matmul %489, %413, %cst_175 {dimension_numbers = #tpu.dot_dimension_numbers<[1], [0], [0], [1], [0, 0, 1, 1], [], []>} : vector<8x64xbf16>, vector<64x256xbf16>, vector<8x256xf32> -> vector<8x256xf32>
    %491 = arith.addf %488, %490 : vector<8x256xf32>
    %492 = vector.extract_strided_slice %491 {offsets = [0, 0], sizes = [8, 128], strides = [1, 1]} : vector<8x256xf32> to vector<8x128xf32>
    %493 = arith.negf %492 : vector<8x128xf32>
    %494 = math.exp %493 : vector<8x128xf32>
    %cst_176 = arith.constant 1.000000e+00 : f32
    %495 = vector.broadcast %cst_176 : f32 to vector<8x128xf32>
    %496 = arith.addf %495, %494 : vector<8x128xf32>
    %497 = arith.divf %495, %496 : vector<8x128xf32>
    %498 = vector.extract_strided_slice %491 {offsets = [0, 128], sizes = [8, 64], strides = [1, 1]} : vector<8x256xf32> to vector<8x64xf32>
    %499 = math.tanh %498 : vector<8x64xf32>
    %500 = vector.extract_strided_slice %491 {offsets = [0, 192], sizes = [8, 64], strides = [1, 1]} : vector<8x256xf32> to vector<8x64xf32>
    %501 = arith.negf %500 : vector<8x64xf32>
    %502 = math.exp %501 : vector<8x64xf32>
    %cst_177 = arith.constant 1.000000e+00 : f32
    %503 = vector.broadcast %cst_177 : f32 to vector<8x64xf32>
    %504 = arith.addf %503, %502 : vector<8x64xf32>
    %505 = arith.divf %503, %504 : vector<8x64xf32>
    %506 = vector.extract_strided_slice %497 {offsets = [0, 0], sizes = [8, 64], strides = [1, 1]} : vector<8x128xf32> to vector<8x64xf32>
    %507 = vector.extract_strided_slice %497 {offsets = [0, 64], sizes = [8, 64], strides = [1, 1]} : vector<8x128xf32> to vector<8x64xf32>
    %508 = arith.mulf %507, %415 : vector<8x64xf32>
    %509 = arith.mulf %506, %499 : vector<8x64xf32>
    %510 = arith.addf %508, %509 : vector<8x64xf32>
    %511 = math.tanh %510 : vector<8x64xf32>
    %512 = arith.mulf %505, %511 : vector<8x64xf32>
    %513 = vector.extract_strided_slice %512 {offsets = [0, 0], sizes = [8, 32], strides = [1, 1]} : vector<8x64xf32> to vector<8x32xf32>
    %514 = arith.truncf %513 : vector<8x32xf32> to vector<8x32xbf16>
    %515 = arith.index_cast %482 : i32 to index
    %c0_178 = arith.constant 0 : index
    %516 = vector.load %arg17[%515, %c0_178] : memref<64x64xbf16, #tpu.memory_space<vmem>>, vector<8x32xbf16>
    tpu.vector_store %arg17[%515, %c0_178], %514 {strides = array<i32>} : memref<64x64xbf16, #tpu.memory_space<vmem>>, vector<8x32xbf16>,
    %517 = vector.extract_strided_slice %512 {offsets = [0, 32], sizes = [8, 32], strides = [1, 1]} : vector<8x64xf32> to vector<8x32xf32>
    %518 = arith.truncf %517 : vector<8x32xf32> to vector<8x32xbf16>
    %519 = arith.index_cast %485 : i32 to index
    %c32_179 = arith.constant 32 : index
    %520 = vector.load %arg17[%519, %c32_179] : memref<64x64xbf16, #tpu.memory_space<vmem>>, vector<8x32xbf16>
    tpu.vector_store %arg17[%519, %c32_179], %518 {strides = array<i32>} : memref<64x64xbf16, #tpu.memory_space<vmem>>, vector<8x32xbf16>,
    %c1_i32_180 = arith.constant 1 : i32
    %c8_i32_181 = arith.constant 8 : i32
    %521 = arith.muli %c1_i32_180, %c8_i32_181 : i32
    %522 = tpu.assume_multiple %521, 8 : i32
    %c7_i32_182 = arith.constant 7 : i32
    %523 = arith.subi %c7_i32_182, %c1_i32_180 : i32
    %c8_i32_183 = arith.constant 8 : i32
    %524 = arith.muli %523, %c8_i32_183 : i32
    %525 = tpu.assume_multiple %524, 8 : i32
    %526 = arith.index_cast %522 : i32 to index
    %c0_184 = arith.constant 0 : index
    %527 = vector.load %arg16[%526, %c0_184] : memref<64x256xbf16, #tpu.memory_space<vmem>>, vector<8x256xbf16>
    %528 = arith.extf %527 : vector<8x256xbf16> to vector<8x256xf32>
    %529 = arith.truncf %512 : vector<8x64xf32> to vector<8x64xbf16>
    %cst_185 = arith.constant dense<0.000000e+00> : vector<8x256xf32>
    %530 = tpu.matmul %529, %413, %cst_185 {dimension_numbers = #tpu.dot_dimension_numbers<[1], [0], [0], [1], [0, 0, 1, 1], [], []>} : vector<8x64xbf16>, vector<64x256xbf16>, vector<8x256xf32> -> vector<8x256xf32>
    %531 = arith.addf %528, %530 : vector<8x256xf32>
    %532 = vector.extract_strided_slice %531 {offsets = [0, 0], sizes = [8, 128], strides = [1, 1]} : vector<8x256xf32> to vector<8x128xf32>
    %533 = arith.negf %532 : vector<8x128xf32>
    %534 = math.exp %533 : vector<8x128xf32>
    %cst_186 = arith.constant 1.000000e+00 : f32
    %535 = vector.broadcast %cst_186 : f32 to vector<8x128xf32>
    %536 = arith.addf %535, %534 : vector<8x128xf32>
    %537 = arith.divf %535, %536 : vector<8x128xf32>
    %538 = vector.extract_strided_slice %531 {offsets = [0, 128], sizes = [8, 64], strides = [1, 1]} : vector<8x256xf32> to vector<8x64xf32>
    %539 = math.tanh %538 : vector<8x64xf32>
    %540 = vector.extract_strided_slice %531 {offsets = [0, 192], sizes = [8, 64], strides = [1, 1]} : vector<8x256xf32> to vector<8x64xf32>
    %541 = arith.negf %540 : vector<8x64xf32>
    %542 = math.exp %541 : vector<8x64xf32>
    %cst_187 = arith.constant 1.000000e+00 : f32
    %543 = vector.broadcast %cst_187 : f32 to vector<8x64xf32>
    %544 = arith.addf %543, %542 : vector<8x64xf32>
    %545 = arith.divf %543, %544 : vector<8x64xf32>
    %546 = vector.extract_strided_slice %537 {offsets = [0, 0], sizes = [8, 64], strides = [1, 1]} : vector<8x128xf32> to vector<8x64xf32>
    %547 = vector.extract_strided_slice %537 {offsets = [0, 64], sizes = [8, 64], strides = [1, 1]} : vector<8x128xf32> to vector<8x64xf32>
    %548 = arith.mulf %547, %510 : vector<8x64xf32>
    %549 = arith.mulf %546, %539 : vector<8x64xf32>
    %550 = arith.addf %548, %549 : vector<8x64xf32>
    %551 = math.tanh %550 : vector<8x64xf32>
    %552 = arith.mulf %545, %551 : vector<8x64xf32>
    %553 = vector.extract_strided_slice %552 {offsets = [0, 0], sizes = [8, 32], strides = [1, 1]} : vector<8x64xf32> to vector<8x32xf32>
    %554 = arith.truncf %553 : vector<8x32xf32> to vector<8x32xbf16>
    %555 = arith.index_cast %522 : i32 to index
    %c0_188 = arith.constant 0 : index
    %556 = vector.load %arg17[%555, %c0_188] : memref<64x64xbf16, #tpu.memory_space<vmem>>, vector<8x32xbf16>
    tpu.vector_store %arg17[%555, %c0_188], %554 {strides = array<i32>} : memref<64x64xbf16, #tpu.memory_space<vmem>>, vector<8x32xbf16>,
    %557 = vector.extract_strided_slice %552 {offsets = [0, 32], sizes = [8, 32], strides = [1, 1]} : vector<8x64xf32> to vector<8x32xf32>
    %558 = arith.truncf %557 : vector<8x32xf32> to vector<8x32xbf16>
    %559 = arith.index_cast %525 : i32 to index
    %c32_189 = arith.constant 32 : index
    %560 = vector.load %arg17[%559, %c32_189] : memref<64x64xbf16, #tpu.memory_space<vmem>>, vector<8x32xbf16>
    tpu.vector_store %arg17[%559, %c32_189], %558 {strides = array<i32>} : memref<64x64xbf16, #tpu.memory_space<vmem>>, vector<8x32xbf16>,
    %c2_i32_190 = arith.constant 2 : i32
    %c8_i32_191 = arith.constant 8 : i32
    %561 = arith.muli %c2_i32_190, %c8_i32_191 : i32
    %562 = tpu.assume_multiple %561, 8 : i32
    %c7_i32_192 = arith.constant 7 : i32
    %563 = arith.subi %c7_i32_192, %c2_i32_190 : i32
    %c8_i32_193 = arith.constant 8 : i32
    %564 = arith.muli %563, %c8_i32_193 : i32
    %565 = tpu.assume_multiple %564, 8 : i32
    %566 = arith.index_cast %562 : i32 to index
    %c0_194 = arith.constant 0 : index
    %567 = vector.load %arg16[%566, %c0_194] : memref<64x256xbf16, #tpu.memory_space<vmem>>, vector<8x256xbf16>
    %568 = arith.extf %567 : vector<8x256xbf16> to vector<8x256xf32>
    %569 = arith.truncf %552 : vector<8x64xf32> to vector<8x64xbf16>
    %cst_195 = arith.constant dense<0.000000e+00> : vector<8x256xf32>
    %570 = tpu.matmul %569, %413, %cst_195 {dimension_numbers = #tpu.dot_dimension_numbers<[1], [0], [0], [1], [0, 0, 1, 1], [], []>} : vector<8x64xbf16>, vector<64x256xbf16>, vector<8x256xf32> -> vector<8x256xf32>
    %571 = arith.addf %568, %570 : vector<8x256xf32>
    %572 = vector.extract_strided_slice %571 {offsets = [0, 0], sizes = [8, 128], strides = [1, 1]} : vector<8x256xf32> to vector<8x128xf32>
    %573 = arith.negf %572 : vector<8x128xf32>
    %574 = math.exp %573 : vector<8x128xf32>
    %cst_196 = arith.constant 1.000000e+00 : f32
    %575 = vector.broadcast %cst_196 : f32 to vector<8x128xf32>
    %576 = arith.addf %575, %574 : vector<8x128xf32>
    %577 = arith.divf %575, %576 : vector<8x128xf32>
    %578 = vector.extract_strided_slice %571 {offsets = [0, 128], sizes = [8, 64], strides = [1, 1]} : vector<8x256xf32> to vector<8x64xf32>
    %579 = math.tanh %578 : vector<8x64xf32>
    %580 = vector.extract_strided_slice %571 {offsets = [0, 192], sizes = [8, 64], strides = [1, 1]} : vector<8x256xf32> to vector<8x64xf32>
    %581 = arith.negf %580 : vector<8x64xf32>
    %582 = math.exp %581 : vector<8x64xf32>
    %cst_197 = arith.constant 1.000000e+00 : f32
    %583 = vector.broadcast %cst_197 : f32 to vector<8x64xf32>
    %584 = arith.addf %583, %582 : vector<8x64xf32>
    %585 = arith.divf %583, %584 : vector<8x64xf32>
    %586 = vector.extract_strided_slice %577 {offsets = [0, 0], sizes = [8, 64], strides = [1, 1]} : vector<8x128xf32> to vector<8x64xf32>
    %587 = vector.extract_strided_slice %577 {offsets = [0, 64], sizes = [8, 64], strides = [1, 1]} : vector<8x128xf32> to vector<8x64xf32>
    %588 = arith.mulf %587, %550 : vector<8x64xf32>
    %589 = arith.mulf %586, %579 : vector<8x64xf32>
    %590 = arith.addf %588, %589 : vector<8x64xf32>
    %591 = math.tanh %590 : vector<8x64xf32>
    %592 = arith.mulf %585, %591 : vector<8x64xf32>
    %593 = vector.extract_strided_slice %592 {offsets = [0, 0], sizes = [8, 32], strides = [1, 1]} : vector<8x64xf32> to vector<8x32xf32>
    %594 = arith.truncf %593 : vector<8x32xf32> to vector<8x32xbf16>
    %595 = arith.index_cast %562 : i32 to index
    %c0_198 = arith.constant 0 : index
    %596 = vector.load %arg17[%595, %c0_198] : memref<64x64xbf16, #tpu.memory_space<vmem>>, vector<8x32xbf16>
    tpu.vector_store %arg17[%595, %c0_198], %594 {strides = array<i32>} : memref<64x64xbf16, #tpu.memory_space<vmem>>, vector<8x32xbf16>,
    %597 = vector.extract_strided_slice %592 {offsets = [0, 32], sizes = [8, 32], strides = [1, 1]} : vector<8x64xf32> to vector<8x32xf32>
    %598 = arith.truncf %597 : vector<8x32xf32> to vector<8x32xbf16>
    %599 = arith.index_cast %565 : i32 to index
    %c32_199 = arith.constant 32 : index
    %600 = vector.load %arg17[%599, %c32_199] : memref<64x64xbf16, #tpu.memory_space<vmem>>, vector<8x32xbf16>
    tpu.vector_store %arg17[%599, %c32_199], %598 {strides = array<i32>} : memref<64x64xbf16, #tpu.memory_space<vmem>>, vector<8x32xbf16>,
    %c3_i32_200 = arith.constant 3 : i32
    %c8_i32_201 = arith.constant 8 : i32
    %601 = arith.muli %c3_i32_200, %c8_i32_201 : i32
    %602 = tpu.assume_multiple %601, 8 : i32
    %c7_i32_202 = arith.constant 7 : i32
    %603 = arith.subi %c7_i32_202, %c3_i32_200 : i32
    %c8_i32_203 = arith.constant 8 : i32
    %604 = arith.muli %603, %c8_i32_203 : i32
    %605 = tpu.assume_multiple %604, 8 : i32
    %606 = arith.index_cast %602 : i32 to index
    %c0_204 = arith.constant 0 : index
    %607 = vector.load %arg16[%606, %c0_204] : memref<64x256xbf16, #tpu.memory_space<vmem>>, vector<8x256xbf16>
    %608 = arith.extf %607 : vector<8x256xbf16> to vector<8x256xf32>
    %609 = arith.truncf %592 : vector<8x64xf32> to vector<8x64xbf16>
    %cst_205 = arith.constant dense<0.000000e+00> : vector<8x256xf32>
    %610 = tpu.matmul %609, %413, %cst_205 {dimension_numbers = #tpu.dot_dimension_numbers<[1], [0], [0], [1], [0, 0, 1, 1], [], []>} : vector<8x64xbf16>, vector<64x256xbf16>, vector<8x256xf32> -> vector<8x256xf32>
    %611 = arith.addf %608, %610 : vector<8x256xf32>
    %612 = vector.extract_strided_slice %611 {offsets = [0, 0], sizes = [8, 128], strides = [1, 1]} : vector<8x256xf32> to vector<8x128xf32>
    %613 = arith.negf %612 : vector<8x128xf32>
    %614 = math.exp %613 : vector<8x128xf32>
    %cst_206 = arith.constant 1.000000e+00 : f32
    %615 = vector.broadcast %cst_206 : f32 to vector<8x128xf32>
    %616 = arith.addf %615, %614 : vector<8x128xf32>
    %617 = arith.divf %615, %616 : vector<8x128xf32>
    %618 = vector.extract_strided_slice %611 {offsets = [0, 128], sizes = [8, 64], strides = [1, 1]} : vector<8x256xf32> to vector<8x64xf32>
    %619 = math.tanh %618 : vector<8x64xf32>
    %620 = vector.extract_strided_slice %611 {offsets = [0, 192], sizes = [8, 64], strides = [1, 1]} : vector<8x256xf32> to vector<8x64xf32>
    %621 = arith.negf %620 : vector<8x64xf32>
    %622 = math.exp %621 : vector<8x64xf32>
    %cst_207 = arith.constant 1.000000e+00 : f32
    %623 = vector.broadcast %cst_207 : f32 to vector<8x64xf32>
    %624 = arith.addf %623, %622 : vector<8x64xf32>
    %625 = arith.divf %623, %624 : vector<8x64xf32>
    %626 = vector.extract_strided_slice %617 {offsets = [0, 0], sizes = [8, 64], strides = [1, 1]} : vector<8x128xf32> to vector<8x64xf32>
    %627 = vector.extract_strided_slice %617 {offsets = [0, 64], sizes = [8, 64], strides = [1, 1]} : vector<8x128xf32> to vector<8x64xf32>
    %628 = arith.mulf %627, %590 : vector<8x64xf32>
    %629 = arith.mulf %626, %619 : vector<8x64xf32>
    %630 = arith.addf %628, %629 : vector<8x64xf32>
    %631 = math.tanh %630 : vector<8x64xf32>
    %632 = arith.mulf %625, %631 : vector<8x64xf32>
    %633 = vector.extract_strided_slice %632 {offsets = [0, 0], sizes = [8, 32], strides = [1, 1]} : vector<8x64xf32> to vector<8x32xf32>
    %634 = arith.truncf %633 : vector<8x32xf32> to vector<8x32xbf16>
    %635 = arith.index_cast %602 : i32 to index
    %c0_208 = arith.constant 0 : index
    %636 = vector.load %arg17[%635, %c0_208] : memref<64x64xbf16, #tpu.memory_space<vmem>>, vector<8x32xbf16>
    tpu.vector_store %arg17[%635, %c0_208], %634 {strides = array<i32>} : memref<64x64xbf16, #tpu.memory_space<vmem>>, vector<8x32xbf16>,
    %637 = vector.extract_strided_slice %632 {offsets = [0, 32], sizes = [8, 32], strides = [1, 1]} : vector<8x64xf32> to vector<8x32xf32>
    %638 = arith.truncf %637 : vector<8x32xf32> to vector<8x32xbf16>
    %639 = arith.index_cast %605 : i32 to index
    %c32_209 = arith.constant 32 : index
    %640 = vector.load %arg17[%639, %c32_209] : memref<64x64xbf16, #tpu.memory_space<vmem>>, vector<8x32xbf16>
    tpu.vector_store %arg17[%639, %c32_209], %638 {strides = array<i32>} : memref<64x64xbf16, #tpu.memory_space<vmem>>, vector<8x32xbf16>,
    %c4_i32_210 = arith.constant 4 : i32
    %c8_i32_211 = arith.constant 8 : i32
    %641 = arith.muli %c4_i32_210, %c8_i32_211 : i32
    %642 = tpu.assume_multiple %641, 8 : i32
    %c7_i32_212 = arith.constant 7 : i32
    %643 = arith.subi %c7_i32_212, %c4_i32_210 : i32
    %c8_i32_213 = arith.constant 8 : i32
    %644 = arith.muli %643, %c8_i32_213 : i32
    %645 = tpu.assume_multiple %644, 8 : i32
    %646 = arith.index_cast %642 : i32 to index
    %c0_214 = arith.constant 0 : index
    %647 = vector.load %arg16[%646, %c0_214] : memref<64x256xbf16, #tpu.memory_space<vmem>>, vector<8x256xbf16>
    %648 = arith.extf %647 : vector<8x256xbf16> to vector<8x256xf32>
    %649 = arith.truncf %632 : vector<8x64xf32> to vector<8x64xbf16>
    %cst_215 = arith.constant dense<0.000000e+00> : vector<8x256xf32>
    %650 = tpu.matmul %649, %413, %cst_215 {dimension_numbers = #tpu.dot_dimension_numbers<[1], [0], [0], [1], [0, 0, 1, 1], [], []>} : vector<8x64xbf16>, vector<64x256xbf16>, vector<8x256xf32> -> vector<8x256xf32>
    %651 = arith.addf %648, %650 : vector<8x256xf32>
    %652 = vector.extract_strided_slice %651 {offsets = [0, 0], sizes = [8, 128], strides = [1, 1]} : vector<8x256xf32> to vector<8x128xf32>
    %653 = arith.negf %652 : vector<8x128xf32>
    %654 = math.exp %653 : vector<8x128xf32>
    %cst_216 = arith.constant 1.000000e+00 : f32
    %655 = vector.broadcast %cst_216 : f32 to vector<8x128xf32>
    %656 = arith.addf %655, %654 : vector<8x128xf32>
    %657 = arith.divf %655, %656 : vector<8x128xf32>
    %658 = vector.extract_strided_slice %651 {offsets = [0, 128], sizes = [8, 64], strides = [1, 1]} : vector<8x256xf32> to vector<8x64xf32>
    %659 = math.tanh %658 : vector<8x64xf32>
    %660 = vector.extract_strided_slice %651 {offsets = [0, 192], sizes = [8, 64], strides = [1, 1]} : vector<8x256xf32> to vector<8x64xf32>
    %661 = arith.negf %660 : vector<8x64xf32>
    %662 = math.exp %661 : vector<8x64xf32>
    %cst_217 = arith.constant 1.000000e+00 : f32
    %663 = vector.broadcast %cst_217 : f32 to vector<8x64xf32>
    %664 = arith.addf %663, %662 : vector<8x64xf32>
    %665 = arith.divf %663, %664 : vector<8x64xf32>
    %666 = vector.extract_strided_slice %657 {offsets = [0, 0], sizes = [8, 64], strides = [1, 1]} : vector<8x128xf32> to vector<8x64xf32>
    %667 = vector.extract_strided_slice %657 {offsets = [0, 64], sizes = [8, 64], strides = [1, 1]} : vector<8x128xf32> to vector<8x64xf32>
    %668 = arith.mulf %667, %630 : vector<8x64xf32>
    %669 = arith.mulf %666, %659 : vector<8x64xf32>
    %670 = arith.addf %668, %669 : vector<8x64xf32>
    %671 = math.tanh %670 : vector<8x64xf32>
    %672 = arith.mulf %665, %671 : vector<8x64xf32>
    %673 = vector.extract_strided_slice %672 {offsets = [0, 0], sizes = [8, 32], strides = [1, 1]} : vector<8x64xf32> to vector<8x32xf32>
    %674 = arith.truncf %673 : vector<8x32xf32> to vector<8x32xbf16>
    %675 = arith.index_cast %642 : i32 to index
    %c0_218 = arith.constant 0 : index
    %676 = vector.load %arg17[%675, %c0_218] : memref<64x64xbf16, #tpu.memory_space<vmem>>, vector<8x32xbf16>
    tpu.vector_store %arg17[%675, %c0_218], %674 {strides = array<i32>} : memref<64x64xbf16, #tpu.memory_space<vmem>>, vector<8x32xbf16>,
    %677 = vector.extract_strided_slice %672 {offsets = [0, 32], sizes = [8, 32], strides = [1, 1]} : vector<8x64xf32> to vector<8x32xf32>
    %678 = arith.truncf %677 : vector<8x32xf32> to vector<8x32xbf16>
    %679 = arith.index_cast %645 : i32 to index
    %c32_219 = arith.constant 32 : index
    %680 = vector.load %arg17[%679, %c32_219] : memref<64x64xbf16, #tpu.memory_space<vmem>>, vector<8x32xbf16>
    tpu.vector_store %arg17[%679, %c32_219], %678 {strides = array<i32>} : memref<64x64xbf16, #tpu.memory_space<vmem>>, vector<8x32xbf16>,
    %c5_i32_220 = arith.constant 5 : i32
    %c8_i32_221 = arith.constant 8 : i32
    %681 = arith.muli %c5_i32_220, %c8_i32_221 : i32
    %682 = tpu.assume_multiple %681, 8 : i32
    %c7_i32_222 = arith.constant 7 : i32
    %683 = arith.subi %c7_i32_222, %c5_i32_220 : i32
    %c8_i32_223 = arith.constant 8 : i32
    %684 = arith.muli %683, %c8_i32_223 : i32
    %685 = tpu.assume_multiple %684, 8 : i32
    %686 = arith.index_cast %682 : i32 to index
    %c0_224 = arith.constant 0 : index
    %687 = vector.load %arg16[%686, %c0_224] : memref<64x256xbf16, #tpu.memory_space<vmem>>, vector<8x256xbf16>
    %688 = arith.extf %687 : vector<8x256xbf16> to vector<8x256xf32>
    %689 = arith.truncf %672 : vector<8x64xf32> to vector<8x64xbf16>
    %cst_225 = arith.constant dense<0.000000e+00> : vector<8x256xf32>
    %690 = tpu.matmul %689, %413, %cst_225 {dimension_numbers = #tpu.dot_dimension_numbers<[1], [0], [0], [1], [0, 0, 1, 1], [], []>} : vector<8x64xbf16>, vector<64x256xbf16>, vector<8x256xf32> -> vector<8x256xf32>
    %691 = arith.addf %688, %690 : vector<8x256xf32>
    %692 = vector.extract_strided_slice %691 {offsets = [0, 0], sizes = [8, 128], strides = [1, 1]} : vector<8x256xf32> to vector<8x128xf32>
    %693 = arith.negf %692 : vector<8x128xf32>
    %694 = math.exp %693 : vector<8x128xf32>
    %cst_226 = arith.constant 1.000000e+00 : f32
    %695 = vector.broadcast %cst_226 : f32 to vector<8x128xf32>
    %696 = arith.addf %695, %694 : vector<8x128xf32>
    %697 = arith.divf %695, %696 : vector<8x128xf32>
    %698 = vector.extract_strided_slice %691 {offsets = [0, 128], sizes = [8, 64], strides = [1, 1]} : vector<8x256xf32> to vector<8x64xf32>
    %699 = math.tanh %698 : vector<8x64xf32>
    %700 = vector.extract_strided_slice %691 {offsets = [0, 192], sizes = [8, 64], strides = [1, 1]} : vector<8x256xf32> to vector<8x64xf32>
    %701 = arith.negf %700 : vector<8x64xf32>
    %702 = math.exp %701 : vector<8x64xf32>
    %cst_227 = arith.constant 1.000000e+00 : f32
    %703 = vector.broadcast %cst_227 : f32 to vector<8x64xf32>
    %704 = arith.addf %703, %702 : vector<8x64xf32>
    %705 = arith.divf %703, %704 : vector<8x64xf32>
    %706 = vector.extract_strided_slice %697 {offsets = [0, 0], sizes = [8, 64], strides = [1, 1]} : vector<8x128xf32> to vector<8x64xf32>
    %707 = vector.extract_strided_slice %697 {offsets = [0, 64], sizes = [8, 64], strides = [1, 1]} : vector<8x128xf32> to vector<8x64xf32>
    %708 = arith.mulf %707, %670 : vector<8x64xf32>
    %709 = arith.mulf %706, %699 : vector<8x64xf32>
    %710 = arith.addf %708, %709 : vector<8x64xf32>
    %711 = math.tanh %710 : vector<8x64xf32>
    %712 = arith.mulf %705, %711 : vector<8x64xf32>
    %713 = vector.extract_strided_slice %712 {offsets = [0, 0], sizes = [8, 32], strides = [1, 1]} : vector<8x64xf32> to vector<8x32xf32>
    %714 = arith.truncf %713 : vector<8x32xf32> to vector<8x32xbf16>
    %715 = arith.index_cast %682 : i32 to index
    %c0_228 = arith.constant 0 : index
    %716 = vector.load %arg17[%715, %c0_228] : memref<64x64xbf16, #tpu.memory_space<vmem>>, vector<8x32xbf16>
    tpu.vector_store %arg17[%715, %c0_228], %714 {strides = array<i32>} : memref<64x64xbf16, #tpu.memory_space<vmem>>, vector<8x32xbf16>,
    %717 = vector.extract_strided_slice %712 {offsets = [0, 32], sizes = [8, 32], strides = [1, 1]} : vector<8x64xf32> to vector<8x32xf32>
    %718 = arith.truncf %717 : vector<8x32xf32> to vector<8x32xbf16>
    %719 = arith.index_cast %685 : i32 to index
    %c32_229 = arith.constant 32 : index
    %720 = vector.load %arg17[%719, %c32_229] : memref<64x64xbf16, #tpu.memory_space<vmem>>, vector<8x32xbf16>
    tpu.vector_store %arg17[%719, %c32_229], %718 {strides = array<i32>} : memref<64x64xbf16, #tpu.memory_space<vmem>>, vector<8x32xbf16>,
    %c6_i32_230 = arith.constant 6 : i32
    %c8_i32_231 = arith.constant 8 : i32
    %721 = arith.muli %c6_i32_230, %c8_i32_231 : i32
    %722 = tpu.assume_multiple %721, 8 : i32
    %c7_i32_232 = arith.constant 7 : i32
    %723 = arith.subi %c7_i32_232, %c6_i32_230 : i32
    %c8_i32_233 = arith.constant 8 : i32
    %724 = arith.muli %723, %c8_i32_233 : i32
    %725 = tpu.assume_multiple %724, 8 : i32
    %726 = arith.index_cast %722 : i32 to index
    %c0_234 = arith.constant 0 : index
    %727 = vector.load %arg16[%726, %c0_234] : memref<64x256xbf16, #tpu.memory_space<vmem>>, vector<8x256xbf16>
    %728 = arith.extf %727 : vector<8x256xbf16> to vector<8x256xf32>
    %729 = arith.truncf %712 : vector<8x64xf32> to vector<8x64xbf16>
    %cst_235 = arith.constant dense<0.000000e+00> : vector<8x256xf32>
    %730 = tpu.matmul %729, %413, %cst_235 {dimension_numbers = #tpu.dot_dimension_numbers<[1], [0], [0], [1], [0, 0, 1, 1], [], []>} : vector<8x64xbf16>, vector<64x256xbf16>, vector<8x256xf32> -> vector<8x256xf32>
    %731 = arith.addf %728, %730 : vector<8x256xf32>
    %732 = vector.extract_strided_slice %731 {offsets = [0, 0], sizes = [8, 128], strides = [1, 1]} : vector<8x256xf32> to vector<8x128xf32>
    %733 = arith.negf %732 : vector<8x128xf32>
    %734 = math.exp %733 : vector<8x128xf32>
    %cst_236 = arith.constant 1.000000e+00 : f32
    %735 = vector.broadcast %cst_236 : f32 to vector<8x128xf32>
    %736 = arith.addf %735, %734 : vector<8x128xf32>
    %737 = arith.divf %735, %736 : vector<8x128xf32>
    %738 = vector.extract_strided_slice %731 {offsets = [0, 128], sizes = [8, 64], strides = [1, 1]} : vector<8x256xf32> to vector<8x64xf32>
    %739 = math.tanh %738 : vector<8x64xf32>
    %740 = vector.extract_strided_slice %731 {offsets = [0, 192], sizes = [8, 64], strides = [1, 1]} : vector<8x256xf32> to vector<8x64xf32>
    %741 = arith.negf %740 : vector<8x64xf32>
    %742 = math.exp %741 : vector<8x64xf32>
    %cst_237 = arith.constant 1.000000e+00 : f32
    %743 = vector.broadcast %cst_237 : f32 to vector<8x64xf32>
    %744 = arith.addf %743, %742 : vector<8x64xf32>
    %745 = arith.divf %743, %744 : vector<8x64xf32>
    %746 = vector.extract_strided_slice %737 {offsets = [0, 0], sizes = [8, 64], strides = [1, 1]} : vector<8x128xf32> to vector<8x64xf32>
    %747 = vector.extract_strided_slice %737 {offsets = [0, 64], sizes = [8, 64], strides = [1, 1]} : vector<8x128xf32> to vector<8x64xf32>
    %748 = arith.mulf %747, %710 : vector<8x64xf32>
    %749 = arith.mulf %746, %739 : vector<8x64xf32>
    %750 = arith.addf %748, %749 : vector<8x64xf32>
    %751 = math.tanh %750 : vector<8x64xf32>
    %752 = arith.mulf %745, %751 : vector<8x64xf32>
    %753 = vector.extract_strided_slice %752 {offsets = [0, 0], sizes = [8, 32], strides = [1, 1]} : vector<8x64xf32> to vector<8x32xf32>
    %754 = arith.truncf %753 : vector<8x32xf32> to vector<8x32xbf16>
    %755 = arith.index_cast %722 : i32 to index
    %c0_238 = arith.constant 0 : index
    %756 = vector.load %arg17[%755, %c0_238] : memref<64x64xbf16, #tpu.memory_space<vmem>>, vector<8x32xbf16>
    tpu.vector_store %arg17[%755, %c0_238], %754 {strides = array<i32>} : memref<64x64xbf16, #tpu.memory_space<vmem>>, vector<8x32xbf16>,
    %757 = vector.extract_strided_slice %752 {offsets = [0, 32], sizes = [8, 32], strides = [1, 1]} : vector<8x64xf32> to vector<8x32xf32>
    %758 = arith.truncf %757 : vector<8x32xf32> to vector<8x32xbf16>
    %759 = arith.index_cast %725 : i32 to index
    %c32_239 = arith.constant 32 : index
    %760 = vector.load %arg17[%759, %c32_239] : memref<64x64xbf16, #tpu.memory_space<vmem>>, vector<8x32xbf16>
    tpu.vector_store %arg17[%759, %c32_239], %758 {strides = array<i32>} : memref<64x64xbf16, #tpu.memory_space<vmem>>, vector<8x32xbf16>,
    %c7_i32_240 = arith.constant 7 : i32
    %c8_i32_241 = arith.constant 8 : i32
    %761 = arith.muli %c7_i32_240, %c8_i32_241 : i32
    %762 = tpu.assume_multiple %761, 8 : i32
    %c7_i32_242 = arith.constant 7 : i32
    %763 = arith.subi %c7_i32_242, %c7_i32_240 : i32
    %c8_i32_243 = arith.constant 8 : i32
    %764 = arith.muli %763, %c8_i32_243 : i32
    %765 = tpu.assume_multiple %764, 8 : i32
    %766 = arith.index_cast %762 : i32 to index
    %c0_244 = arith.constant 0 : index
    %767 = vector.load %arg16[%766, %c0_244] : memref<64x256xbf16, #tpu.memory_space<vmem>>, vector<8x256xbf16>
    %768 = arith.extf %767 : vector<8x256xbf16> to vector<8x256xf32>
    %769 = arith.truncf %752 : vector<8x64xf32> to vector<8x64xbf16>
    %cst_245 = arith.constant dense<0.000000e+00> : vector<8x256xf32>
    %770 = tpu.matmul %769, %413, %cst_245 {dimension_numbers = #tpu.dot_dimension_numbers<[1], [0], [0], [1], [0, 0, 1, 1], [], []>} : vector<8x64xbf16>, vector<64x256xbf16>, vector<8x256xf32> -> vector<8x256xf32>
    %771 = arith.addf %768, %770 : vector<8x256xf32>
    %772 = vector.extract_strided_slice %771 {offsets = [0, 0], sizes = [8, 128], strides = [1, 1]} : vector<8x256xf32> to vector<8x128xf32>
    %773 = arith.negf %772 : vector<8x128xf32>
    %774 = math.exp %773 : vector<8x128xf32>
    %cst_246 = arith.constant 1.000000e+00 : f32
    %775 = vector.broadcast %cst_246 : f32 to vector<8x128xf32>
    %776 = arith.addf %775, %774 : vector<8x128xf32>
    %777 = arith.divf %775, %776 : vector<8x128xf32>
    %778 = vector.extract_strided_slice %771 {offsets = [0, 128], sizes = [8, 64], strides = [1, 1]} : vector<8x256xf32> to vector<8x64xf32>
    %779 = math.tanh %778 : vector<8x64xf32>
    %780 = vector.extract_strided_slice %771 {offsets = [0, 192], sizes = [8, 64], strides = [1, 1]} : vector<8x256xf32> to vector<8x64xf32>
    %781 = arith.negf %780 : vector<8x64xf32>
    %782 = math.exp %781 : vector<8x64xf32>
    %cst_247 = arith.constant 1.000000e+00 : f32
    %783 = vector.broadcast %cst_247 : f32 to vector<8x64xf32>
    %784 = arith.addf %783, %782 : vector<8x64xf32>
    %785 = arith.divf %783, %784 : vector<8x64xf32>
    %786 = vector.extract_strided_slice %777 {offsets = [0, 0], sizes = [8, 64], strides = [1, 1]} : vector<8x128xf32> to vector<8x64xf32>
    %787 = vector.extract_strided_slice %777 {offsets = [0, 64], sizes = [8, 64], strides = [1, 1]} : vector<8x128xf32> to vector<8x64xf32>
    %788 = arith.mulf %787, %750 : vector<8x64xf32>
    %789 = arith.mulf %786, %779 : vector<8x64xf32>
    %790 = arith.addf %788, %789 : vector<8x64xf32>
    %791 = math.tanh %790 : vector<8x64xf32>
    %792 = arith.mulf %785, %791 : vector<8x64xf32>
    %793 = vector.extract_strided_slice %792 {offsets = [0, 0], sizes = [8, 32], strides = [1, 1]} : vector<8x64xf32> to vector<8x32xf32>
    %794 = arith.truncf %793 : vector<8x32xf32> to vector<8x32xbf16>
    %795 = arith.index_cast %762 : i32 to index
    %c0_248 = arith.constant 0 : index
    %796 = vector.load %arg17[%795, %c0_248] : memref<64x64xbf16, #tpu.memory_space<vmem>>, vector<8x32xbf16>
    tpu.vector_store %arg17[%795, %c0_248], %794 {strides = array<i32>} : memref<64x64xbf16, #tpu.memory_space<vmem>>, vector<8x32xbf16>,
    %797 = vector.extract_strided_slice %792 {offsets = [0, 32], sizes = [8, 32], strides = [1, 1]} : vector<8x64xf32> to vector<8x32xf32>
    %798 = arith.truncf %797 : vector<8x32xf32> to vector<8x32xbf16>
    %799 = arith.index_cast %765 : i32 to index
    %c32_249 = arith.constant 32 : index
    %800 = vector.load %arg17[%799, %c32_249] : memref<64x64xbf16, #tpu.memory_space<vmem>>, vector<8x32xbf16>
    tpu.vector_store %arg17[%799, %c32_249], %798 {strides = array<i32>} : memref<64x64xbf16, #tpu.memory_space<vmem>>, vector<8x32xbf16>,
    %c8_i32_250 = arith.constant 8 : i32
    %c0_251 = arith.constant 0 : index
    %c0_252 = arith.constant 0 : index
    %801 = vector.load %arg11[%c0_251, %c0_252] : memref<64x192xbf16, #tpu.memory_space<vmem>>, vector<64x192xbf16>
    %c0_253 = arith.constant 0 : index
    %c0_254 = arith.constant 0 : index
    %802 = vector.load %arg13[%c0_253, %c0_254] : memref<192x128xbf16, #tpu.memory_space<vmem>>, vector<192x128xbf16>
    %c0_255 = arith.constant 0 : index
    %c0_256 = arith.constant 0 : index
    %803 = vector.load %arg12[%c0_255, %c0_256] : memref<1x192xf32, #tpu.memory_space<vmem>>, vector<1x192xf32>
    %c0_257 = arith.constant 0 : index
    %c0_258 = arith.constant 0 : index
    %804 = vector.load %arg14[%c0_257, %c0_258] : memref<1x128xf32, #tpu.memory_space<vmem>>, vector<1x128xf32>
    %c0_259 = arith.constant 0 : index
    %c0_260 = arith.constant 0 : index
    %805 = vector.load %arg17[%c0_259, %c0_260] : memref<64x64xbf16, #tpu.memory_space<vmem>>, vector<64x64xbf16>
    %cst_261 = arith.constant dense<0.000000e+00> : vector<64x192xf32>
    %806 = tpu.matmul %805, %801, %cst_261 {dimension_numbers = #tpu.dot_dimension_numbers<[1], [0], [0], [1], [0, 0, 1, 1], [], []>} : vector<64x64xbf16>, vector<64x192xbf16>, vector<64x192xf32> -> vector<64x192xf32>
    %807 = vector.broadcast %803 : vector<1x192xf32> to vector<64x192xf32>
    %808 = arith.addf %806, %807 : vector<64x192xf32>
    %cst_262 = arith.constant 0.000000e+00 : f32
    %809 = vector.broadcast %cst_262 : f32 to vector<64x192xf32>
    %810 = arith.maximumf %808, %809 : vector<64x192xf32>
    %811 = arith.truncf %810 : vector<64x192xf32> to vector<64x192xbf16>
    %cst_263 = arith.constant dense<0.000000e+00> : vector<64x128xf32>
    %812 = tpu.matmul %811, %802, %cst_263 {dimension_numbers = #tpu.dot_dimension_numbers<[1], [0], [0], [1], [0, 0, 1, 1], [], []>} : vector<64x192xbf16>, vector<192x128xbf16>, vector<64x128xf32> -> vector<64x128xf32>
    %813 = vector.broadcast %804 : vector<1x128xf32> to vector<64x128xf32>
    %814 = arith.addf %812, %813 : vector<64x128xf32>
    %cst_264 = arith.constant 0.000000e+00 : f32
    %815 = vector.broadcast %cst_264 : f32 to vector<64x128xf32>
    %816 = arith.maximumf %814, %815 : vector<64x128xf32>
    %c0_265 = arith.constant 0 : index
    %c0_266 = arith.constant 0 : index
    %817 = vector.load %arg15[%c0_265, %c0_266] : memref<64x128xf32, #tpu.memory_space<vmem>>, vector<64x128xf32>
    tpu.vector_store %arg15[%c0_265, %c0_266], %816 {strides = array<i32>} : memref<64x128xf32, #tpu.memory_space<vmem>>, vector<64x128xf32>,
    return
  }
}

</mosaic_0001>

<bundles_post_ra>
// kernel: double_lstm_forward.1
= control target key start
LH: loop header
LB: loop body
LE: loop exit
PB: predicated region body
PF: predicated region fallthrough
CT: control target
= control target key end

     0   :  { %v2881_v1 = vmov 0   ;;  %vm154_vm0 = vcmask 261120   ;;  %s2882_s24 = smov 64   ;;  %vm389_vm1 = vcmask 523264   ;;  %v51_v20 = vlaneseq  ;;  %s3621_s1 = inlined_call_operand.vmem [shape: bf16[32,256], index: 1, kind: input, shape index: {}]   ;;  %s3622_s0 = inlined_call_operand.vmem [shape: bf16[64,32], index: 0, kind: input, shape index: {}]   ;;  %s3623_s2 = inlined_call_operand.vmem [shape: bf16[64,256], index: 2, kind: input, shape index: {}]   ;;  %s3624_s5 = inlined_call_operand.vmem [shape: f32[8,64], index: 5, kind: input, shape index: {}]   ;;  %s3625_s4 = inlined_call_operand.vmem [shape: f32[8,64], index: 4, kind: input, shape index: {}]   ;;  %s3626_s3 = inlined_call_operand.vmem [shape: f32[1,256], index: 3, kind: input, shape index: {}]   ;;  %s3627_s6 = inlined_call_operand.vmem [shape: bf16[64,256], index: 6, kind: input, shape index: {}]   ;;  %s3628_s7 = inlined_call_operand.vmem [shape: bf16[64,256], index: 7, kind: input, shape index: {}]   ;;  %s3629_s9 = inlined_call_operand.vmem [shape: f32[8,64], index: 9, kind: input, shape index: {}]   ;;  %s3630_s10 = inlined_call_operand.vmem [shape: f32[8,64], index: 10, kind: input, shape index: {}]   ;;  %s3631_s8 = inlined_call_operand.vmem [shape: f32[1,256], index: 8, kind: input, shape index: {}]   ;;  %s3632_s11 = inlined_call_operand.vmem [shape: bf16[64,192], index: 11, kind: input, shape index: {}]   ;;  %s3633_s13 = inlined_call_operand.vmem [shape: bf16[192,128], index: 13, kind: input, shape index: {}]   ;;  %s3634_s12 = inlined_call_operand.vmem [shape: f32[1,192], index: 12, kind: input, shape index: {}]   ;;  %s3635_s14 = inlined_call_operand.vmem [shape: f32[1,128], index: 14, kind: input, shape index: {}]   ;;  %s3636_s15 = inlined_call_operand.vmem [shape: f32[64,128], index: 15, kind: output, shape index: {}]  }
   0x1   :  { %v2611_v0 = vld [vmem:[%s3621_s1 + $0x14] ss:$8 sps:$4 sm:$0xff]   ;;  %199 = vmatprep.mubr.bf16.mxu0 %v2881_v1  ;;  %514 = vmatprep.mubr.bf16.mxu1 %v2881_v1  ;;  %v2613_v2 = vld [vmem:[%s3621_s1 + $0x10] ss:$8 sps:$4 sm:$0xff]   ;;  %v2614_v3 = vld [vmem:[%s3621_s1 + $0x4] ss:$8 sps:$4 sm:$0xff]  }
   0x2   :  { %179 = vmatprep.subr.bf16.mxu0 %v2611_v0  ;;  %v2616_v4 = vld [vmem:[%s3621_s1] ss:$8 sps:$4 sm:$0xff]   ;;  %v2983_v6 = vld [vmem:[%s3623_s2 + $0x34] ss:$8 sps:$4 sm:$0xff]   ;;  %v2988_v7 = vld [vmem:[%s3623_s2 + $0x30] ss:$8 sps:$4 sm:$0xff]  }
   0x3   :  { %180 = vmatpush1.bf16.msra.mxu0 %v2613_v2  ;;  %v2617_v5 = vld [vmem:[%s3622_s0] sm:$0xff]   ;;  %490 = vmatprep.subr.bf16.mxu1 %v2983_v6  ;;  %v3010_v10 = vld [vmem:[%s3623_s2 + $0x14] ss:$8 sps:$4 sm:$0xff]   ;;  %v2621_v12 = vld [vmem:[%s3622_s0 + $0x8] sm:$0xff]   ;;  %v105_v21 = vshrl.u32 %v51_v20, 7  ;;  %v52_v31 = vand.u32 127, %v51_v20 }
   0x4   :  { %181 = vmatprep.subr.bf16.mxu0 %v2614_v3  ;;  %v2993_v8 = vld [vmem:[%s3623_s2 + $0x24] ss:$8 sps:$4 sm:$0xff]   ;;  %491 = vmatpush1.bf16.msra.mxu1 %v2988_v7  ;;  %v3003_v9 = vld [vmem:[%s3623_s2 + $0x20] ss:$8 sps:$4 sm:$0xff]   ;;  %v3025_v13 = vld [vmem:[%s3623_s2 + $0x10] ss:$8 sps:$4 sm:$0xff]  }
   0x5   :  { %492 = vmatprep.subr.bf16.mxu1 %v2993_v8  ;;  %v102_v11 = vld [vmem:[%s3624_s5] sm:$0xff]  ;;  %v2625_v16 = vld [vmem:[%s3622_s0 + $0x10] sm:$0xff]   ;;  %v2629_v17 = vld [vmem:[%s3622_s0 + $0x18] sm:$0xff]   ;;  %v3072_v22 = vsub.s32 0, %v105_v21  ;;  %v3077_v25 = vsub.s32 1, %v105_v21  ;;  %v53_v36 = vadd.s32 128, %v52_v31 }
   0x6   :  { %450 = vrot.lane.b32.xlu0 %v102_v11, %s2882_s24  ;;  %v3031_v14 = vld [vmem:[%s3623_s2 + $0x4] ss:$8 sps:$4 sm:$0xff]   ;;  %v3040_v15 = vld [vmem:[%s3623_s2] ss:$8 sps:$4 sm:$0xff]   ;;  %v58_v41 = vand.u32 63, %v52_v31  ;;  %vm469_vm5 = vcmask 257024  }
   0x7   :  { %182 = vmatpush1.bf16.msra.mxu0 %v2616_v4  ;;  %v101_v18 = vld [vmem:[%s3625_s4] sm:$0xff]  ;;  %v65_v42 = vand.u32 63, %v53_v36  ;;  %vm472_vm6 = vcmask 519424  }
   0x8   :  { %401 = vmatprep.subr.bf16.mxu0 %v2983_v6  ;;  %493 = vmatpush1.bf16.msra.mxu1 %v3003_v9  ;;  %v348_v19 = vpack.c.bf16 %v101_v18, %v101_v18  ;;  %v92_v23 = vld [vmem:[%s3626_s3] sm:$0x3]  ;;  %vm78_vm2 = vcmp.lt.s32.totalorder %v58_v41, 32 }
   0x9   :  { %494 = vmatprep.subr.bf16.mxu1 %v3010_v10  ;;  %v107_v27 = vrot.slane %v92_v23, %v3072_v22  ;;  %v111_v29 = vrot.slane %v92_v23, %v3077_v25  ;;  %vm79_vm3 = vcmp.lt.s32.totalorder %v65_v42, 32 }
   0xa   :  { %2428 = vmatmul.mubr.msk.bf16.vlgmr.msra.gmra.mxu0 %vm154_vm0, %v2617_v5  ;;  %vm3081_vm4 = vmpackc.low %vm79_vm3, %vm78_vm2 }
   0xb   :  { %402 = vmatpush1.bf16.msra.mxu0 %v2988_v7  ;;  %209 = vmatprep.mubr.bf16.mxu0 %v2881_v1 }
   0xc   :  { %403 = vmatprep.subr.bf16.mxu0 %v2993_v8  ;;  %495 = vmatpush1.bf16.msra.mxu1 %v3025_v13 }
   0xd   :  { %496 = vmatprep.subr.bf16.mxu1 %v3031_v14 }
   0xf   :  { %404 = vmatpush1.bf16.msra.mxu0 %v3003_v9 }
  0x10   :  { %405 = vmatprep.subr.bf16.mxu0 %v3010_v10  ;;  %497 = vmatpush1.bf16.msra.mxu1 %v3040_v15 }
  0x11   :  { %658 = vmatprep.subr.bf16.mxu1 %v2983_v6 }
  0x12   :  { %2429 = vmatmul.mubr.msk.bf16.gmra.mxu0 %vm154_vm0, %v2621_v12 }
  0x13   :  { %219 = vmatprep.mubr.bf16.mxu0 %v2881_v1  ;;  %406 = vmatpush1.bf16.msra.mxu0 %v3025_v13 }
  0x14   :  { %407 = vmatprep.subr.bf16.mxu0 %v3031_v14 }
  0x17   :  { %408 = vmatpush1.bf16.msra.mxu0 %v3040_v15 }
  0x18   :  { %574 = vmatprep.subr.bf16.mxu0 %v2983_v6 }
  0x1a   :  { %2430 = vmatmul.mubr.msk.bf16.gmra.mxu0 %vm154_vm0, %v2625_v16 }
  0x1b   :  { %229 = vmatprep.mubr.bf16.mxu0 %v2881_v1 }
  0x22   :  { %2431 = vmatmul.mubr.msk.bf16.gmra.mxu0 %vm154_vm0, %v2629_v17 }
  0x23   :  { %425 = vmatprep.mubr.bf16.mxu0 %v2881_v1 }
  0x2a   :  { %2448 = vmatmul.mubr.msk.bf16.vlgmr.msra.gmra.mxu0 %vm389_vm1, %v348_v19 }
  0x2b   :  { %575 = vmatpush1.bf16.msra.mxu0 %v2988_v7  ;;  %598 = vmatprep.mubr.bf16.mxu0 %v2881_v1 }
  0x2c   :  { %576 = vmatprep.subr.bf16.mxu0 %v2993_v8 }
  0x2f   :  { %577 = vmatpush1.bf16.msra.mxu0 %v3003_v9 }
  0x30   :  { %578 = vmatprep.subr.bf16.mxu0 %v3010_v10 }
  0x33   :  { %579 = vmatpush1.bf16.msra.mxu0 %v3025_v13 }
  0x34   :  { %580 = vmatprep.subr.bf16.mxu0 %v3031_v14 }
  0x37   :  { %581 = vmatpush1.bf16.msra.mxu0 %v3040_v15 }
  0x38   :  { %742 = vmatprep.subr.bf16.mxu0 %v2983_v6 }
  0xca   :  { %v201_v24 = vpop.f32.mrf.mxu0 }
  0xcb   :  { %v202_v12 = vadd.f32 %v201_v24, %v107_v27 }
  0xcc   :  { %v203_v26 = vpop.f32.mrf.mxu0 }
  0xcd   :  { %v204_v5 = vadd.f32 %v203_v26, %v111_v29 }
  0xce   :  { %v205_v28 = vpop.f32.mrf.mxu0 }
  0xcf   :  { %v206_v30 = vadd.f32 %v205_v28, %v107_v27  ;;  %v2577_v23 = vpack.c.bf16 %v204_v5, %v202_v12 }
  0xd0   :  { %v207_v32 = vpop.f32.mrf.mxu0 }
  0xd1   :  { %v208_v33 = vadd.f32 %v207_v32, %v111_v29 }
  0xd2   :  { %v211_v34 = vpop.f32.mrf.mxu0 }
  0xd3   :  { %v2578_v35 = vpack.c.bf16 %v208_v33, %v206_v30  ;;  %v212_v37 = vadd.f32 %v211_v34, %v107_v27 }
  0xd4   :  { %v213_v38 = vpop.f32.mrf.mxu0 }
  0xd5   :  { %v214_v39 = vadd.f32 %v213_v38, %v111_v29 }
  0xd6   :  { %v215_v40 = vpop.f32.mrf.mxu0 }
  0xd7   :  { %v2579_v43 = vpack.c.bf16 %v214_v39, %v212_v37  ;;  %v216_v44 = vadd.f32 %v215_v40, %v107_v27 }
  0xd8   :  { %v217_v45 = vpop.f32.mrf.mxu0 }
  0xd9   :  { %v218_v46 = vadd.f32 %v217_v45, %v111_v29 }
  0xda   :  { %v221_v47 = vpop.f32.mrf.mxu0 }
  0xdb   :  { %v2580_v48 = vpack.c.bf16 %v218_v46, %v216_v44  ;;  %v222_v49 = vadd.f32 %v221_v47, %v107_v27 }
  0xdc   :  { %v223_v50 = vpop.f32.mrf.mxu0 }
  0xdd   :  { %v224_v51 = vadd.f32 %v223_v50, %v111_v29 }
  0xde   :  { %v225_v53 = vpop.f32.mrf.mxu0 }
  0xdf   :  { %v2581_v54 = vpack.c.bf16 %v224_v51, %v222_v49  ;;  %v226_v55 = vadd.f32 %v225_v53, %v107_v27 }
  0xe0   :  { %v227_v56 = vpop.f32.mrf.mxu0 }
  0xe1   :  { %v228_v57 = vadd.f32 %v227_v56, %v111_v29  ;;  %v3087_v58 = vsel %vm3081_vm4, %v2580_v48, %v2581_v54  ;;  %v3091_v59 = vsel %vm3081_vm4, %v2581_v54, %v2580_v48 }
  0xe2   :  { %v231_v60 = vpop.f32.mrf.mxu0 }
  0xe3   :  { %v2582_v61 = vpack.c.bf16 %v228_v57, %v226_v55  ;;  %v232_v62 = vadd.f32 %v231_v60, %v107_v27 }
  0xe4   :  { %v233_v63 = vpop.f32.mrf.mxu0 }
  0xe5   :  { %v234_v0 = vadd.f32 %v233_v63, %v111_v29  ;;  %v3095_v2 = vsel %vm3081_vm4, %v2579_v43, %v2582_v61  ;;  %v3099_v3 = vsel %vm3081_vm4, %v2582_v61, %v2579_v43  ;;  %v451_v43 = vpop.permute.xlu0 %450 }
  0xe6   :  { %v235_v4 = vpop.f32.mrf.mxu0 }
  0xe7   :  { %v2583_v11 = vpack.c.bf16 %v234_v0, %v232_v62  ;;  %v236_v17 = vadd.f32 %v235_v4, %v107_v27 }
  0xe8   :  { %v237_v16 = vpop.f32.mrf.mxu0 }
  0xe9   :  { %v238_v18 = vadd.f32 %v237_v16, %v111_v29  ;;  %v317_v19 = vsel %vm3081_vm4, %v2578_v35, %v2583_v11  ;;  %v3105_v20 = vsel %vm3081_vm4, %v2583_v11, %v2578_v35 }
  0xea   :  { %v427_v21 = vpop.f32.mrf.mxu0  ;;  %v475_v54 = vunpack.c.l.bf16 %v317_v19  ;;  %v476_v63 = vunpack.c.h.bf16 %v317_v19 }
  0xeb   :  { %v2584_v28 = vpack.c.bf16 %v238_v18, %v236_v17 }
  0xec   :  { %v429_v30 = vpop.f32.mrf.mxu0 }
  0xed   :  { %v305_v31 = vsel %vm3081_vm4, %v2577_v23, %v2584_v28  ;;  %v3111_v24 = vsel %vm3081_vm4, %v2584_v28, %v2577_v23 }
  0xee   :  { %v346_v26 = vunpack.c.l.bf16 %v305_v31  ;;  %v431_v27 = vpop.f32.mrf.mxu0  ;;  %v347_v34 = vunpack.c.h.bf16 %v305_v31 }
  0xf0   :  { %v434_v29 = vadd.f32 %v427_v21, %v346_v26  ;;  %v432_v32 = vpop.f32.mrf.mxu0  ;;  %v435_v35 = vadd.f32 %v429_v30, %v347_v34 }
  0xf1   :  { %v559_v32 = vunpack.c.l.bf16 %v3095_v2 }
  0xf2   :  { %v2449_v33 = vmul.f32 -1.442695, %v434_v29  ;;  %v2450_v41 = vmul.f32 -1.442695, %v435_v35 }
  0xf4   :  { %2689 = vpow2.f32 %v2449_v33 }
  0xf5   :  { %2691 = vtanh.f32 %v435_v35 }
 0x101   :  { %v2690_v36 = vpop.eup %2689 }
 0x102   :  { %v439_v37 = vadd.f32 1.0, %v2690_v36  ;;  %v2692_v38 = vpop.eup %2691 }
 0x104   :  { %2693 = vrcp.f32 %v439_v37 }
 0x105   :  { %2695 = vpow2.f32 %v2450_v41 }
 0x111   :  { %v2694_v39 = vpop.eup %2693 }
 0x112   :  { %v454_v40 = vmul.f32 %v2694_v39, %v2692_v38  ;;  %v2696_v42 = vpop.eup %2695  ;;  %v453_v45 = vmul.f32 %v2694_v39, %v451_v43  ;;  %v560_v39 = vunpack.c.h.bf16 %v3095_v2 }
 0x113   :  { %v446_v44 = vadd.f32 1.0, %v2696_v42 }
 0x114   :  { %456 = vrot.lane.b32.xlu0 %v454_v40, %s2882_s24 }
 0x115   :  { %2697 = vrcp.f32 %v446_v44 }
 0x122   :  { %v2698_v48 = vpop.eup %2697 }
 0x186   :  { %v457_v46 = vpop.permute.xlu0 %456 }
 0x187   :  { %v459_v47 = vadd.f32 %v457_v46, %v453_v45 }
 0x189   :  { %2699 = vtanh.f32 %v459_v47 }
 0x196   :  { %v2700_v49 = vpop.eup %2699 }
 0x197   :  { %v461_v50 = vmul.f32 %v2700_v49, %v2698_v48 }
 0x199   :  { %v3114_v51 = vpack.c.bf16 %v461_v50, %v461_v50 }
 0x19b   :  { %477 = vrot.lane.b32.xlu1 %v3114_v51, %s2882_s24 }
 0x20d   :  { %v478_v53 = vpop.permute.xlu1 %477 }
 0x20e   :  { %2452 = vmatmul.mubr.msk.bf16.vlgmr.msra.gmra.mxu1 %vm389_vm1, %v478_v53 }
 0x20f   :  { %659 = vmatpush1.bf16.msra.mxu1 %v2988_v7  ;;  %682 = vmatprep.mubr.bf16.mxu1 %v2881_v1 }
 0x210   :  { %660 = vmatprep.subr.bf16.mxu1 %v2993_v8 }
 0x213   :  { %661 = vmatpush1.bf16.msra.mxu1 %v3003_v9 }
 0x214   :  { %662 = vmatprep.subr.bf16.mxu1 %v3010_v10 }
 0x217   :  { %663 = vmatpush1.bf16.msra.mxu1 %v3025_v13 }
 0x218   :  { %664 = vmatprep.subr.bf16.mxu1 %v3031_v14 }
 0x21b   :  { %665 = vmatpush1.bf16.msra.mxu1 %v3040_v15 }
 0x21c   :  { %824 = vmatprep.subr.bf16.mxu1 %v2983_v6 }
 0x2ce   :  { %v516_v55 = vpop.f32.mrf.mxu1 }
 0x2cf   :  { %v523_v56 = vadd.f32 %v516_v55, %v475_v54 }
 0x2d0   :  { %v518_v57 = vpop.f32.mrf.mxu1 }
 0x2d1   :  { %v2453_v60 = vmul.f32 -1.442695, %v523_v56  ;;  %v524_v0 = vadd.f32 %v518_v57, %v476_v63 }
 0x2d2   :  { %v520_v61 = vpop.f32.mrf.mxu1 }
 0x2d3   :  { %2701 = vpow2.f32 %v2453_v60  ;;  %v2454_v17 = vmul.f32 -1.442695, %v524_v0  ;;  %v643_v60 = vunpack.c.l.bf16 %v3087_v58 }
 0x2d4   :  { %v521_v62 = vpop.f32.mrf.mxu1  ;;  %2703 = vtanh.f32 %v524_v0 }
 0x2e0   :  { %v2702_v4 = vpop.eup %2701 }
 0x2e1   :  { %v528_v5 = vadd.f32 1.0, %v2702_v4  ;;  %v2704_v11 = vpop.eup %2703 }
 0x2e3   :  { %2705 = vrcp.f32 %v528_v5 }
 0x2e4   :  { %2707 = vpow2.f32 %v2454_v17 }
 0x2f0   :  { %v2706_v12 = vpop.eup %2705 }
 0x2f1   :  { %v539_v16 = vmul.f32 %v2706_v12, %v2704_v11  ;;  %v2708_v18 = vpop.eup %2707  ;;  %v538_v23 = vmul.f32 %v2706_v12, %v459_v47  ;;  %v644_v11 = vunpack.c.h.bf16 %v3087_v58 }
 0x2f2   :  { %v535_v21 = vadd.f32 1.0, %v2708_v18 }
 0x2f3   :  { %541 = vrot.lane.b32.xlu1 %v539_v16, %s2882_s24 }
 0x2f4   :  { %2709 = vrcp.f32 %v535_v21 }
 0x301   :  { %v2710_v19 = vpop.eup %2709 }
 0x365   :  { %v542_v28 = vpop.permute.xlu1 %541 }
 0x366   :  { %v544_v30 = vadd.f32 %v542_v28, %v538_v23 }
 0x368   :  { %2711 = vtanh.f32 %v544_v30 }
 0x375   :  { %v2712_v31 = vpop.eup %2711 }
 0x376   :  { %v546_v26 = vmul.f32 %v2712_v31, %v2710_v19 }
 0x378   :  { %v3129_v27 = vpack.c.bf16 %v546_v26, %v546_v26 }
 0x37a   :  { %561 = vrot.lane.b32.xlu0 %v3129_v27, %s2882_s24 }
 0x3ec   :  { %v562_v29 = vpop.permute.xlu0 %561 }
 0x3ed   :  { %2456 = vmatmul.mubr.msk.bf16.vlgmr.msra.gmra.mxu0 %vm389_vm1, %v562_v29 }
 0x3ee   :  { %743 = vmatpush1.bf16.msra.mxu0 %v2988_v7  ;;  %766 = vmatprep.mubr.bf16.mxu0 %v2881_v1 }
 0x3ef   :  { %744 = vmatprep.subr.bf16.mxu0 %v2993_v8 }
 0x3f2   :  { %745 = vmatpush1.bf16.msra.mxu0 %v3003_v9 }
 0x3f3   :  { %746 = vmatprep.subr.bf16.mxu0 %v3010_v10 }
 0x3f6   :  { %747 = vmatpush1.bf16.msra.mxu0 %v3025_v13 }
 0x3f7   :  { %748 = vmatprep.subr.bf16.mxu0 %v3031_v14 }
 0x3fa   :  { %749 = vmatpush1.bf16.msra.mxu0 %v3040_v15 }
 0x3fb   :  { %906 = vmatprep.subr.bf16.mxu0 %v2983_v6 }
 0x4ad   :  { %v600_v33 = vpop.f32.mrf.mxu0 }
 0x4ae   :  { %v607_v34 = vadd.f32 %v600_v33, %v559_v32 }
 0x4af   :  { %v602_v35 = vpop.f32.mrf.mxu0 }
 0x4b0   :  { %v2457_v36 = vmul.f32 -1.442695, %v607_v34  ;;  %v608_v40 = vadd.f32 %v602_v35, %v560_v39  ;;  %v727_v35 = vunpack.c.l.bf16 %v3091_v59 }
 0x4b1   :  { %v604_v37 = vpop.f32.mrf.mxu0 }
 0x4b2   :  { %2713 = vpow2.f32 %v2457_v36  ;;  %v2458_v46 = vmul.f32 -1.442695, %v608_v40 }
 0x4b3   :  { %v605_v38 = vpop.f32.mrf.mxu0  ;;  %2715 = vtanh.f32 %v608_v40 }
 0x4bf   :  { %v2714_v41 = vpop.eup %2713 }
 0x4c0   :  { %v612_v42 = vadd.f32 1.0, %v2714_v41  ;;  %v2716_v43 = vpop.eup %2715 }
 0x4c2   :  { %2717 = vrcp.f32 %v612_v42  ;;  %v728_v42 = vunpack.c.h.bf16 %v3091_v59 }
 0x4c3   :  { %2719 = vpow2.f32 %v2458_v46 }
 0x4cf   :  { %v2718_v44 = vpop.eup %2717 }
 0x4d0   :  { %v623_v45 = vmul.f32 %v2718_v44, %v2716_v43  ;;  %v2720_v47 = vpop.eup %2719  ;;  %v622_v49 = vmul.f32 %v2718_v44, %v544_v30 }
 0x4d1   :  { %v619_v48 = vadd.f32 1.0, %v2720_v47 }
 0x4d2   :  { %625 = vrot.lane.b32.xlu1 %v623_v45, %s2882_s24 }
 0x4d3   :  { %2721 = vrcp.f32 %v619_v48 }
 0x4e0   :  { %v2722_v2 = vpop.eup %2721 }
 0x544   :  { %v626_v50 = vpop.permute.xlu1 %625 }
 0x545   :  { %v628_v53 = vadd.f32 %v626_v50, %v622_v49 }
 0x547   :  { %2723 = vtanh.f32 %v628_v53 }
 0x554   :  { %v2724_v54 = vpop.eup %2723 }
 0x555   :  { %v630_v55 = vmul.f32 %v2724_v54, %v2722_v2 }
 0x557   :  { %v3146_v56 = vpack.c.bf16 %v630_v55, %v630_v55 }
 0x559   :  { %645 = vrot.lane.b32.xlu0 %v3146_v56, %s2882_s24 }
 0x5cb   :  { %v646_v57 = vpop.permute.xlu0 %645 }
 0x5cc   :  { %2460 = vmatmul.mubr.msk.bf16.vlgmr.msra.gmra.mxu1 %vm389_vm1, %v646_v57 }
 0x5cd   :  { %825 = vmatpush1.bf16.msra.mxu1 %v2988_v7  ;;  %848 = vmatprep.mubr.bf16.mxu1 %v2881_v1 }
 0x5ce   :  { %826 = vmatprep.subr.bf16.mxu1 %v2993_v8 }
 0x5d1   :  { %827 = vmatpush1.bf16.msra.mxu1 %v3003_v9 }
 0x5d2   :  { %828 = vmatprep.subr.bf16.mxu1 %v3010_v10 }
 0x5d5   :  { %829 = vmatpush1.bf16.msra.mxu1 %v3025_v13 }
 0x5d6   :  { %830 = vmatprep.subr.bf16.mxu1 %v3031_v14 }
 0x5d9   :  { %831 = vmatpush1.bf16.msra.mxu1 %v3040_v15 }
 0x5da   :  { %988 = vmatprep.subr.bf16.mxu1 %v2983_v6 }
 0x68c   :  { %v684_v61 = vpop.f32.mrf.mxu1 }
 0x68d   :  { %v691_v62 = vadd.f32 %v684_v61, %v643_v60 }
 0x68e   :  { %v686_v63 = vpop.f32.mrf.mxu1 }
 0x68f   :  { %v2461_v0 = vmul.f32 -1.442695, %v691_v62  ;;  %v692_v12 = vadd.f32 %v686_v63, %v644_v11  ;;  %v809_v63 = vunpack.c.l.bf16 %v3099_v3 }
 0x690   :  { %v688_v4 = vpop.f32.mrf.mxu1 }
 0x691   :  { %2725 = vpow2.f32 %v2461_v0  ;;  %v2462_v6 = vmul.f32 -1.442695, %v692_v12 }
 0x692   :  { %v689_v5 = vpop.f32.mrf.mxu1  ;;  %2727 = vtanh.f32 %v692_v12 }
 0x69e   :  { %v2726_v16 = vpop.eup %2725 }
 0x69f   :  { %v696_v17 = vadd.f32 1.0, %v2726_v16  ;;  %v2728_v18 = vpop.eup %2727 }
 0x6a1   :  { %2729 = vrcp.f32 %v696_v17 }
 0x6a2   :  { %2731 = vpow2.f32 %v2462_v6 }
 0x6ae   :  { %v2730_v21 = vpop.eup %2729 }
 0x6af   :  { %v707_v23 = vmul.f32 %v2730_v21, %v2728_v18  ;;  %v2732_v28 = vpop.eup %2731  ;;  %v706_v19 = vmul.f32 %v2730_v21, %v628_v53 }
 0x6b0   :  { %v703_v30 = vadd.f32 1.0, %v2732_v28 }
 0x6b1   :  { %709 = vrot.lane.b32.xlu1 %v707_v23, %s2882_s24 }
 0x6b2   :  { %2733 = vrcp.f32 %v703_v30 }
 0x6bf   :  { %v2734_v58 = vpop.eup %2733 }
 0x723   :  { %v710_v31 = vpop.permute.xlu1 %709 }
 0x724   :  { %v712_v26 = vadd.f32 %v710_v31, %v706_v19 }
 0x726   :  { %2735 = vtanh.f32 %v712_v26 }
 0x733   :  { %v2736_v29 = vpop.eup %2735 }
 0x734   :  { %v714_v32 = vmul.f32 %v2736_v29, %v2734_v58  ;;  %v891_v58 = vunpack.c.l.bf16 %v3105_v20 }
 0x736   :  { %v3163_v33 = vpack.c.bf16 %v714_v32, %v714_v32 }
 0x738   :  { %729 = vrot.lane.b32.xlu0 %v3163_v33, %s2882_s24 }
 0x7aa   :  { %v730_v34 = vpop.permute.xlu0 %729 }
 0x7ab   :  { %2464 = vmatmul.mubr.msk.bf16.vlgmr.msra.gmra.mxu0 %vm389_vm1, %v730_v34 }
 0x7ac   :  { %907 = vmatpush1.bf16.msra.mxu0 %v2988_v7  ;;  %930 = vmatprep.mubr.bf16.mxu0 %v2881_v1 }
 0x7ad   :  { %908 = vmatprep.subr.bf16.mxu0 %v2993_v8 }
 0x7b0   :  { %909 = vmatpush1.bf16.msra.mxu0 %v3003_v9 }
 0x7b1   :  { %910 = vmatprep.subr.bf16.mxu0 %v3010_v10 }
 0x7b4   :  { %911 = vmatpush1.bf16.msra.mxu0 %v3025_v13 }
 0x7b5   :  { %912 = vmatprep.subr.bf16.mxu0 %v3031_v14 }
 0x7b8   :  { %913 = vmatpush1.bf16.msra.mxu0 %v3040_v15 }
 0x86b   :  { %v768_v36 = vpop.f32.mrf.mxu0 }
 0x86c   :  { %v775_v37 = vadd.f32 %v768_v36, %v727_v35 }
 0x86d   :  { %v770_v38 = vpop.f32.mrf.mxu0 }
 0x86e   :  { %v2465_v39 = vmul.f32 -1.442695, %v775_v37  ;;  %v776_v43 = vadd.f32 %v770_v38, %v728_v42  ;;  %v892_v38 = vunpack.c.h.bf16 %v3105_v20 }
 0x86f   :  { %v772_v40 = vpop.f32.mrf.mxu0 }
 0x870   :  { %2737 = vpow2.f32 %v2465_v39  ;;  %v2466_v49 = vmul.f32 -1.442695, %v776_v43 }
 0x871   :  { %v773_v41 = vpop.f32.mrf.mxu0  ;;  %2739 = vtanh.f32 %v776_v43 }
 0x87d   :  { %v2738_v44 = vpop.eup %2737 }
 0x87e   :  { %v780_v45 = vadd.f32 1.0, %v2738_v44  ;;  %v2740_v46 = vpop.eup %2739 }
 0x880   :  { %2741 = vrcp.f32 %v780_v45 }
 0x881   :  { %2743 = vpow2.f32 %v2466_v49 }
 0x88d   :  { %v2742_v47 = vpop.eup %2741 }
 0x88e   :  { %v791_v48 = vmul.f32 %v2742_v47, %v2740_v46  ;;  %v2744_v50 = vpop.eup %2743  ;;  %v790_v2 = vmul.f32 %v2742_v47, %v712_v26 }
 0x88f   :  { %v787_v53 = vadd.f32 1.0, %v2744_v50 }
 0x890   :  { %793 = vrot.lane.b32.xlu1 %v791_v48, %s2882_s24 }
 0x891   :  { %2745 = vrcp.f32 %v787_v53 }
 0x89e   :  { %v2746_v59 = vpop.eup %2745 }
 0x902   :  { %v794_v54 = vpop.permute.xlu1 %793 }
 0x903   :  { %v796_v55 = vadd.f32 %v794_v54, %v790_v2 }
 0x905   :  { %2747 = vtanh.f32 %v796_v55 }
 0x912   :  { %v2748_v57 = vpop.eup %2747 }
 0x913   :  { %v798_v60 = vmul.f32 %v2748_v57, %v2746_v59 }
 0x915   :  { %v3179_v61 = vpack.c.bf16 %v798_v60, %v798_v60 }
 0x917   :  { %811 = vrot.lane.b32.xlu0 %v3179_v61, %s2882_s24 }
 0x989   :  { %v812_v62 = vpop.permute.xlu0 %811 }
 0x98a   :  { %2468 = vmatmul.mubr.msk.bf16.vlgmr.msra.gmra.mxu1 %vm389_vm1, %v812_v62 }
 0x98b   :  { %989 = vmatpush1.bf16.msra.mxu1 %v2988_v7  ;;  %1012 = vmatprep.mubr.bf16.mxu1 %v2881_v1 }
 0x98c   :  { %990 = vmatprep.subr.bf16.mxu1 %v2993_v8  ;;  %v810_v8 = vunpack.c.h.bf16 %v3099_v3 }
 0x98f   :  { %991 = vmatpush1.bf16.msra.mxu1 %v3003_v9 }
 0x990   :  { %992 = vmatprep.subr.bf16.mxu1 %v3010_v10 }
 0x993   :  { %993 = vmatpush1.bf16.msra.mxu1 %v3025_v13 }
 0x994   :  { %994 = vmatprep.subr.bf16.mxu1 %v3031_v14 }
 0x997   :  { %995 = vmatpush1.bf16.msra.mxu1 %v3040_v15 }
 0xa4a   :  { %v850_v0 = vpop.f32.mrf.mxu1 }
 0xa4b   :  { %v857_v4 = vadd.f32 %v850_v0, %v809_v63 }
 0xa4c   :  { %v852_v5 = vpop.f32.mrf.mxu1 }
 0xa4d   :  { %v2469_v7 = vmul.f32 -1.442695, %v857_v4  ;;  %v858_v9 = vadd.f32 %v852_v5, %v810_v8  ;;  %v974_v5 = vunpack.c.h.bf16 %v3111_v24 }
 0xa4e   :  { %v854_v11 = vpop.f32.mrf.mxu1 }
 0xa4f   :  { %2749 = vpow2.f32 %v2469_v7  ;;  %v2470_v15 = vmul.f32 -1.442695, %v858_v9 }
 0xa50   :  { %v855_v12 = vpop.f32.mrf.mxu1  ;;  %2751 = vtanh.f32 %v858_v9 }
 0xa5c   :  { %v2750_v16 = vpop.eup %2749 }
 0xa5d   :  { %v862_v10 = vadd.f32 1.0, %v2750_v16  ;;  %v2752_v13 = vpop.eup %2751 }
 0xa5f   :  { %2753 = vrcp.f32 %v862_v10  ;;  %v2633_v10 = vld [vmem:[%s3627_s6 + $0x30] ss:$8 sps:$4 sm:$0xff]  }
 0xa60   :  { %2755 = vpow2.f32 %v2470_v15 }
 0xa6c   :  { %v2754_v14 = vpop.eup %2753 }
 0xa6d   :  { %v873_v17 = vmul.f32 %v2754_v14, %v2752_v13  ;;  %v2756_v18 = vpop.eup %2755  ;;  %v872_v23 = vmul.f32 %v2754_v14, %v796_v55  ;;  %v2638_v13 = vld [vmem:[%s3627_s6 + $0x24] ss:$8 sps:$4 sm:$0xff]   ;;  %v2636_v14 = vld [vmem:[%s3627_s6 + $0x20] ss:$8 sps:$4 sm:$0xff]  }
 0xa6e   :  { %v869_v21 = vadd.f32 1.0, %v2756_v18 }
 0xa6f   :  { %875 = vrot.lane.b32.xlu1 %v873_v17, %s2882_s24 }
 0xa70   :  { %2757 = vrcp.f32 %v869_v21 }
 0xa7d   :  { %v2758_v3 = vpop.eup %2757 }
 0xae1   :  { %v876_v6 = vpop.permute.xlu1 %875 }
 0xae2   :  { %v878_v28 = vadd.f32 %v876_v6, %v872_v23 }
 0xae4   :  { %2759 = vtanh.f32 %v878_v28 }
 0xaf1   :  { %v2760_v30 = vpop.eup %2759 }
 0xaf2   :  { %v880_v19 = vmul.f32 %v2760_v30, %v2758_v3  ;;  %v2641_v3 = vld [vmem:[%s3627_s6 + $0x14] ss:$8 sps:$4 sm:$0xff]   ;;  %v2644_v30 = vld [vmem:[%s3627_s6 + $0x4] ss:$8 sps:$4 sm:$0xff]  }
 0xaf4   :  { %v3195_v31 = vpack.c.bf16 %v880_v19, %v880_v19  ;;  %v2642_v19 = vld [vmem:[%s3627_s6] ss:$8 sps:$4 sm:$0xff]  }
 0xaf6   :  { %893 = vrot.lane.b32.xlu0 %v3195_v31, %s2882_s24 }
 0xb68   :  { %v894_v26 = vpop.permute.xlu0 %893 }
 0xb69   :  { %2472 = vmatmul.mubr.msk.bf16.vlgmr.msra.gmra.mxu0 %vm389_vm1, %v894_v26 }
 0xb6a   :  { %1196 = vmatprep.mubr.bf16.mxu0 %v2881_v1 }
 0xc29   :  { %v932_v29 = vpop.f32.mrf.mxu0 }
 0xc2a   :  { %v939_v32 = vadd.f32 %v932_v29, %v891_v58 }
 0xc2b   :  { %v934_v34 = vpop.f32.mrf.mxu0 }
 0xc2c   :  { %v2473_v35 = vmul.f32 -1.442695, %v939_v32  ;;  %v940_v39 = vadd.f32 %v934_v34, %v892_v38  ;;  %v3257_v34 = vld [vmem:[%s3628_s7 + $0x34] ss:$8 sps:$4 sm:$0xff]   ;;  %v3295_v38 = vld [vmem:[%s3628_s7 + $0x4] ss:$8 sps:$4 sm:$0xff]  }
 0xc2d   :  { %v936_v36 = vpop.f32.mrf.mxu0  ;;  %1372 = vmatprep.subr.bf16.mxu1 %v3257_v34 }
 0xc2e   :  { %2761 = vpow2.f32 %v2473_v35  ;;  %v2474_v45 = vmul.f32 -1.442695, %v940_v39  ;;  %v3266_v35 = vld [vmem:[%s3628_s7 + $0x30] ss:$8 sps:$4 sm:$0xff]   ;;  %v3283_v36 = vld [vmem:[%s3628_s7 + $0x14] ss:$8 sps:$4 sm:$0xff]  }
 0xc2f   :  { %v937_v37 = vpop.f32.mrf.mxu0  ;;  %2763 = vtanh.f32 %v940_v39  ;;  %v3301_v39 = vld [vmem:[%s3628_s7] ss:$8 sps:$4 sm:$0xff]  }
 0xc30   :  { %v3290_v37 = vld [vmem:[%s3628_s7 + $0x10] ss:$8 sps:$4 sm:$0xff]  }
 0xc3b   :  { %v2762_v40 = vpop.eup %2761 }
 0xc3c   :  { %v944_v41 = vadd.f32 1.0, %v2762_v40  ;;  %v2764_v42 = vpop.eup %2763  ;;  %v1079_v40 = vld [vmem:[%s3629_s9] sm:$0xff] }
 0xc3e   :  { %2765 = vrcp.f32 %v944_v41  ;;  %v1080_v41 = vld [vmem:[%s3630_s10] sm:$0xff] }
 0xc3f   :  { %2767 = vpow2.f32 %v2474_v45 }
 0xc4b   :  { %v2766_v43 = vpop.eup %2765 }
 0xc4c   :  { %v955_v44 = vmul.f32 %v2766_v43, %v2764_v42  ;;  %v2768_v46 = vpop.eup %2767  ;;  %v954_v48 = vmul.f32 %v2766_v43, %v878_v28  ;;  %v2639_v28 = vld [vmem:[%s3627_s6 + $0x10] ss:$8 sps:$4 sm:$0xff]   ;;  %v1320_v42 = vpack.c.bf16 %v1079_v40, %v1079_v40 }
 0xc4d   :  { %v951_v47 = vadd.f32 1.0, %v2768_v46 }
 0xc4e   :  { %957 = vrot.lane.b32.xlu1 %v955_v44, %s2882_s24 }
 0xc4f   :  { %2769 = vrcp.f32 %v951_v47 }
 0xc5c   :  { %v2770_v20 = vpop.eup %2769 }
 0xcc0   :  { %v958_v49 = vpop.permute.xlu1 %957 }
 0xcc1   :  { %v960_v50 = vadd.f32 %v958_v49, %v954_v48 }
 0xcc3   :  { %2771 = vtanh.f32 %v960_v50 }
 0xcd0   :  { %v2772_v53 = vpop.eup %2771 }
 0xcd1   :  { %v962_v2 = vmul.f32 %v2772_v53, %v2770_v20 }
 0xcd3   :  { %v963_v54 = vpack.c.bf16 %v962_v2, %v962_v2 }
 0xcd5   :  { %975 = vrot.lane.b32.xlu0 %v963_v54, %s2882_s24 }
 0xcd9   :  { %466 = vrot.lane.b32.xlu0 %v3114_v51, %s2882_s24 }
 0xcdd   :  { %967 = vrot.lane.b32.xlu0 %v963_v54, %s2882_s24 }
 0xce1   :  { %635 = vrot.lane.b32.xlu0 %v3146_v56, %s2882_s24  ;;  %v973_v56 = vunpack.c.l.bf16 %v3111_v24  ;;  %v2635_v24 = vld [vmem:[%s3627_s6 + $0x34] ss:$8 sps:$4 sm:$0xff]  }
 0xce2   :  { %1172 = vmatprep.subr.bf16.mxu0 %v2635_v24 }
 0xce3   :  { %1173 = vmatpush1.bf16.msra.mxu0 %v2633_v10 }
 0xce4   :  { %1174 = vmatprep.subr.bf16.mxu0 %v2638_v13 }
 0xce5   :  { %803 = vrot.lane.b32.xlu0 %v3179_v61, %s2882_s24 }
 0xce7   :  { %1175 = vmatpush1.bf16.msra.mxu0 %v2636_v14 }
 0xce8   :  { %1176 = vmatprep.subr.bf16.mxu0 %v2641_v3 }
 0xce9   :  { %1421 = vrot.lane.b32.xlu0 %v1080_v41, %s2882_s24 }
 0xceb   :  { %1177 = vmatpush1.bf16.msra.mxu0 %v2639_v28 }
 0xcec   :  { %1178 = vmatprep.subr.bf16.mxu0 %v2644_v30 }
 0xcef   :  { %1179 = vmatpush1.bf16.msra.mxu0 %v2642_v19 }
 0xcf0   :  { %1540 = vmatprep.subr.bf16.mxu0 %v3257_v34 }
 0xd47   :  { %v976_v55 = vpop.permute.xlu0 %975 }
 0xd48   :  { %2476 = vmatmul.mubr.msk.bf16.vlgmr.msra.gmra.mxu1 %vm389_vm1, %v976_v55  ;;  %v1070_v55 = vld [vmem:[%s3631_s8] sm:$0x3] }
 0xd49   :  { %1396 = vmatprep.mubr.bf16.mxu1 %v2881_v1  ;;  %1373 = vmatpush1.bf16.msra.mxu1 %v3266_v35 }
 0xd4b   :  { %v467_v59 = vpop.permute.xlu0 %466 }
 0xd4c   :  { %470 = vst.msk [vmem:[#allocation3] sm:$0xf] %vm469_vm5, %v467_v59 }
 0xd4d   :  { %473 = vst.msk [vmem:[#allocation3 + $0x1c] sm:$0xf] %vm472_vm6, %v467_v59 }
 0xd4f   :  { %v968_v51 = vpop.permute.xlu0 %967 }
 0xd53   :  { %v636_v57 = vpop.permute.xlu0 %635 }
 0xd54   :  { %639 = vst.msk [vmem:[#allocation3 + $0x8] sm:$0xf] %vm469_vm5, %v636_v57 }
 0xd55   :  { %641 = vst.msk [vmem:[#allocation3 + $0x14] sm:$0xf] %vm472_vm6, %v636_v57  ;;  %v1085_v57 = vrot.slane %v1070_v55, %v3072_v22 }
 0xd57   :  { %v804_v45 = vpop.permute.xlu0 %803 }
 0xe08   :  { %v1014_v60 = vpop.f32.mrf.mxu1 }
 0xe09   :  { %v1021_v61 = vadd.f32 %v1014_v60, %v973_v56  ;;  %v1089_v60 = vrot.slane %v1070_v55, %v3077_v25 }
 0xe0a   :  { %v1016_v62 = vpop.f32.mrf.mxu1 }
 0xe0b   :  { %v2477_v63 = vmul.f32 -1.442695, %v1021_v61  ;;  %v1022_v7 = vadd.f32 %v1016_v62, %v974_v5 }
 0xe0c   :  { %v1018_v0 = vpop.f32.mrf.mxu1 }
 0xe0d   :  { %2773 = vpow2.f32 %v2477_v63 }
 0xe0e   :  { %v1019_v4 = vpop.f32.mrf.mxu1  ;;  %2775 = vtanh.f32 %v1022_v7 }
 0xe1a   :  { %v2774_v11 = vpop.eup %2773 }
 0xe1b   :  { %v1026_v12 = vadd.f32 1.0, %v2774_v11  ;;  %v2776_v8 = vpop.eup %2775 }
 0xe1d   :  { %2777 = vrcp.f32 %v1026_v12 }
 0xe2a   :  { %v2778_v9 = vpop.eup %2777 }
 0xe2b   :  { %v1037_v16 = vmul.f32 %v2778_v9, %v2776_v8  ;;  %v1036_v18 = vmul.f32 %v2778_v9, %v960_v50 }
 0xe2d   :  { %1039 = vrot.lane.b32.xlu1 %v1037_v16, %s2882_s24 }
 0xe31   :  { %551 = vrot.lane.b32.xlu1 %v3129_v27, %s2882_s24  ;;  %v2478_v27 = vmul.f32 -1.442695, %v1022_v7 }
 0xe33   :  { %2779 = vpow2.f32 %v2478_v27 }
 0xe40   :  { %v2780_v17 = vpop.eup %2779 }
 0xe41   :  { %v1033_v15 = vadd.f32 1.0, %v2780_v17 }
 0xe43   :  { %2781 = vrcp.f32 %v1033_v15 }
 0xe50   :  { %v2782_v26 = vpop.eup %2781 }
 0xe9f   :  { %v1040_v21 = vpop.permute.xlu1 %1039 }
 0xea0   :  { %v1042_v23 = vadd.f32 %v1040_v21, %v1036_v18 }
 0xea2   :  { %2783 = vtanh.f32 %v1042_v23 }
 0xea3   :  { %v552_v6 = vpop.permute.xlu1 %551 }
 0xea4   :  { %555 = vst.msk [vmem:[#allocation3 + $0x4] sm:$0xf] %vm469_vm5, %v552_v6 }
 0xea5   :  { %557 = vst.msk [vmem:[#allocation3 + $0x18] sm:$0xf] %vm472_vm6, %v552_v6  ;;  %971 = vst.msk [vmem:[#allocation3 + $0x4] sm:$0xf] %vm472_vm6, %v968_v51 }
 0xea6   :  { %970 = vst.msk [vmem:[#allocation3 + $0x18] sm:$0xf] %vm469_vm5, %v968_v51 }
 0xeaf   :  { %v2784_v58 = vpop.eup %2783 }
 0xeb0   :  { %v1044_v29 = vmul.f32 %v2784_v58, %v2782_v26 }
 0xeb2   :  { %v2592_v32 = vpack.c.bf16 %v1044_v29, %v1044_v29 }
 0xeb4   :  { %1049 = vrot.lane.b32.xlu1 %v2592_v32, %s2882_s24 }
 0xeb8   :  { %719 = vrot.lane.b32.xlu1 %v3163_v33, %s2882_s24  ;;  %v3271_v33 = vld [vmem:[%s3628_s7 + $0x24] ss:$8 sps:$4 sm:$0xff]  }
 0xeb9   :  { %1374 = vmatprep.subr.bf16.mxu1 %v3271_v33 }
 0xebc   :  { %885 = vrot.lane.b32.xlu1 %v3195_v31, %s2882_s24  ;;  %v3277_v31 = vld [vmem:[%s3628_s7 + $0x20] ss:$8 sps:$4 sm:$0xff]  }
 0xebd   :  { %1375 = vmatpush1.bf16.msra.mxu1 %v3277_v31 }
 0xebe   :  { %1376 = vmatprep.subr.bf16.mxu1 %v3283_v36 }
 0xec1   :  { %1377 = vmatpush1.bf16.msra.mxu1 %v3290_v37 }
 0xec2   :  { %1378 = vmatprep.subr.bf16.mxu1 %v3295_v38 }
 0xec5   :  { %1379 = vmatpush1.bf16.msra.mxu1 %v3301_v39 }
 0xec6   :  { %1458 = vmatprep.subr.bf16.mxu1 %v3257_v34 }
 0xec8   :  { %2512 = vmatmul.mubr.msk.bf16.vlgmr.msra.gmra.mxu1 %vm389_vm1, %v1320_v42 }
 0xec9   :  { %1459 = vmatpush1.bf16.msra.mxu1 %v3266_v35  ;;  %1482 = vmatprep.mubr.bf16.mxu1 %v2881_v1 }
 0xeca   :  { %1460 = vmatprep.subr.bf16.mxu1 %v3271_v33 }
 0xecd   :  { %1461 = vmatpush1.bf16.msra.mxu1 %v3277_v31 }
 0xece   :  { %1462 = vmatprep.subr.bf16.mxu1 %v3283_v36 }
 0xed1   :  { %1463 = vmatpush1.bf16.msra.mxu1 %v3290_v37 }
 0xed2   :  { %1464 = vmatprep.subr.bf16.mxu1 %v3295_v38 }
 0xed5   :  { %1465 = vmatpush1.bf16.msra.mxu1 %v3301_v39 }
 0xed6   :  { %1622 = vmatprep.subr.bf16.mxu1 %v3257_v34 }
 0xf26   :  { %v1050_v43 = vpop.permute.xlu1 %1049 }
 0xf27   :  { %1052 = vst.msk [vmem:[#allocation3 + $0x1c] sm:$0xf] %vm469_vm5, %v1050_v43 }
 0xf28   :  { %1053 = vst.msk [vmem:[#allocation3] sm:$0xf] %vm472_vm6, %v1050_v43 }
 0xf2a   :  { %v720_v44 = vpop.permute.xlu1 %719 }
 0xf2b   :  { %723 = vst.msk [vmem:[#allocation3 + $0xc] sm:$0xf] %vm469_vm5, %v720_v44 }
 0xf2c   :  { %725 = vst.msk [vmem:[#allocation3 + $0x10] sm:$0xf] %vm472_vm6, %v720_v44  ;;  %807 = vst.msk [vmem:[#allocation3 + $0xc] sm:$0xf] %vm472_vm6, %v804_v45 }
 0xf2d   :  { %806 = vst.msk [vmem:[#allocation3 + $0x10] sm:$0xf] %vm469_vm5, %v804_v45 }
 0xf2e   :  { %v886_v46 = vpop.permute.xlu1 %885  ;;  %v2656_v50 = vld [vmem:[#allocation3 + $0x18] sm:$0xff]  }
 0xf2f   :  { %v2645_v47 = vld [vmem:[#allocation3] sm:$0xff]   ;;  %888 = vst.msk [vmem:[#allocation3 + $0x14] sm:$0xf] %vm469_vm5, %v886_v46 }
 0xf30   :  { %889 = vst.msk [vmem:[#allocation3 + $0x8] sm:$0xf] %vm472_vm6, %v886_v46  ;;  %2492 = vmatmul.mubr.msk.bf16.vlgmr.msra.gmra.mxu0 %vm389_vm1, %v2645_v47 }
 0xf31   :  { %1206 = vmatprep.mubr.bf16.mxu0 %v2881_v1  ;;  %1541 = vmatpush1.bf16.msra.mxu0 %v3266_v35 }
 0xf32   :  { %1542 = vmatprep.subr.bf16.mxu0 %v3271_v33 }
 0xf35   :  { %1543 = vmatpush1.bf16.msra.mxu0 %v3277_v31 }
 0xf36   :  { %1544 = vmatprep.subr.bf16.mxu0 %v3283_v36  ;;  %v2649_v49 = vld [vmem:[#allocation3 + $0x10] sm:$0xff]  }
 0xf37   :  { %v2646_v48 = vld [vmem:[#allocation3 + $0x8] sm:$0xff]  }
 0xf38   :  { %2493 = vmatmul.mubr.msk.bf16.gmra.mxu0 %vm389_vm1, %v2646_v48 }
 0xf39   :  { %1216 = vmatprep.mubr.bf16.mxu0 %v2881_v1  ;;  %1545 = vmatpush1.bf16.msra.mxu0 %v3290_v37 }
 0xf3a   :  { %1546 = vmatprep.subr.bf16.mxu0 %v3295_v38 }
 0xf3d   :  { %1547 = vmatpush1.bf16.msra.mxu0 %v3301_v39 }
 0xf3e   :  { %1704 = vmatprep.subr.bf16.mxu0 %v3257_v34 }
 0xf40   :  { %2494 = vmatmul.mubr.msk.bf16.gmra.mxu0 %vm389_vm1, %v2649_v49 }
 0xf41   :  { %1226 = vmatprep.mubr.bf16.mxu0 %v2881_v1 }
 0xf48   :  { %2495 = vmatmul.mubr.msk.bf16.gmra.mxu0 %vm389_vm1, %v2656_v50 }
 0xf49   :  { %1564 = vmatprep.mubr.bf16.mxu0 %v2881_v1 }
 0xf88   :  { %v1398_v20 = vpop.f32.mrf.mxu1 }
 0xf8a   :  { %v1400_v53 = vpop.f32.mrf.mxu1 }
 0xf8c   :  { %v1402_v2 = vpop.f32.mrf.mxu1 }
 0xf8e   :  { %v1403_v54 = vpop.f32.mrf.mxu1 }
 0xff0   :  { %v1198_v59 = vpop.f32.mrf.mxu0 }
 0xff1   :  { %v1199_v44 = vadd.f32 %v1198_v59, %v1085_v57 }
 0xff2   :  { %v1200_v51 = vpop.f32.mrf.mxu0 }
 0xff3   :  { %v1201_v42 = vadd.f32 %v1200_v51, %v1089_v60 }
 0xff4   :  { %v1202_v56 = vpop.f32.mrf.mxu0 }
 0xff5   :  { %v1203_v61 = vadd.f32 %v1202_v56, %v1085_v57  ;;  %v2593_v50 = vpack.c.bf16 %v1201_v42, %v1199_v44 }
 0xff6   :  { %v1204_v62 = vpop.f32.mrf.mxu0 }
 0xff7   :  { %v1205_v63 = vadd.f32 %v1204_v62, %v1089_v60 }
 0xff8   :  { %v1208_v0 = vpop.f32.mrf.mxu0 }
 0xff9   :  { %v2594_v4 = vpack.c.bf16 %v1205_v63, %v1203_v61  ;;  %v1209_v5 = vadd.f32 %v1208_v0, %v1085_v57 }
 0xffa   :  { %v1210_v7 = vpop.f32.mrf.mxu0 }
 0xffb   :  { %v1211_v11 = vadd.f32 %v1210_v7, %v1089_v60  ;;  %v1422_v7 = vpop.permute.xlu0 %1421 }
 0xffc   :  { %v1212_v12 = vpop.f32.mrf.mxu0 }
 0xffd   :  { %v2595_v8 = vpack.c.bf16 %v1211_v11, %v1209_v5  ;;  %v1213_v9 = vadd.f32 %v1212_v12, %v1085_v57 }
 0xffe   :  { %v1214_v16 = vpop.f32.mrf.mxu0 }
 0xfff   :  { %v1215_v10 = vadd.f32 %v1214_v16, %v1089_v60 }
0x1000   :  { %v1218_v24 = vpop.f32.mrf.mxu0 }
0x1001   :  { %v2596_v13 = vpack.c.bf16 %v1215_v10, %v1213_v9  ;;  %v1219_v14 = vadd.f32 %v1218_v24, %v1085_v57 }
0x1002   :  { %v1220_v27 = vpop.f32.mrf.mxu0 }
0x1003   :  { %v1221_v17 = vadd.f32 %v1220_v27, %v1089_v60 }
0x1004   :  { %v1222_v15 = vpop.f32.mrf.mxu0 }
0x1005   :  { %v2597_v18 = vpack.c.bf16 %v1221_v17, %v1219_v14  ;;  %v1223_v21 = vadd.f32 %v1222_v15, %v1085_v57 }
0x1006   :  { %v1224_v23 = vpop.f32.mrf.mxu0 }
0x1007   :  { %v1225_v6 = vadd.f32 %v1224_v23, %v1089_v60  ;;  %v3354_v28 = vsel %vm3081_vm4, %v2596_v13, %v2597_v18  ;;  %v3358_v3 = vsel %vm3081_vm4, %v2597_v18, %v2596_v13 }
0x1008   :  { %v1228_v30 = vpop.f32.mrf.mxu0 }
0x1009   :  { %v2598_v19 = vpack.c.bf16 %v1225_v6, %v1223_v21  ;;  %v1229_v26 = vadd.f32 %v1228_v30, %v1085_v57 }
0x100a   :  { %v1230_v58 = vpop.f32.mrf.mxu0 }
0x100b   :  { %v1231_v29 = vadd.f32 %v1230_v58, %v1089_v60  ;;  %v3362_v32 = vsel %vm3081_vm4, %v2595_v8, %v2598_v19  ;;  %v3366_v40 = vsel %vm3081_vm4, %v2598_v19, %v2595_v8 }
0x100c   :  { %v1232_v41 = vpop.f32.mrf.mxu0 }
0x100d   :  { %v2599_v43 = vpack.c.bf16 %v1231_v29, %v1229_v26  ;;  %v1233_v46 = vadd.f32 %v1232_v41, %v1085_v57 }
0x100e   :  { %v1234_v45 = vpop.f32.mrf.mxu0 }
0x100f   :  { %v1235_v47 = vadd.f32 %v1234_v45, %v1089_v60  ;;  %v1301_v48 = vsel %vm3081_vm4, %v2594_v4, %v2599_v43  ;;  %v3372_v49 = vsel %vm3081_vm4, %v2599_v43, %v2594_v4 }
0x1010   :  { %v1443_v13 = vunpack.c.l.bf16 %v1301_v48  ;;  %v1444_v23 = vunpack.c.h.bf16 %v1301_v48 }
0x1011   :  { %v2600_v2 = vpack.c.bf16 %v1235_v47, %v1233_v46 }
0x1013   :  { %v1295_v54 = vsel %vm3081_vm4, %v2593_v50, %v2600_v2  ;;  %v3378_v55 = vsel %vm3081_vm4, %v2600_v2, %v2593_v50 }
0x1014   :  { %v1318_v59 = vunpack.c.l.bf16 %v1295_v54  ;;  %v1319_v56 = vunpack.c.h.bf16 %v1295_v54 }
0x1016   :  { %v1405_v51 = vadd.f32 %v1398_v20, %v1318_v59  ;;  %v1406_v60 = vadd.f32 %v1400_v53, %v1319_v56  ;;  %v1525_v59 = vunpack.c.l.bf16 %v3362_v32 }
0x1018   :  { %v2513_v57 = vmul.f32 -1.442695, %v1405_v51  ;;  %v2514_v5 = vmul.f32 -1.442695, %v1406_v60 }
0x101a   :  { %2785 = vpow2.f32 %v2513_v57 }
0x101b   :  { %2787 = vtanh.f32 %v1406_v60 }
0x1027   :  { %v2786_v61 = vpop.eup %2785 }
0x1028   :  { %v1410_v62 = vadd.f32 1.0, %v2786_v61  ;;  %v2788_v63 = vpop.eup %2787 }
0x102a   :  { %2789 = vrcp.f32 %v1410_v62 }
0x102b   :  { %2791 = vpow2.f32 %v2514_v5 }
0x1037   :  { %v2790_v0 = vpop.eup %2789 }
0x1038   :  { %v1425_v4 = vmul.f32 %v2790_v0, %v2788_v63  ;;  %v2792_v52 = vpop.eup %2791  ;;  %v1424_v12 = vmul.f32 %v2790_v0, %v1422_v7  ;;  %v1526_v63 = vunpack.c.h.bf16 %v3362_v32 }
0x1039   :  { %v1417_v11 = vadd.f32 1.0, %v2792_v52 }
0x103a   :  { %1427 = vrot.lane.b32.xlu1 %v1425_v4, %s2882_s24 }
0x103b   :  { %2793 = vrcp.f32 %v1417_v11 }
0x1048   :  { %v2794_v53 = vpop.eup %2793 }
0x10ac   :  { %v1428_v20 = vpop.permute.xlu1 %1427 }
0x10ad   :  { %v1430_v8 = vadd.f32 %v1428_v20, %v1424_v12 }
0x10af   :  { %2795 = vtanh.f32 %v1430_v8 }
0x10bc   :  { %v2796_v9 = vpop.eup %2795 }
0x10bd   :  { %v1432_v16 = vmul.f32 %v2796_v9, %v2794_v53 }
0x10bf   :  { %v3381_v10 = vpack.c.bf16 %v1432_v16, %v1432_v16 }
0x10c1   :  { %1445 = vrot.lane.b32.xlu0 %v3381_v10, %s2882_s24 }
0x1133   :  { %v1446_v24 = vpop.permute.xlu0 %1445 }
0x1134   :  { %2516 = vmatmul.mubr.msk.bf16.vlgmr.msra.gmra.mxu1 %vm389_vm1, %v1446_v24 }
0x1135   :  { %1623 = vmatpush1.bf16.msra.mxu1 %v3266_v35  ;;  %1646 = vmatprep.mubr.bf16.mxu1 %v2881_v1 }
0x1136   :  { %1624 = vmatprep.subr.bf16.mxu1 %v3271_v33 }
0x1139   :  { %1625 = vmatpush1.bf16.msra.mxu1 %v3277_v31 }
0x113a   :  { %1626 = vmatprep.subr.bf16.mxu1 %v3283_v36 }
0x113d   :  { %1627 = vmatpush1.bf16.msra.mxu1 %v3290_v37 }
0x113e   :  { %1628 = vmatprep.subr.bf16.mxu1 %v3295_v38 }
0x1141   :  { %1629 = vmatpush1.bf16.msra.mxu1 %v3301_v39 }
0x1142   :  { %1786 = vmatprep.subr.bf16.mxu1 %v3257_v34 }
0x11f4   :  { %v1484_v14 = vpop.f32.mrf.mxu1 }
0x11f5   :  { %v1491_v27 = vadd.f32 %v1484_v14, %v1443_v13 }
0x11f6   :  { %v1486_v17 = vpop.f32.mrf.mxu1 }
0x11f7   :  { %v2517_v15 = vmul.f32 -1.442695, %v1491_v27  ;;  %v1492_v6 = vadd.f32 %v1486_v17, %v1444_v23  ;;  %v1607_v17 = vunpack.c.l.bf16 %v3354_v28 }
0x11f8   :  { %v1488_v18 = vpop.f32.mrf.mxu1 }
0x11f9   :  { %2797 = vpow2.f32 %v2517_v15  ;;  %v2518_v41 = vmul.f32 -1.442695, %v1492_v6 }
0x11fa   :  { %v1489_v21 = vpop.f32.mrf.mxu1  ;;  %2799 = vtanh.f32 %v1492_v6 }
0x1206   :  { %v2798_v30 = vpop.eup %2797 }
0x1207   :  { %v1496_v19 = vadd.f32 1.0, %v2798_v30  ;;  %v2800_v26 = vpop.eup %2799 }
0x1209   :  { %2801 = vrcp.f32 %v1496_v19  ;;  %v1608_v19 = vunpack.c.h.bf16 %v3354_v28 }
0x120a   :  { %2803 = vpow2.f32 %v2518_v41 }
0x1216   :  { %v2802_v58 = vpop.eup %2801 }
0x1217   :  { %v1507_v29 = vmul.f32 %v2802_v58, %v2800_v26  ;;  %v2804_v42 = vpop.eup %2803  ;;  %v1506_v44 = vmul.f32 %v2802_v58, %v1430_v8 }
0x1218   :  { %v1503_v43 = vadd.f32 1.0, %v2804_v42 }
0x1219   :  { %1509 = vrot.lane.b32.xlu1 %v1507_v29, %s2882_s24 }
0x121a   :  { %2805 = vrcp.f32 %v1503_v43 }
0x1227   :  { %v2806_v47 = vpop.eup %2805 }
0x128b   :  { %v1510_v45 = vpop.permute.xlu1 %1509 }
0x128c   :  { %v1512_v46 = vadd.f32 %v1510_v45, %v1506_v44 }
0x128e   :  { %2807 = vtanh.f32 %v1512_v46 }
0x129b   :  { %v2808_v48 = vpop.eup %2807 }
0x129c   :  { %v1514_v50 = vmul.f32 %v2808_v48, %v2806_v47 }
0x129e   :  { %v3396_v2 = vpack.c.bf16 %v1514_v50, %v1514_v50 }
0x12a0   :  { %1527 = vrot.lane.b32.xlu0 %v3396_v2, %s2882_s24 }
0x1312   :  { %v1528_v54 = vpop.permute.xlu0 %1527 }
0x1313   :  { %2520 = vmatmul.mubr.msk.bf16.vlgmr.msra.gmra.mxu0 %vm389_vm1, %v1528_v54 }
0x1314   :  { %1705 = vmatpush1.bf16.msra.mxu0 %v3266_v35  ;;  %1728 = vmatprep.mubr.bf16.mxu0 %v2881_v1 }
0x1315   :  { %1706 = vmatprep.subr.bf16.mxu0 %v3271_v33 }
0x1318   :  { %1707 = vmatpush1.bf16.msra.mxu0 %v3277_v31 }
0x1319   :  { %1708 = vmatprep.subr.bf16.mxu0 %v3283_v36 }
0x131c   :  { %1709 = vmatpush1.bf16.msra.mxu0 %v3290_v37 }
0x131d   :  { %1710 = vmatprep.subr.bf16.mxu0 %v3295_v38 }
0x1320   :  { %1711 = vmatpush1.bf16.msra.mxu0 %v3301_v39 }
0x1321   :  { %1868 = vmatprep.subr.bf16.mxu0 %v3257_v34 }
0x13d3   :  { %v1566_v51 = vpop.f32.mrf.mxu0 }
0x13d4   :  { %v1573_v57 = vadd.f32 %v1566_v51, %v1525_v59 }
0x13d5   :  { %v1568_v56 = vpop.f32.mrf.mxu0 }
0x13d6   :  { %v2521_v60 = vmul.f32 -1.442695, %v1573_v57  ;;  %v1574_v0 = vadd.f32 %v1568_v56, %v1526_v63  ;;  %v1689_v57 = vunpack.c.l.bf16 %v3358_v3 }
0x13d7   :  { %v1570_v61 = vpop.f32.mrf.mxu0 }
0x13d8   :  { %2809 = vpow2.f32 %v2521_v60  ;;  %v2522_v12 = vmul.f32 -1.442695, %v1574_v0 }
0x13d9   :  { %v1571_v62 = vpop.f32.mrf.mxu0  ;;  %2811 = vtanh.f32 %v1574_v0 }
0x13e5   :  { %v2810_v4 = vpop.eup %2809 }
0x13e6   :  { %v1578_v5 = vadd.f32 1.0, %v2810_v4  ;;  %v2812_v52 = vpop.eup %2811  ;;  %v1690_v4 = vunpack.c.h.bf16 %v3358_v3 }
0x13e8   :  { %2813 = vrcp.f32 %v1578_v5 }
0x13e9   :  { %2815 = vpow2.f32 %v2522_v12 }
0x13f5   :  { %v2814_v7 = vpop.eup %2813 }
0x13f6   :  { %v1589_v11 = vmul.f32 %v2814_v7, %v2812_v52  ;;  %v2816_v20 = vpop.eup %2815  ;;  %v1588_v53 = vmul.f32 %v2814_v7, %v1512_v46 }
0x13f7   :  { %v1585_v8 = vadd.f32 1.0, %v2816_v20 }
0x13f8   :  { %1591 = vrot.lane.b32.xlu1 %v1589_v11, %s2882_s24 }
0x13f9   :  { %2817 = vrcp.f32 %v1585_v8 }
0x1406   :  { %v2818_v32 = vpop.eup %2817 }
0x146a   :  { %v1592_v9 = vpop.permute.xlu1 %1591 }
0x146b   :  { %v1594_v16 = vadd.f32 %v1592_v9, %v1588_v53 }
0x146d   :  { %2819 = vtanh.f32 %v1594_v16 }
0x147a   :  { %v2820_v24 = vpop.eup %2819 }
0x147b   :  { %v1596_v13 = vmul.f32 %v2820_v24, %v2818_v32 }
0x147d   :  { %v3413_v14 = vpack.c.bf16 %v1596_v13, %v1596_v13 }
0x147f   :  { %1609 = vrot.lane.b32.xlu0 %v3413_v14, %s2882_s24 }
0x14f1   :  { %v1610_v27 = vpop.permute.xlu0 %1609 }
0x14f2   :  { %2524 = vmatmul.mubr.msk.bf16.vlgmr.msra.gmra.mxu1 %vm389_vm1, %v1610_v27 }
0x14f3   :  { %1787 = vmatpush1.bf16.msra.mxu1 %v3266_v35  ;;  %1810 = vmatprep.mubr.bf16.mxu1 %v2881_v1 }
0x14f4   :  { %1788 = vmatprep.subr.bf16.mxu1 %v3271_v33 }
0x14f7   :  { %1789 = vmatpush1.bf16.msra.mxu1 %v3277_v31 }
0x14f8   :  { %1790 = vmatprep.subr.bf16.mxu1 %v3283_v36 }
0x14fb   :  { %1791 = vmatpush1.bf16.msra.mxu1 %v3290_v37 }
0x14fc   :  { %1792 = vmatprep.subr.bf16.mxu1 %v3295_v38 }
0x14ff   :  { %1793 = vmatpush1.bf16.msra.mxu1 %v3301_v39 }
0x1500   :  { %1950 = vmatprep.subr.bf16.mxu1 %v3257_v34 }
0x15b2   :  { %v1648_v15 = vpop.f32.mrf.mxu1 }
0x15b3   :  { %v1655_v18 = vadd.f32 %v1648_v15, %v1607_v17 }
0x15b4   :  { %v1650_v21 = vpop.f32.mrf.mxu1 }
0x15b5   :  { %v2525_v23 = vmul.f32 -1.442695, %v1655_v18  ;;  %v1656_v26 = vadd.f32 %v1650_v21, %v1608_v19  ;;  %v1771_v18 = vunpack.c.l.bf16 %v3366_v40 }
0x15b6   :  { %v1652_v6 = vpop.f32.mrf.mxu1 }
0x15b7   :  { %2821 = vpow2.f32 %v2525_v23  ;;  %v2526_v34 = vmul.f32 -1.442695, %v1656_v26 }
0x15b8   :  { %v1653_v30 = vpop.f32.mrf.mxu1  ;;  %2823 = vtanh.f32 %v1656_v26 }
0x15c4   :  { %v2822_v58 = vpop.eup %2821 }
0x15c5   :  { %v1660_v29 = vadd.f32 1.0, %v2822_v58  ;;  %v2824_v41 = vpop.eup %2823 }
0x15c7   :  { %2825 = vrcp.f32 %v1660_v29 }
0x15c8   :  { %2827 = vpow2.f32 %v2526_v34 }
0x15d4   :  { %v2826_v42 = vpop.eup %2825 }
0x15d5   :  { %v1671_v43 = vmul.f32 %v2826_v42, %v2824_v41  ;;  %v2828_v44 = vpop.eup %2827  ;;  %v1670_v46 = vmul.f32 %v2826_v42, %v1594_v16 }
0x15d6   :  { %v1667_v45 = vadd.f32 1.0, %v2828_v44 }
0x15d7   :  { %1673 = vrot.lane.b32.xlu1 %v1671_v43, %s2882_s24 }
0x15d8   :  { %2829 = vrcp.f32 %v1667_v45 }
0x15e5   :  { %v2830_v28 = vpop.eup %2829 }
0x1649   :  { %v1674_v47 = vpop.permute.xlu1 %1673 }
0x164a   :  { %v1676_v48 = vadd.f32 %v1674_v47, %v1670_v46 }
0x164c   :  { %2831 = vtanh.f32 %v1676_v48 }
0x1659   :  { %v2832_v50 = vpop.eup %2831 }
0x165a   :  { %v1678_v54 = vmul.f32 %v2832_v50, %v2830_v28 }
0x165c   :  { %v3430_v59 = vpack.c.bf16 %v1678_v54, %v1678_v54 }
0x165e   :  { %1691 = vrot.lane.b32.xlu0 %v3430_v59, %s2882_s24 }
0x16d0   :  { %v1692_v51 = vpop.permute.xlu0 %1691 }
0x16d1   :  { %2528 = vmatmul.mubr.msk.bf16.vlgmr.msra.gmra.mxu0 %vm389_vm1, %v1692_v51 }
0x16d2   :  { %1869 = vmatpush1.bf16.msra.mxu0 %v3266_v35  ;;  %1892 = vmatprep.mubr.bf16.mxu0 %v2881_v1 }
0x16d3   :  { %1870 = vmatprep.subr.bf16.mxu0 %v3271_v33 }
0x16d6   :  { %1871 = vmatpush1.bf16.msra.mxu0 %v3277_v31 }
0x16d7   :  { %1872 = vmatprep.subr.bf16.mxu0 %v3283_v36 }
0x16da   :  { %1873 = vmatpush1.bf16.msra.mxu0 %v3290_v37 }
0x16db   :  { %1874 = vmatprep.subr.bf16.mxu0 %v3295_v38 }
0x16de   :  { %1875 = vmatpush1.bf16.msra.mxu0 %v3301_v39 }
0x1791   :  { %v1730_v56 = vpop.f32.mrf.mxu0 }
0x1792   :  { %v1737_v60 = vadd.f32 %v1730_v56, %v1689_v57 }
0x1793   :  { %v1732_v61 = vpop.f32.mrf.mxu0 }
0x1794   :  { %v2529_v62 = vmul.f32 -1.442695, %v1737_v60  ;;  %v1738_v5 = vadd.f32 %v1732_v61, %v1690_v4  ;;  %v1854_v60 = vunpack.c.h.bf16 %v3372_v49 }
0x1795   :  { %v1734_v63 = vpop.f32.mrf.mxu0 }
0x1796   :  { %2833 = vpow2.f32 %v2529_v62  ;;  %v2530_v8 = vmul.f32 -1.442695, %v1738_v5 }
0x1797   :  { %v1735_v0 = vpop.f32.mrf.mxu0  ;;  %2835 = vtanh.f32 %v1738_v5 }
0x17a3   :  { %v2834_v52 = vpop.eup %2833 }
0x17a4   :  { %v1742_v7 = vadd.f32 1.0, %v2834_v52  ;;  %v2836_v11 = vpop.eup %2835 }
0x17a6   :  { %2837 = vrcp.f32 %v1742_v7 }
0x17a7   :  { %2839 = vpow2.f32 %v2530_v8 }
0x17b3   :  { %v2838_v12 = vpop.eup %2837 }
0x17b4   :  { %v1753_v20 = vmul.f32 %v2838_v12, %v2836_v11  ;;  %v2840_v53 = vpop.eup %2839  ;;  %v1752_v16 = vmul.f32 %v2838_v12, %v1676_v48  ;;  %v1853_v48 = vunpack.c.l.bf16 %v3372_v49 }
0x17b5   :  { %v1749_v9 = vadd.f32 1.0, %v2840_v53 }
0x17b6   :  { %1755 = vrot.lane.b32.xlu1 %v1753_v20, %s2882_s24 }
0x17b7   :  { %2841 = vrcp.f32 %v1749_v9 }
0x17c4   :  { %v2842_v3 = vpop.eup %2841 }
0x1828   :  { %v1756_v32 = vpop.permute.xlu1 %1755 }
0x1829   :  { %v1758_v24 = vadd.f32 %v1756_v32, %v1752_v16 }
0x182b   :  { %2843 = vtanh.f32 %v1758_v24 }
0x1838   :  { %v2844_v13 = vpop.eup %2843 }
0x1839   :  { %v1760_v27 = vmul.f32 %v2844_v13, %v2842_v3 }
0x183b   :  { %v3446_v17 = vpack.c.bf16 %v1760_v27, %v1760_v27 }
0x183d   :  { %1773 = vrot.lane.b32.xlu0 %v3446_v17, %s2882_s24 }
0x18af   :  { %v1774_v15 = vpop.permute.xlu0 %1773 }
0x18b0   :  { %2532 = vmatmul.mubr.msk.bf16.vlgmr.msra.gmra.mxu1 %vm389_vm1, %v1774_v15 }
0x18b1   :  { %1951 = vmatpush1.bf16.msra.mxu1 %v3266_v35  ;;  %1974 = vmatprep.mubr.bf16.mxu1 %v2881_v1 }
0x18b2   :  { %1952 = vmatprep.subr.bf16.mxu1 %v3271_v33 }
0x18b5   :  { %1953 = vmatpush1.bf16.msra.mxu1 %v3277_v31  ;;  %v1772_v31 = vunpack.c.h.bf16 %v3366_v40 }
0x18b6   :  { %1954 = vmatprep.subr.bf16.mxu1 %v3283_v36 }
0x18b9   :  { %1955 = vmatpush1.bf16.msra.mxu1 %v3290_v37 }
0x18ba   :  { %1956 = vmatprep.subr.bf16.mxu1 %v3295_v38 }
0x18bd   :  { %1957 = vmatpush1.bf16.msra.mxu1 %v3301_v39 }
0x18be   :  { %2328 = vmatprep.subr.bf16.mxu1 %v2881_v1 }
0x1970   :  { %v1812_v21 = vpop.f32.mrf.mxu1 }
0x1971   :  { %v1819_v35 = vadd.f32 %v1812_v21, %v1771_v18 }
0x1972   :  { %v1814_v23 = vpop.f32.mrf.mxu1 }
0x1973   :  { %v2533_v6 = vmul.f32 -1.442695, %v1819_v35  ;;  %v1820_v36 = vadd.f32 %v1814_v23, %v1772_v31  ;;  %v1936_v35 = vunpack.c.h.bf16 %v3378_v55 }
0x1974   :  { %v1816_v30 = vpop.f32.mrf.mxu1 }
0x1975   :  { %2845 = vpow2.f32 %v2533_v6  ;;  %v2534_v58 = vmul.f32 -1.442695, %v1820_v36 }
0x1976   :  { %v1817_v33 = vpop.f32.mrf.mxu1  ;;  %2847 = vtanh.f32 %v1820_v36 }
0x1982   :  { %v2846_v19 = vpop.eup %2845 }
0x1983   :  { %v1824_v37 = vadd.f32 1.0, %v2846_v19  ;;  %v2848_v38 = vpop.eup %2847  ;;  %v2661_v19 = vld [vmem:[%s3632_s11 + $0x30] ss:$8 sps:$4 sm:$0xff]  }
0x1985   :  { %2849 = vrcp.f32 %v1824_v37  ;;  %v2666_v37 = vld [vmem:[%s3632_s11 + $0x24] ss:$8 sps:$4 sm:$0xff]  }
0x1986   :  { %2851 = vpow2.f32 %v2534_v58 }
0x1992   :  { %v2850_v39 = vpop.eup %2849 }
0x1993   :  { %v1835_v26 = vmul.f32 %v2850_v39, %v2848_v38  ;;  %v2852_v29 = vpop.eup %2851  ;;  %v1834_v42 = vmul.f32 %v2850_v39, %v1758_v24  ;;  %v2664_v38 = vld [vmem:[%s3632_s11 + $0x20] ss:$8 sps:$4 sm:$0xff]  }
0x1994   :  { %v1831_v41 = vadd.f32 1.0, %v2852_v29 }
0x1995   :  { %1837 = vrot.lane.b32.xlu1 %v1835_v26, %s2882_s24 }
0x1996   :  { %2853 = vrcp.f32 %v1831_v41 }
0x19a3   :  { %v2854_v40 = vpop.eup %2853 }
0x1a07   :  { %v1838_v43 = vpop.permute.xlu1 %1837 }
0x1a08   :  { %v1840_v34 = vadd.f32 %v1838_v43, %v1834_v42  ;;  %v2667_v43 = vld [vmem:[%s3632_s11 + $0x10] ss:$8 sps:$4 sm:$0xff]  }
0x1a0a   :  { %2855 = vtanh.f32 %v1840_v34 }
0x1a17   :  { %v2856_v44 = vpop.eup %2855 }
0x1a18   :  { %v1842_v45 = vmul.f32 %v2856_v44, %v2854_v40  ;;  %v2672_v40 = vld [vmem:[%s3632_s11 + $0x4] ss:$8 sps:$4 sm:$0xff]   ;;  %v2670_v44 = vld [vmem:[%s3632_s11] ss:$8 sps:$4 sm:$0xff]  }
0x1a1a   :  { %v3463_v46 = vpack.c.bf16 %v1842_v45, %v1842_v45 }
0x1a1c   :  { %1855 = vrot.lane.b32.xlu0 %v3463_v46, %s2882_s24 }
0x1a8e   :  { %v1856_v47 = vpop.permute.xlu0 %1855 }
0x1a8f   :  { %2536 = vmatmul.mubr.msk.bf16.vlgmr.msra.gmra.mxu0 %vm389_vm1, %v1856_v47 }
0x1a90   :  { %2173 = vmatprep.mubr.bf16.mxu0 %v2881_v1 }
0x1b4f   :  { %v1894_v28 = vpop.f32.mrf.mxu0 }
0x1b50   :  { %v1901_v50 = vadd.f32 %v1894_v28, %v1853_v48 }
0x1b51   :  { %v1896_v54 = vpop.f32.mrf.mxu0 }
0x1b52   :  { %v2537_v51 = vmul.f32 -1.442695, %v1901_v50  ;;  %v1902_v61 = vadd.f32 %v1896_v54, %v1854_v60  ;;  %v2677_v50 = vld [vmem:[%s3633_s13 + $0x38] sm:$0xff]   ;;  %v2678_v54 = vld [vmem:[%s3633_s13 + $0x30] sm:$0xff]   ;;  %v2684_v60 = vld [vmem:[%s3633_s13] sm:$0xff]  }
0x1b53   :  { %v1898_v57 = vpop.f32.mrf.mxu0 }
0x1b54   :  { %2857 = vpow2.f32 %v2537_v51  ;;  %v2538_v52 = vmul.f32 -1.442695, %v1902_v61  ;;  %v2679_v51 = vld [vmem:[%s3633_s13 + $0x28] sm:$0xff]   ;;  %v2682_v57 = vld [vmem:[%s3633_s13 + $0x10] sm:$0xff]  }
0x1b55   :  { %v1899_v56 = vpop.f32.mrf.mxu0  ;;  %2859 = vtanh.f32 %v1902_v61  ;;  %v2685_v61 = vld [vmem:[%s3633_s13 + $0x58] sm:$0xff]  }
0x1b56   :  { %v2683_v56 = vld [vmem:[%s3633_s13 + $0x8] sm:$0xff]  }
0x1b61   :  { %v2858_v62 = vpop.eup %2857 }
0x1b62   :  { %v1906_v63 = vadd.f32 1.0, %v2858_v62  ;;  %v2860_v0 = vpop.eup %2859 }
0x1b64   :  { %2861 = vrcp.f32 %v1906_v63 }
0x1b65   :  { %2863 = vpow2.f32 %v2538_v52 }
0x1b71   :  { %v2862_v4 = vpop.eup %2861 }
0x1b72   :  { %v1917_v5 = vmul.f32 %v2862_v4, %v2860_v0  ;;  %v2864_v7 = vpop.eup %2863  ;;  %v1916_v12 = vmul.f32 %v2862_v4, %v1840_v34  ;;  %v2669_v34 = vld [vmem:[%s3632_s11 + $0x14] ss:$8 sps:$4 sm:$0xff]  }
0x1b73   :  { %v1913_v11 = vadd.f32 1.0, %v2864_v7 }
0x1b74   :  { %1919 = vrot.lane.b32.xlu1 %v1917_v5, %s2882_s24 }
0x1b75   :  { %2865 = vrcp.f32 %v1913_v11 }
0x1b82   :  { %v2866_v49 = vpop.eup %2865 }
0x1be6   :  { %v1920_v20 = vpop.permute.xlu1 %1919 }
0x1be7   :  { %v1922_v8 = vadd.f32 %v1920_v20, %v1916_v12  ;;  %v2686_v12 = vld [vmem:[%s3633_s13 + $0x50] sm:$0xff]   ;;  %v2687_v20 = vld [vmem:[%s3633_s13 + $0x48] sm:$0xff]  }
0x1be9   :  { %2867 = vtanh.f32 %v1922_v8 }
0x1bf6   :  { %v2868_v53 = vpop.eup %2867 }
0x1bf7   :  { %v1924_v9 = vmul.f32 %v2868_v53, %v2866_v49  ;;  %v2048_v49 = vld [vmem:[%s3634_s12] sm:$0x3] }
0x1bf9   :  { %v1925_v16 = vpack.c.bf16 %v1924_v9, %v1924_v9  ;;  %v2066_v9 = vrot.slane %v2048_v49, %v3077_v25 }
0x1bfb   :  { %1937 = vrot.lane.b32.xlu0 %v1925_v16, %s2882_s24 }
0x1bff   :  { %1437 = vrot.lane.b32.xlu0 %v3381_v10, %s2882_s24  ;;  %v1935_v10 = vunpack.c.l.bf16 %v3378_v55  ;;  %v2663_v55 = vld [vmem:[%s3632_s11 + $0x34] ss:$8 sps:$4 sm:$0xff]  }
0x1c00   :  { %2149 = vmatprep.subr.bf16.mxu0 %v2663_v55 }
0x1c01   :  { %2150 = vmatpush1.bf16.msra.mxu0 %v2661_v19 }
0x1c02   :  { %2151 = vmatprep.subr.bf16.mxu0 %v2666_v37 }
0x1c03   :  { %1929 = vrot.lane.b32.xlu0 %v1925_v16, %s2882_s24  ;;  %v2062_v16 = vrot.slane %v2048_v49, %v3072_v22 }
0x1c05   :  { %2152 = vmatpush1.bf16.msra.mxu0 %v2664_v38 }
0x1c06   :  { %2153 = vmatprep.subr.bf16.mxu0 %v2669_v34 }
0x1c07   :  { %1601 = vrot.lane.b32.xlu0 %v3413_v14, %s2882_s24 }
0x1c09   :  { %2154 = vmatpush1.bf16.msra.mxu0 %v2667_v43 }
0x1c0a   :  { %2155 = vmatprep.subr.bf16.mxu0 %v2672_v40 }
0x1c0b   :  { %1765 = vrot.lane.b32.xlu0 %v3446_v17, %s2882_s24 }
0x1c0d   :  { %2156 = vmatpush1.bf16.msra.mxu0 %v2670_v44 }
0x1c6d   :  { %v1938_v32 = vpop.permute.xlu0 %1937 }
0x1c6e   :  { %2540 = vmatmul.mubr.msk.bf16.vlgmr.msra.gmra.mxu1 %vm389_vm1, %v1938_v32 }
0x1c6f   :  { %2329 = vmatpush1.bf16.msra.mxu1 %v2677_v50 }
0x1c70   :  { %2330 = vmatprep.subr.bf16.mxu1 %v2881_v1 }
0x1c71   :  { %v1438_v24 = vpop.permute.xlu0 %1437 }
0x1c72   :  { %1440 = vst.msk [vmem:[#allocation3] sm:$0xf] %vm469_vm5, %v1438_v24 }
0x1c73   :  { %1441 = vst.msk [vmem:[#allocation3 + $0x1c] sm:$0xf] %vm472_vm6, %v1438_v24  ;;  %2331 = vmatpush1.bf16.msra.mxu1 %v2678_v54 }
0x1c74   :  { %2332 = vmatprep.subr.bf16.mxu1 %v2881_v1 }
0x1c75   :  { %v1930_v3 = vpop.permute.xlu0 %1929 }
0x1c77   :  { %2333 = vmatpush1.bf16.msra.mxu1 %v2679_v51 }
0x1c78   :  { %2334 = vmatprep.subr.bf16.mxu1 %v2881_v1 }
0x1c79   :  { %v1602_v13 = vpop.permute.xlu0 %1601 }
0x1c7a   :  { %1604 = vst.msk [vmem:[#allocation3 + $0x8] sm:$0xf] %vm469_vm5, %v1602_v13 }
0x1c7b   :  { %1605 = vst.msk [vmem:[#allocation3 + $0x14] sm:$0xf] %vm472_vm6, %v1602_v13 }
0x1c7d   :  { %v1766_v0 = vpop.permute.xlu0 %1765 }
0x1d2e   :  { %v1976_v14 = vpop.f32.mrf.mxu1 }
0x1d2f   :  { %v1983_v27 = vadd.f32 %v1976_v14, %v1935_v10 }
0x1d30   :  { %v1978_v15 = vpop.f32.mrf.mxu1 }
0x1d31   :  { %v2541_v17 = vmul.f32 -1.442695, %v1983_v27  ;;  %v1984_v23 = vadd.f32 %v1978_v15, %v1936_v35 }
0x1d32   :  { %v1980_v18 = vpop.f32.mrf.mxu1 }
0x1d33   :  { %2869 = vpow2.f32 %v2541_v17 }
0x1d34   :  { %v1981_v21 = vpop.f32.mrf.mxu1  ;;  %2871 = vtanh.f32 %v1984_v23 }
0x1d40   :  { %v2870_v6 = vpop.eup %2869 }
0x1d41   :  { %v1988_v30 = vadd.f32 1.0, %v2870_v6  ;;  %v2872_v33 = vpop.eup %2871 }
0x1d43   :  { %2873 = vrcp.f32 %v1988_v30 }
0x1d50   :  { %v2874_v31 = vpop.eup %2873 }
0x1d51   :  { %v1999_v36 = vmul.f32 %v2874_v31, %v2872_v33  ;;  %v1998_v58 = vmul.f32 %v2874_v31, %v1922_v8  ;;  %v2688_v8 = vld [vmem:[%s3633_s13 + $0x40] sm:$0xff]  }
0x1d53   :  { %2001 = vrot.lane.b32.xlu1 %v1999_v36, %s2882_s24 }
0x1d57   :  { %1519 = vrot.lane.b32.xlu1 %v3396_v2, %s2882_s24  ;;  %v2542_v2 = vmul.f32 -1.442695, %v1984_v23 }
0x1d59   :  { %2875 = vpow2.f32 %v2542_v2 }
0x1d66   :  { %v2876_v39 = vpop.eup %2875 }
0x1d67   :  { %v1995_v26 = vadd.f32 1.0, %v2876_v39 }
0x1d69   :  { %2877 = vrcp.f32 %v1995_v26 }
0x1d76   :  { %v2878_v45 = vpop.eup %2877 }
0x1dc5   :  { %v2002_v29 = vpop.permute.xlu1 %2001 }
0x1dc6   :  { %v2004_v41 = vadd.f32 %v2002_v29, %v1998_v58 }
0x1dc8   :  { %2879 = vtanh.f32 %v2004_v41 }
0x1dc9   :  { %v1520_v42 = vpop.permute.xlu1 %1519 }
0x1dca   :  { %1522 = vst.msk [vmem:[#allocation3 + $0x4] sm:$0xf] %vm469_vm5, %v1520_v42 }
0x1dcb   :  { %1523 = vst.msk [vmem:[#allocation3 + $0x18] sm:$0xf] %vm472_vm6, %v1520_v42  ;;  %1933 = vst.msk [vmem:[#allocation3 + $0x4] sm:$0xf] %vm472_vm6, %v1930_v3 }
0x1dcc   :  { %1932 = vst.msk [vmem:[#allocation3 + $0x18] sm:$0xf] %vm469_vm5, %v1930_v3 }
0x1dd5   :  { %v2880_v47 = vpop.eup %2879 }
0x1dd6   :  { %v2006_v48 = vmul.f32 %v2880_v47, %v2878_v45 }
0x1dd8   :  { %v2608_v28 = vpack.c.bf16 %v2006_v48, %v2006_v48 }
0x1dda   :  { %2011 = vrot.lane.b32.xlu1 %v2608_v28, %s2882_s24 }
0x1dde   :  { %1683 = vrot.lane.b32.xlu1 %v3430_v59, %s2882_s24  ;;  %v2680_v59 = vld [vmem:[%s3633_s13 + $0x20] sm:$0xff]  }
0x1ddf   :  { %2335 = vmatpush1.bf16.msra.mxu1 %v2680_v59 }
0x1de0   :  { %2336 = vmatprep.subr.bf16.mxu1 %v2881_v1 }
0x1de2   :  { %1847 = vrot.lane.b32.xlu1 %v3463_v46, %s2882_s24  ;;  %v2681_v46 = vld [vmem:[%s3633_s13 + $0x18] sm:$0xff]  }
0x1de3   :  { %2337 = vmatpush1.bf16.msra.mxu1 %v2681_v46 }
0x1de4   :  { %2338 = vmatprep.subr.bf16.mxu1 %v2881_v1 }
0x1de7   :  { %2339 = vmatpush1.bf16.msra.mxu1 %v2682_v57 }
0x1de8   :  { %2340 = vmatprep.subr.bf16.mxu1 %v2881_v1 }
0x1deb   :  { %2341 = vmatpush1.bf16.msra.mxu1 %v2683_v56 }
0x1dec   :  { %2342 = vmatprep.subr.bf16.mxu1 %v2881_v1 }
0x1def   :  { %2343 = vmatpush1.bf16.msra.mxu1 %v2684_v60 }
0x1df0   :  { %2352 = vmatprep.subr.bf16.mxu1 %v2881_v1 }
0x1df3   :  { %2353 = vmatpush2.bf16.msra.mxu1 %v2685_v61 }
0x1df4   :  { %2354 = vmatprep.subr.bf16.mxu1 %v2881_v1 }
0x1df7   :  { %2355 = vmatpush2.bf16.msra.mxu1 %v2686_v12 }
0x1df8   :  { %2356 = vmatprep.subr.bf16.mxu1 %v2881_v1 }
0x1dfb   :  { %2357 = vmatpush2.bf16.msra.mxu1 %v2687_v20 }
0x1dfc   :  { %2358 = vmatprep.subr.bf16.mxu1 %v2881_v1 }
0x1dff   :  { %2359 = vmatpush2.bf16.msra.mxu1 %v2688_v8 }
0x1e4c   :  { %v2012_v62 = vpop.permute.xlu1 %2011 }
0x1e4d   :  { %2014 = vst.msk [vmem:[#allocation3 + $0x1c] sm:$0xf] %vm469_vm5, %v2012_v62 }
0x1e4e   :  { %2015 = vst.msk [vmem:[#allocation3] sm:$0xf] %vm472_vm6, %v2012_v62 }
0x1e50   :  { %v1684_v63 = vpop.permute.xlu1 %1683 }
0x1e51   :  { %1686 = vst.msk [vmem:[#allocation3 + $0xc] sm:$0xf] %vm469_vm5, %v1684_v63 }
0x1e52   :  { %1687 = vst.msk [vmem:[#allocation3 + $0x10] sm:$0xf] %vm472_vm6, %v1684_v63  ;;  %1769 = vst.msk [vmem:[#allocation3 + $0xc] sm:$0xf] %vm472_vm6, %v1766_v0 }
0x1e53   :  { %1768 = vst.msk [vmem:[#allocation3 + $0x10] sm:$0xf] %vm469_vm5, %v1766_v0 }
0x1e54   :  { %v1848_v4 = vpop.permute.xlu1 %1847  ;;  %v2676_v11 = vld [vmem:[#allocation3 + $0x18] sm:$0xff]  }
0x1e55   :  { %v2673_v5 = vld [vmem:[#allocation3] sm:$0xff]   ;;  %1850 = vst.msk [vmem:[#allocation3 + $0x14] sm:$0xf] %vm469_vm5, %v1848_v4 }
0x1e56   :  { %1851 = vst.msk [vmem:[#allocation3 + $0x8] sm:$0xf] %vm472_vm6, %v1848_v4  ;;  %2556 = vmatmul.mubr.msk.bf16.vlgmr.msra.gmra.mxu0 %vm389_vm1, %v2673_v5 }
0x1e57   :  { %2183 = vmatprep.mubr.bf16.mxu0 %v2881_v1 }
0x1e5c   :  { %v2675_v7 = vld [vmem:[#allocation3 + $0x10] sm:$0xff]  }
0x1e5d   :  { %v2674_v52 = vld [vmem:[#allocation3 + $0x8] sm:$0xff]  }
0x1e5e   :  { %2557 = vmatmul.mubr.msk.bf16.gmra.mxu0 %vm389_vm1, %v2674_v52 }
0x1e5f   :  { %2193 = vmatprep.mubr.bf16.mxu0 %v2881_v1 }
0x1e66   :  { %2558 = vmatmul.mubr.msk.bf16.gmra.mxu0 %vm389_vm1, %v2675_v7  ;;  %v2560_v7 = vld [vmem:[%s3635_s14] ss:$0 sm:$0xff] }
0x1e67   :  { %2203 = vmatprep.mubr.bf16.mxu0 %v2881_v1 }
0x1e6e   :  { %2559 = vmatmul.mubr.msk.bf16.gmra.mxu0 %vm389_vm1, %v2676_v11 }
0x1f16   :  { %v2175_v53 = vpop.f32.mrf.mxu0 }
0x1f17   :  { %v2176_v10 = vadd.f32 %v2175_v53, %v2062_v16 }
0x1f18   :  { %v2177_v32 = vpop.f32.mrf.mxu0 }
0x1f19   :  { %v2178_v3 = vadd.f32 %v2177_v32, %v2066_v9  ;;  %v2214_v21 = vmax.f32 %v2176_v10, 0.0 }
0x1f1a   :  { %v2179_v24 = vpop.f32.mrf.mxu0 }
0x1f1b   :  { %v2180_v13 = vadd.f32 %v2179_v24, %v2062_v16  ;;  %v2215_v17 = vmax.f32 %v2178_v3, 0.0 }
0x1f1c   :  { %v2181_v1 = vpop.f32.mrf.mxu0 }
0x1f1d   :  { %v2182_v14 = vadd.f32 %v2181_v1, %v2066_v9  ;;  %v2216_v27 = vmax.f32 %v2180_v13, 0.0 }
0x1f1e   :  { %v2185_v15 = vpop.f32.mrf.mxu0 }
0x1f1f   :  { %v2217_v18 = vmax.f32 %v2182_v14, 0.0  ;;  %v2230_v6 = vpack.c.bf16 %v2216_v27, %v2214_v21  ;;  %v2186_v22 = vadd.f32 %v2185_v15, %v2062_v16 }
0x1f20   :  { %v2187_v35 = vpop.f32.mrf.mxu0 }
0x1f21   :  { %v2231_v23 = vpack.c.bf16 %v2217_v18, %v2215_v17  ;;  %v2188_v33 = vadd.f32 %v2187_v35, %v2066_v9  ;;  %v2218_v2 = vmax.f32 %v2186_v22, 0.0 }
0x1f22   :  { %v2189_v30 = vpop.f32.mrf.mxu0 }
0x1f23   :  { %v2190_v25 = vadd.f32 %v2189_v30, %v2062_v16  ;;  %2573 = vmatprep.mubr.msk.bf16.mxu1 %vm389_vm1, %v2231_v23  ;;  %v2219_v37 = vmax.f32 %v2188_v33, 0.0 }
0x1f24   :  { %v2191_v31 = vpop.f32.mrf.mxu0  ;;  %2361 = vmatmul.mubr.bf16.vlgmr.msra.gmra.mxu1 %v2230_v6 }
0x1f25   :  { %v2192_v36 = vadd.f32 %v2191_v31, %v2066_v9  ;;  %v2220_v19 = vmax.f32 %v2190_v25, 0.0 }
0x1f26   :  { %v2195_v55 = vpop.f32.mrf.mxu0 }
0x1f27   :  { %v2221_v38 = vmax.f32 %v2192_v36, 0.0  ;;  %v2232_v58 = vpack.c.bf16 %v2220_v19, %v2218_v2  ;;  %v2196_v43 = vadd.f32 %v2195_v55, %v2062_v16 }
0x1f28   :  { %v2197_v39 = vpop.f32.mrf.mxu0 }
0x1f29   :  { %v2233_v26 = vpack.c.bf16 %v2221_v38, %v2219_v37  ;;  %v2198_v41 = vadd.f32 %v2197_v39, %v2066_v9  ;;  %v2222_v28 = vmax.f32 %v2196_v43, 0.0 }
0x1f2a   :  { %v2199_v29 = vpop.f32.mrf.mxu0 }
0x1f2b   :  { %v2200_v42 = vadd.f32 %v2199_v29, %v2062_v16  ;;  %2574 = vmatprep.mubr.msk.bf16.mxu1 %vm389_vm1, %v2233_v26  ;;  %v2223_v47 = vmax.f32 %v2198_v41, 0.0 }
0x1f2c   :  { %v2201_v34 = vpop.f32.mrf.mxu0  ;;  %2369 = vmatmul.mubr.bf16.gmra.mxu1 %v2232_v58 }
0x1f2d   :  { %v2202_v40 = vadd.f32 %v2201_v34, %v2066_v9  ;;  %v2224_v44 = vmax.f32 %v2200_v42, 0.0 }
0x1f2e   :  { %v2205_v45 = vpop.f32.mrf.mxu0 }
0x1f2f   :  { %v2225_v48 = vmax.f32 %v2202_v40, 0.0  ;;  %v2234_v51 = vpack.c.bf16 %v2224_v44, %v2222_v28  ;;  %v2206_v56 = vadd.f32 %v2205_v45, %v2062_v16 }
0x1f30   :  { %v2207_v50 = vpop.f32.mrf.mxu0 }
0x1f31   :  { %v2235_v54 = vpack.c.bf16 %v2225_v48, %v2223_v47  ;;  %v2208_v46 = vadd.f32 %v2207_v50, %v2066_v9  ;;  %v2226_v4 = vmax.f32 %v2206_v56, 0.0 }
0x1f32   :  { %v2209_v59 = vpop.f32.mrf.mxu0 }
0x1f33   :  { %v2210_v57 = vadd.f32 %v2209_v59, %v2062_v16  ;;  %2575 = vmatprep.mubr.msk.bf16.mxu1 %vm389_vm1, %v2235_v54  ;;  %v2227_v63 = vmax.f32 %v2208_v46, 0.0 }
0x1f34   :  { %v2211_v60 = vpop.f32.mrf.mxu0  ;;  %2377 = vmatmul.mubr.bf16.gmra.mxu1 %v2234_v51 }
0x1f35   :  { %v2212_v61 = vadd.f32 %v2211_v60, %v2066_v9  ;;  %v2228_v62 = vmax.f32 %v2210_v57, 0.0 }
0x1f37   :  { %v2229_v0 = vmax.f32 %v2212_v61, 0.0  ;;  %v2236_v52 = vpack.c.bf16 %v2228_v62, %v2226_v4 }
0x1f39   :  { %v2237_v5 = vpack.c.bf16 %v2229_v0, %v2227_v63 }
0x1f3b   :  { %2576 = vmatprep.mubr.msk.bf16.mxu1 %vm389_vm1, %v2237_v5 }
0x1f3c   :  { %2385 = vmatmul.mubr.bf16.gmra.mxu1 %v2236_v52 }
0x1fe4   :  { %v2362_v11 = vpop.f32.mrf.mxu1 }
0x1fe5   :  { %v2363_v12 = vadd.f32 %v2560_v7, %v2362_v11 }
0x1fe6   :  { %v2364_v20 = vpop.f32.mrf.mxu1 }
0x1fe7   :  { %v2393_v8 = vmax.f32 %v2363_v12, 0.0 }
0x1fe8   :  { %v2365_v49 = vpop.f32.mrf.mxu1 }
0x1fe9   :  { %2401 = vst [vmem:[%s3636_s15] sm:$0xff] %v2393_v8  ;;  %v2366_v53 = vadd.f32 %v2560_v7, %v2365_v49 }
0x1fea   :  { %v2367_v9 = vpop.f32.mrf.mxu1 }
0x1feb   :  { %v2394_v16 = vmax.f32 %v2366_v53, 0.0 }
0x1fec   :  { %v2370_v32 = vpop.f32.mrf.mxu1 }
0x1fed   :  { %2402 = vst [vmem:[%s3636_s15 + $0x8] sm:$0xff] %v2394_v16  ;;  %v2371_v24 = vadd.f32 %v2560_v7, %v2370_v32 }
0x1fee   :  { %v2372_v3 = vpop.f32.mrf.mxu1 }
0x1fef   :  { %v2395_v13 = vmax.f32 %v2371_v24, 0.0 }
0x1ff0   :  { %v2373_v10 = vpop.f32.mrf.mxu1 }
0x1ff1   :  { %2403 = vst [vmem:[%s3636_s15 + $0x10] sm:$0xff] %v2395_v13  ;;  %v2374_v1 = vadd.f32 %v2560_v7, %v2373_v10 }
0x1ff2   :  { %v2375_v14 = vpop.f32.mrf.mxu1 }
0x1ff3   :  { %v2396_v27 = vmax.f32 %v2374_v1, 0.0 }
0x1ff4   :  { %v2378_v15 = vpop.f32.mrf.mxu1 }
0x1ff5   :  { %2404 = vst [vmem:[%s3636_s15 + $0x18] sm:$0xff] %v2396_v27  ;;  %v2379_v17 = vadd.f32 %v2560_v7, %v2378_v15 }
0x1ff6   :  { %v2380_v18 = vpop.f32.mrf.mxu1 }
0x1ff7   :  { %v2397_v21 = vmax.f32 %v2379_v17, 0.0 }
0x1ff8   :  { %v2381_v35 = vpop.f32.mrf.mxu1 }
0x1ff9   :  { %2405 = vst [vmem:[%s3636_s15 + $0x20] sm:$0xff] %v2397_v21  ;;  %v2382_v23 = vadd.f32 %v2560_v7, %v2381_v35 }
0x1ffa   :  { %v2383_v6 = vpop.f32.mrf.mxu1 }
0x1ffb   :  { %v2398_v30 = vmax.f32 %v2382_v23, 0.0 }
0x1ffc   :  { %v2386_v33 = vpop.f32.mrf.mxu1 }
0x1ffd   :  { %2406 = vst [vmem:[%s3636_s15 + $0x28] sm:$0xff] %v2398_v30  ;;  %v2387_v25 = vadd.f32 %v2560_v7, %v2386_v33 }
0x1ffe   :  { %v2388_v22 = vpop.f32.mrf.mxu1 }
0x1fff   :  { %v2399_v31 = vmax.f32 %v2387_v25, 0.0 }
0x2000   :  { %v2389_v36 = vpop.f32.mrf.mxu1 }
0x2001   :  { %2407 = vst [vmem:[%s3636_s15 + $0x30] sm:$0xff] %v2399_v31  ;;  %v2390_v19 = vadd.f32 %v2560_v7, %v2389_v36 }
0x2002   :  { %v2391_v55 = vpop.f32.mrf.mxu1 }
0x2003   :  { %v2400_v37 = vmax.f32 %v2390_v19, 0.0 }
0x2005   :  { %2408 = vst [vmem:[%s3636_s15 + $0x38] sm:$0xff] %v2400_v37 }

</bundles_post_ra>
